<compile_context>
chip_gen: v7x
topology: tpu7x:2x2x1
jax: 0.10.0
libtpu: 0.0.40
codegen_flags: <defaults>
</compile_context>

<pallas_src>
import functools

import jax
import jax.numpy as jnp
from jax.experimental import pallas as pl
from jax.experimental.pallas import tpu as pltpu


# Below this row count a pallas_call is pure fixed overhead -> plain XLA.
_PALLAS_MIN_ROWS = 128


def _round_up(x, m):
    return (x + m - 1) // m * m


def _pick_tn(n_out):
    # v6e/v7x MXU is 2x256x256: use 256-wide output panels whenever cout >= 256.
    return 256 if n_out >= 256 else 128


def _pick_tm(M):
    """Row tile: prefer an exact divisor (no padding copy of A), up to 512."""
    for cand in (512, 384, 256, 128):
        if M >= cand and M % cand == 0:
            return cand, M
    if M >= 4096:
        tm = 512
    elif M >= 1024:
        tm = 256
    else:
        tm = 128 if M >= 128 else _round_up(M, 8)
    return tm, _round_up(M, tm)


# ---------------------------------------------------------------------------
# Kernel 1: single-K-block MXU matmul (bf16 x bf16 -> f32) + bias, with an
# optional fused LeakyReLU epilogue and optional fused BatchNorm batch-stat
# side outputs (per-channel sum / sum-of-squares of the PRE-BIAS conv output,
# accumulated over the row-block grid axis).
# ---------------------------------------------------------------------------
def _mm_kernel(a_ref, w_ref, b_ref, o_ref, *stats_refs,
               fuse_leaky, with_stats, alpha):
    # Whole contraction in one dot: no k grid axis / accumulator scratch.
    z = jnp.dot(a_ref[...], w_ref[...], preferred_element_type=jnp.float32)

    if with_stats:
        s1_ref, s2_ref = stats_refs
        # program_id bound at TOP LEVEL only (never inside a pl.when body);
        # nesting it broke interpret-mode lowering.
        i = pl.program_id(1)
        zsum = jnp.sum(z, axis=0, keepdims=True)
        zsq = jnp.sum(z * z, axis=0, keepdims=True)

        @pl.when(i == 0)
        def _():
            s1_ref[...] = jnp.zeros_like(s1_ref)
            s2_ref[...] = jnp.zeros_like(s2_ref)

        s1_ref[...] += zsum
        s2_ref[...] += zsq

    y = z + b_ref[...]
    if fuse_leaky:
        y = jnp.where(y > 0, y, alpha * y)
    o_ref[...] = y.astype(o_ref.dtype)


def fused_matmul(a, w_p, bias_p, n_out, *, out_dtype=jnp.bfloat16,
                 fuse_leaky=False, with_stats=False, alpha=0.2):
    """out = a @ w + bias (+ optional LeakyReLU, + optional BN batch stats).

    a: [M, K].  w_p: [K, Np] bf16 (column-padded once at init).
    bias_p: [1, Np] f32.  Returns y[:M, :n_out]  (plus (sum, sumsq) of the
    pre-bias conv output when with_stats=True).
    """
    M, K = a.shape
    Kw, Np = w_p.shape
    assert Kw == K
    tn = _pick_tn(n_out)
    assert Np % tn == 0

    tm, Mp = _pick_tm(M)

    if a.dtype != jnp.bfloat16:
        a = a.astype(jnp.bfloat16)
    if Mp != M:
        # Padded rows must be exact zeros so they contribute nothing to stats.
        a = jnp.pad(a, ((0, Mp - M), (0, 0)))

    # j (cout panels) outer, i (row blocks) inner: the W panel's block index is
    # independent of i, so it stays VMEM-resident across all row blocks.
    grid = (Np // tn, Mp // tm)

    in_specs = [
        pl.BlockSpec((tm, K), lambda j, i: (i, 0)),
        pl.BlockSpec((K, tn), lambda j, i: (0, j)),   # resident across i
        pl.BlockSpec((1, tn), lambda j, i: (0, j)),
    ]

    if with_stats:
        out_shape = (jax.ShapeDtypeStruct((Mp, Np), out_dtype),
                     jax.ShapeDtypeStruct((1, Np), jnp.float32),
                     jax.ShapeDtypeStruct((1, Np), jnp.float32))
        out_specs = (pl.BlockSpec((tm, tn), lambda j, i: (i, j)),
                     pl.BlockSpec((1, tn), lambda j, i: (0, j)),
                     pl.BlockSpec((1, tn), lambda j, i: (0, j)))
        # Stats blocks are revisited/accumulated over the row axis.
        # TODO(synk): per-row-block partial stats would restore v7x megacore here.
        dims = ("parallel", "arbitrary")
    else:
        out_shape = jax.ShapeDtypeStruct((Mp, Np), out_dtype)
        out_specs = pl.BlockSpec((tm, tn), lambda j, i: (i, j))
        dims = ("parallel", "parallel")

    kernel = functools.partial(_mm_kernel, fuse_leaky=fuse_leaky,
                               with_stats=with_stats, alpha=alpha)

    res = pl.pallas_call(
        kernel,
        out_shape=out_shape,
        grid_spec=pltpu.PrefetchScalarGridSpec(
            num_scalar_prefetch=0,
            grid=grid,
            in_specs=in_specs,
            out_specs=out_specs,
        ),
        compiler_params=pltpu.CompilerParams(
            dimension_semantics=dims,
            vmem_limit_bytes=32 * 1024 * 1024),
    )(a, w_p, bias_p)

    if with_stats:
        y, s1, s2 = res
        return y[:M, :n_out], s1[0, :n_out], s2[0, :n_out]
    return res[:M, :n_out]


# ---------------------------------------------------------------------------
# Kernel 2: fused per-channel affine (BatchNorm) + LeakyReLU(0.2),
# tiled & pipelined over rows, lane-dense packing for narrow channel counts.
# ---------------------------------------------------------------------------
def _affine_leaky_kernel(x_ref, s_ref, t_ref, o_ref, *, alpha):
    y = x_ref[...].astype(jnp.float32) * s_ref[...] + t_ref[...]
    o_ref[...] = jnp.where(y > 0, y, alpha * y).astype(o_ref.dtype)


def affine_leaky(x, scale, shift, *, alpha=0.2, out_dtype=jnp.bfloat16,
                 block_rows=1024):
    """LeakyReLU(x * scale + shift) with per-channel scale/shift.  x: [M, C]."""
    # TODO(synk): fuse this pass into the next layer's A-tile load instead.
    M0, C0 = x.shape
    scale = scale.astype(jnp.float32)
    shift = shift.astype(jnp.float32)

    # Lane-dense packing: view [M, 64] as [M/2, 128] so stores are full-lane.
    if C0 < 128 and 128 % C0 == 0 and M0 % (128 // C0) == 0:
        g = 128 // C0
        x = x.reshape(M0 // g, C0 * g)
        scale = jnp.tile(scale, g)
        shift = jnp.tile(shift, g)

    M, C = x.shape
    tm = None
    for cand in (1024, 512, 256, 128):
        if cand <= block_rows and M >= cand and M % cand == 0:
            tm = cand
            break
    if tm is None:
        tm = min(block_rows, _round_up(M, 8))
    Mp = _round_up(M, tm)
    if Mp != M:
        x = jnp.pad(x, ((0, Mp - M), (0, 0)))

    out = pl.pallas_call(
        functools.partial(_affine_leaky_kernel, alpha=alpha),
        out_shape=jax.ShapeDtypeStruct((Mp, C), out_dtype),
        grid_spec=pltpu.PrefetchScalarGridSpec(
            num_scalar_prefetch=0,
            grid=(Mp // tm,),
            in_specs=[
                pl.BlockSpec((tm, C), lambda i: (i, 0)),
                pl.BlockSpec((1, C), lambda i: (0, 0)),
                pl.BlockSpec((1, C), lambda i: (0, 0)),
            ],
            out_specs=pl.BlockSpec((tm, C), lambda i: (i, 0)),
        ),
        compiler_params=pltpu.CompilerParams(
            dimension_semantics=("parallel",),
            vmem_limit_bytes=32 * 1024 * 1024),
    )(x, scale.reshape(1, C), shift.reshape(1, C))

    return out[:M].reshape(M0, C0)


# ---------------------------------------------------------------------------
# Conv2d(3x3, pad 1, stride s) = bf16 im2col patches + fused Pallas matmul.
# ---------------------------------------------------------------------------
def _im2col_3x3(x, stride):
    """x: [N,H,W,C] (bf16) -> A: [N*Ho*Wo, 9*C] bf16, plus (Ho, Wo)."""
    # TODO(synk): fold the 9 taps into the matmul grid (phase-decomposed input
    # + tap-indexed index_map) so this patch matrix is never materialized.
    N, H, W, C = x.shape
    xp = jnp.pad(x, ((0, 0), (1, 1), (1, 1), (0, 0)))
    Ho = (H + 2 - 3) // stride + 1
    Wo = (W + 2 - 3) // stride + 1
    cols = []
    for dh in range(3):
        for dw in range(3):
            cols.append(xp[:, dh:dh + (Ho - 1) * stride + 1:stride,
                           dw:dw + (Wo - 1) * stride + 1:stride, :])
    A = jnp.concatenate(cols, axis=-1).reshape(N * Ho * Wo, 9 * C)
    return A, Ho, Wo


# ---------------------------------------------------------------------------
# Parameters: weights reshaped to [K, cout], column-padded to the tile width
# and bf16-cast once at init; biases column-padded in f32.
# ---------------------------------------------------------------------------
def _make_conv(key, kh, kw, cin, cout):
    k1, k2 = jax.random.split(key)
    fan_in = kh * kw * cin
    bound = 1.0 / (fan_in ** 0.5)
    w = jax.random.normal(k1, (kh, kw, cin, cout), jnp.float32) * bound
    b = jax.random.uniform(k2, (cout,), jnp.float32, -bound, bound)
    K = kh * kw * cin
    Np = _round_up(cout, _pick_tn(cout))
    w_p = jnp.pad(w.reshape(K, cout), ((0, 0), (0, Np - cout))).astype(jnp.bfloat16)
    b_p = jnp.pad(b.reshape(1, cout), ((0, 0), (0, Np - cout)))
    return w_p, b_p


def init_params(key, base=64):
    keys = jax.random.split(key, 10)
    params = {"conv0": _make_conv(keys[0], 3, 3, 3, base)}

    chans = []
    for i in range(7):
        if i % 2 == 0:
            cin = cout = int(base * 2 ** (i / 2))
        else:
            cin = int(base * 2 ** ((i + 1) / 2 - 1))
            cout = int(base * 2 ** ((i + 1) / 2))
        chans.append((cin, cout))

    params["cbl"] = []
    for i, (cin, cout) in enumerate(chans):
        w_p, b_p = _make_conv(keys[1 + i], 3, 3, cin, cout)
        gamma = jnp.ones((cout,), jnp.float32)    # BatchNorm2d default weight
        beta = jnp.zeros((cout,), jnp.float32)    # BatchNorm2d default bias
        params["cbl"].append((w_p, b_p, gamma, beta))

    params["fc1"] = _make_conv(keys[8], 1, 1, 8 * base, 16 * base)   # 512 -> 1024
    params["fc2"] = _make_conv(keys[9], 1, 1, 16 * base, 1)          # 1024 -> 1
    return params


# ---------------------------------------------------------------------------
# Plain-XLA path for the tiny tail layers (M <= a few rows): Pallas dispatch
# overhead would dominate and the MXU cannot be filled.
# ---------------------------------------------------------------------------
def _cbl_block_small(A, w_p, b_p, gamma, beta, cout, eps, alpha):
    z = jnp.dot(A, w_p[:, :cout], preferred_element_type=jnp.float32) + b_p[0, :cout]
    mean = jnp.mean(z, axis=0)
    var = jnp.var(z, axis=0)                       # biased, matches BN training norm
    y = (z - mean) * jax.lax.rsqrt(var + eps) * gamma + beta
    return jnp.where(y > 0, y, alpha * y).astype(jnp.bfloat16)


# ---------------------------------------------------------------------------
# Forward pass (matches torch: sigmoid(net(x).view(batch)))
# NOTE: BatchNorm uses batch statistics (training-mode semantics, fresh module).
# ---------------------------------------------------------------------------
def discriminator_forward(x_nchw, params, eps=1e-5, alpha=0.2):
    x = jnp.transpose(x_nchw, (0, 2, 3, 1)).astype(jnp.bfloat16)  # NCHW -> NHWC
    N = x.shape[0]

    # Conv(3, 64, k3, p1) + LeakyReLU(0.2) — activation fused in matmul epilogue
    w_p, b_p = params["conv0"]
    A, Ho, Wo = _im2col_3x3(x, stride=1)
    if A.shape[0] >= _PALLAS_MIN_ROWS:
        y = fused_matmul(A, w_p, b_p, 64, fuse_leaky=True, alpha=alpha)
    else:
        z = jnp.dot(A, w_p[:, :64], preferred_element_type=jnp.float32) + b_p[0, :64]
        y = jnp.where(z > 0, z, alpha * z).astype(jnp.bfloat16)
    x = y.reshape(N, Ho, Wo, 64)

    # 7 x [Conv(k3,s2,p1) + BatchNorm (batch stats) + LeakyReLU(0.2)]
    for (w_p, b_p, gamma, beta) in params["cbl"]:
        cout = gamma.shape[0]
        A, Ho, Wo = _im2col_3x3(x, stride=2)
        M = A.shape[0]
        if M >= _PALLAS_MIN_ROWS:
            # Conv+bias in one Pallas matmul; per-channel sum / sumsq of the
            # PRE-BIAS conv output come back as fused side outputs (no extra
            # full-tensor HBM passes for mean/var; zero-padded rows contribute
            # nothing, and the shifted accumulation improves var conditioning).
            y, s1, s2 = fused_matmul(A, w_p, b_p, cout, with_stats=True)
            mean_z = s1 / M
            var = jnp.maximum(s2 / M - mean_z * mean_z, 0.0)   # biased variance
            mean = mean_z + b_p[0, :cout]                      # var is shift-invariant
            scale = gamma * jax.lax.rsqrt(var + eps)
            shift = beta - mean * scale
            y = affine_leaky(y, scale, shift, alpha=alpha)
        else:
            y = _cbl_block_small(A, w_p, b_p, gamma, beta, cout, eps, alpha)
        x = y.reshape(N, Ho, Wo, cout)

    # AdaptiveAvgPool2d(1): mean over spatial dims (tiny; plain-JAX glue, f32)
    x = jnp.mean(x.astype(jnp.float32), axis=(1, 2))   # [N, 512]

    # Conv2d(512, 1024, k1) + LeakyReLU(0.2)   (1x1 conv == matmul; M == batch)
    w_p, b_p = params["fc1"]
    if x.shape[0] >= _PALLAS_MIN_ROWS:
        x = fused_matmul(x, w_p, b_p, 1024, fuse_leaky=True, alpha=alpha)
    else:
        z = jnp.dot(x.astype(jnp.bfloat16), w_p[:, :1024],
                    preferred_element_type=jnp.float32) + b_p[0, :1024]
        x = jnp.where(z > 0, z, alpha * z)

    # Conv2d(1024, 1, k1)
    w_p, b_p = params["fc2"]
    if x.shape[0] >= _PALLAS_MIN_ROWS:
        x = fused_matmul(x, w_p, b_p, 1, out_dtype=jnp.float32)
    else:
        x = jnp.dot(x.astype(jnp.bfloat16), w_p[:, :1],
                    preferred_element_type=jnp.float32) + b_p[0, :1]

    return jax.nn.sigmoid(x.reshape(-1))               # sigmoid(view(batch))


if __name__ == "__main__":
    key = jax.random.PRNGKey(0)
    pkey, xkey = jax.random.split(key)
    params = init_params(pkey)

    # small input consistent with the module (NCHW, like torch.rand(B, 3, H, W))
    x = jax.random.uniform(xkey, (2, 3, 32, 32), dtype=jnp.float32)

    fwd = jax.jit(discriminator_forward)
    out = jax.block_until_ready(fwd(x, params))

    assert out.shape == (2,)
    assert bool(jnp.all(jnp.isfinite(out)))
    assert bool(jnp.all((out >= 0.0) & (out <= 1.0)))
    print("KERNEL_OK")
</pallas_src>

<mosaic_0001>
module attributes {stable_mosaic.version = 11 : i64} {
  func.func @_mm_kernel(%arg0: i32, %arg1: i32, %arg2: memref<512x27xbf16, #tpu.memory_space<vmem>>, %arg3: memref<27x128xbf16, #tpu.memory_space<vmem>>, %arg4: memref<1x128xf32, #tpu.memory_space<vmem>>, %arg5: memref<512x128xbf16, #tpu.memory_space<vmem>>) attributes {dimension_semantics = [#tpu.dimension_semantics<parallel>, #tpu.dimension_semantics<parallel>], iteration_bounds = array<i64: 1, 4>, scalar_prefetch = 0 : i64, scratch_operands = 0 : i64, tpu.core_type = #tpu.core_type<tc>, window_params = [{transform_indices = @transform_0, window_bounds = array<i64: 512, 27>}, {transform_indices = @transform_1, window_bounds = array<i64: 27, 128>}, {transform_indices = @transform_2, window_bounds = array<i64: 1, 128>}, {transform_indices = @transform_3, window_bounds = array<i64: 512, 128>}]} {
    %c0 = arith.constant 0 : index
    %c0_0 = arith.constant 0 : index
    %0 = vector.load %arg2[%c0, %c0_0] : memref<512x27xbf16, #tpu.memory_space<vmem>>, vector<512x27xbf16>
    %c0_1 = arith.constant 0 : index
    %c0_2 = arith.constant 0 : index
    %1 = vector.load %arg3[%c0_1, %c0_2] : memref<27x128xbf16, #tpu.memory_space<vmem>>, vector<27x128xbf16>
    %cst = arith.constant dense<0.000000e+00> : vector<512x128xf32>
    %2 = tpu.matmul %0, %1, %cst {dimension_numbers = #tpu.dot_dimension_numbers<[1], [0], [0], [1], [0, 0, 1, 1], [], []>} : vector<512x27xbf16>, vector<27x128xbf16>, vector<512x128xf32> -> vector<512x128xf32>
    %c0_3 = arith.constant 0 : index
    %c0_4 = arith.constant 0 : index
    %3 = vector.load %arg4[%c0_3, %c0_4] : memref<1x128xf32, #tpu.memory_space<vmem>>, vector<1x128xf32>
    %4 = vector.broadcast %3 : vector<1x128xf32> to vector<512x128xf32>
    %5 = arith.addf %2, %4 : vector<512x128xf32>
    %cst_5 = arith.constant 0.000000e+00 : f32
    %6 = vector.broadcast %cst_5 : f32 to vector<512x128xf32>
    %7 = arith.cmpf ogt, %5, %6 : vector<512x128xf32>
    %cst_6 = arith.constant 2.000000e-01 : f32
    %8 = vector.broadcast %cst_6 : f32 to vector<512x128xf32>
    %9 = arith.mulf %8, %5 : vector<512x128xf32>
    %10 = arith.select %7, %5, %9 : vector<512x128xi1>, vector<512x128xf32>
    %11 = arith.truncf %10 : vector<512x128xf32> to vector<512x128xbf16>
    %c0_7 = arith.constant 0 : index
    %c0_8 = arith.constant 0 : index
    %12 = vector.load %arg5[%c0_7, %c0_8] : memref<512x128xbf16, #tpu.memory_space<vmem>>, vector<512x128xbf16>
    tpu.vector_store %arg5[%c0_7, %c0_8], %11 {strides = array<i32>} : memref<512x128xbf16, #tpu.memory_space<vmem>>, vector<512x128xbf16>,
    return
  }
  func.func @transform_0(%arg0: i32, %arg1: i32) -> (i32, i32) {
    %c0_i32 = arith.constant 0 : i32
    %c0_i32_0 = arith.constant 0 : i32
    return %arg1, %c0_i32 : i32, i32
  }
  func.func @transform_1(%arg0: i32, %arg1: i32) -> (i32, i32) {
    %c0_i32 = arith.constant 0 : i32
    %c0_i32_0 = arith.constant 0 : i32
    return %c0_i32, %arg0 : i32, i32
  }
  func.func @transform_2(%arg0: i32, %arg1: i32) -> (i32, i32) {
    %c0_i32 = arith.constant 0 : i32
    %c0_i32_0 = arith.constant 0 : i32
    return %c0_i32, %arg0 : i32, i32
  }
  func.func @transform_3(%arg0: i32, %arg1: i32) -> (i32, i32) {
    %c0_i32 = arith.constant 0 : i32
    return %arg1, %arg0 : i32, i32
  }
}

module attributes {stable_mosaic.version = 11 : i64} {
  func.func @_mm_kernel(%arg0: i32, %arg1: i32, %arg2: memref<512x576xbf16, #tpu.memory_space<vmem>>, %arg3: memref<576x128xbf16, #tpu.memory_space<vmem>>, %arg4: memref<1x128xf32, #tpu.memory_space<vmem>>, %arg5: memref<512x128xbf16, #tpu.memory_space<vmem>>, %arg6: memref<1x128xf32, #tpu.memory_space<vmem>>, %arg7: memref<1x128xf32, #tpu.memory_space<vmem>>) attributes {dimension_semantics = [#tpu.dimension_semantics<parallel>, #tpu.dimension_semantics<arbitrary>], iteration_bounds = array<i64: 1, 1>, scalar_prefetch = 0 : i64, scratch_operands = 0 : i64, tpu.core_type = #tpu.core_type<tc>, window_params = [{transform_indices = @transform_0, window_bounds = array<i64: 512, 576>}, {transform_indices = @transform_1, window_bounds = array<i64: 576, 128>}, {transform_indices = @transform_2, window_bounds = array<i64: 1, 128>}, {transform_indices = @transform_3, window_bounds = array<i64: 512, 128>}, {transform_indices = @transform_4, window_bounds = array<i64: 1, 128>}, {transform_indices = @transform_5, window_bounds = array<i64: 1, 128>}]} {
    %c0 = arith.constant 0 : index
    %c0_0 = arith.constant 0 : index
    %0 = vector.load %arg2[%c0, %c0_0] : memref<512x576xbf16, #tpu.memory_space<vmem>>, vector<512x576xbf16>
    %c0_1 = arith.constant 0 : index
    %c0_2 = arith.constant 0 : index
    %1 = vector.load %arg3[%c0_1, %c0_2] : memref<576x128xbf16, #tpu.memory_space<vmem>>, vector<576x128xbf16>
    %cst = arith.constant dense<0.000000e+00> : vector<512x128xf32>
    %2 = tpu.matmul %0, %1, %cst {dimension_numbers = #tpu.dot_dimension_numbers<[1], [0], [0], [1], [0, 0, 1, 1], [], []>} : vector<512x576xbf16>, vector<576x128xbf16>, vector<512x128xf32> -> vector<512x128xf32>
    %cst_3 = arith.constant dense<0.000000e+00> : vector<128xf32>
    %3 = vector.multi_reduction <add>, %2, %cst_3 [0] : vector<512x128xf32> to vector<128xf32>
    %4 = vector.shape_cast %3 : vector<128xf32> to vector<1x128xf32>
    %5 = arith.mulf %2, %2 : vector<512x128xf32>
    %cst_4 = arith.constant dense<0.000000e+00> : vector<128xf32>
    %6 = vector.multi_reduction <add>, %5, %cst_4 [0] : vector<512x128xf32> to vector<128xf32>
    %7 = vector.shape_cast %6 : vector<128xf32> to vector<1x128xf32>
    %c0_i32 = arith.constant 0 : i32
    %8 = arith.cmpi eq, %arg1, %c0_i32 : i32
    %9 = arith.extui %8 : i1 to i32
    %c0_i32_5 = arith.constant 0 : i32
    %10 = arith.cmpi ne, %9, %c0_i32_5 : i32
    scf.if %10 {
      %cst_18 = arith.constant 0.000000e+00 : f32
      %22 = vector.broadcast %cst_18 : f32 to vector<1x128xf32>
      %c0_19 = arith.constant 0 : index
      %c0_20 = arith.constant 0 : index
      %23 = vector.load %arg6[%c0_19, %c0_20] : memref<1x128xf32, #tpu.memory_space<vmem>>, vector<1x128xf32>
      tpu.vector_store %arg6[%c0_19, %c0_20], %22 {strides = array<i32>} : memref<1x128xf32, #tpu.memory_space<vmem>>, vector<1x128xf32>,
      %cst_21 = arith.constant 0.000000e+00 : f32
      %24 = vector.broadcast %cst_21 : f32 to vector<1x128xf32>
      %c0_22 = arith.constant 0 : index
      %c0_23 = arith.constant 0 : index
      %25 = vector.load %arg7[%c0_22, %c0_23] : memref<1x128xf32, #tpu.memory_space<vmem>>, vector<1x128xf32>
      tpu.vector_store %arg7[%c0_22, %c0_23], %24 {strides = array<i32>} : memref<1x128xf32, #tpu.memory_space<vmem>>, vector<1x128xf32>,
    } else {
    }
    %c0_6 = arith.constant 0 : index
    %c0_7 = arith.constant 0 : index
    %11 = vector.load %arg6[%c0_6, %c0_7] : memref<1x128xf32, #tpu.memory_space<vmem>>, vector<1x128xf32>
    %12 = arith.addf %11, %4 : vector<1x128xf32>
    %c0_8 = arith.constant 0 : index
    %c0_9 = arith.constant 0 : index
    %13 = vector.load %arg6[%c0_8, %c0_9] : memref<1x128xf32, #tpu.memory_space<vmem>>, vector<1x128xf32>
    tpu.vector_store %arg6[%c0_8, %c0_9], %12 {strides = array<i32>} : memref<1x128xf32, #tpu.memory_space<vmem>>, vector<1x128xf32>,
    %c0_10 = arith.constant 0 : index
    %c0_11 = arith.constant 0 : index
    %14 = vector.load %arg7[%c0_10, %c0_11] : memref<1x128xf32, #tpu.memory_space<vmem>>, vector<1x128xf32>
    %15 = arith.addf %14, %7 : vector<1x128xf32>
    %c0_12 = arith.constant 0 : index
    %c0_13 = arith.constant 0 : index
    %16 = vector.load %arg7[%c0_12, %c0_13] : memref<1x128xf32, #tpu.memory_space<vmem>>, vector<1x128xf32>
    tpu.vector_store %arg7[%c0_12, %c0_13], %15 {strides = array<i32>} : memref<1x128xf32, #tpu.memory_space<vmem>>, vector<1x128xf32>,
    %c0_14 = arith.constant 0 : index
    %c0_15 = arith.constant 0 : index
    %17 = vector.load %arg4[%c0_14, %c0_15] : memref<1x128xf32, #tpu.memory_space<vmem>>, vector<1x128xf32>
    %18 = vector.broadcast %17 : vector<1x128xf32> to vector<512x128xf32>
    %19 = arith.addf %2, %18 : vector<512x128xf32>
    %20 = arith.truncf %19 : vector<512x128xf32> to vector<512x128xbf16>
    %c0_16 = arith.constant 0 : index
    %c0_17 = arith.constant 0 : index
    %21 = vector.load %arg5[%c0_16, %c0_17] : memref<512x128xbf16, #tpu.memory_space<vmem>>, vector<512x128xbf16>
    tpu.vector_store %arg5[%c0_16, %c0_17], %20 {strides = array<i32>} : memref<512x128xbf16, #tpu.memory_space<vmem>>, vector<512x128xbf16>,
    return
  }
  func.func @transform_0(%arg0: i32, %arg1: i32) -> (i32, i32) {
    %c0_i32 = arith.constant 0 : i32
    %c0_i32_0 = arith.constant 0 : i32
    return %arg1, %c0_i32 : i32, i32
  }
  func.func @transform_1(%arg0: i32, %arg1: i32) -> (i32, i32) {
    %c0_i32 = arith.constant 0 : i32
    %c0_i32_0 = arith.constant 0 : i32
    return %c0_i32, %arg0 : i32, i32
  }
  func.func @transform_2(%arg0: i32, %arg1: i32) -> (i32, i32) {
    %c0_i32 = arith.constant 0 : i32
    %c0_i32_0 = arith.constant 0 : i32
    return %c0_i32, %arg0 : i32, i32
  }
  func.func @transform_3(%arg0: i32, %arg1: i32) -> (i32, i32) {
    %c0_i32 = arith.constant 0 : i32
    return %arg1, %arg0 : i32, i32
  }
  func.func @transform_4(%arg0: i32, %arg1: i32) -> (i32, i32) {
    %c0_i32 = arith.constant 0 : i32
    %c0_i32_0 = arith.constant 0 : i32
    return %c0_i32, %arg0 : i32, i32
  }
  func.func @transform_5(%arg0: i32, %arg1: i32) -> (i32, i32) {
    %c0_i32 = arith.constant 0 : i32
    %c0_i32_0 = arith.constant 0 : i32
    return %c0_i32, %arg0 : i32, i32
  }
}

module attributes {stable_mosaic.version = 11 : i64} {
  func.func @_affine_leaky_kernel(%arg0: i32, %arg1: memref<256x128xbf16, #tpu.memory_space<vmem>>, %arg2: memref<1x128xf32, #tpu.memory_space<vmem>>, %arg3: memref<1x128xf32, #tpu.memory_space<vmem>>, %arg4: memref<256x128xbf16, #tpu.memory_space<vmem>>) attributes {dimension_semantics = [#tpu.dimension_semantics<parallel>], iteration_bounds = array<i64: 1>, scalar_prefetch = 0 : i64, scratch_operands = 0 : i64, tpu.core_type = #tpu.core_type<tc>, window_params = [{transform_indices = @transform_0, window_bounds = array<i64: 256, 128>}, {pipeline_mode = #tpu.pipeline_mode<synchronous>, transform_indices = @transform_1, window_bounds = array<i64: 1, 128>}, {pipeline_mode = #tpu.pipeline_mode<synchronous>, transform_indices = @transform_2, window_bounds = array<i64: 1, 128>}, {transform_indices = @transform_3, window_bounds = array<i64: 256, 128>}]} {
    %c0 = arith.constant 0 : index
    %c0_0 = arith.constant 0 : index
    %0 = vector.load %arg1[%c0, %c0_0] : memref<256x128xbf16, #tpu.memory_space<vmem>>, vector<256x128xbf16>
    %1 = arith.extf %0 : vector<256x128xbf16> to vector<256x128xf32>
    %c0_1 = arith.constant 0 : index
    %c0_2 = arith.constant 0 : index
    %2 = vector.load %arg2[%c0_1, %c0_2] : memref<1x128xf32, #tpu.memory_space<vmem>>, vector<1x128xf32>
    %3 = vector.broadcast %2 : vector<1x128xf32> to vector<256x128xf32>
    %4 = arith.mulf %1, %3 : vector<256x128xf32>
    %c0_3 = arith.constant 0 : index
    %c0_4 = arith.constant 0 : index
    %5 = vector.load %arg3[%c0_3, %c0_4] : memref<1x128xf32, #tpu.memory_space<vmem>>, vector<1x128xf32>
    %6 = vector.broadcast %5 : vector<1x128xf32> to vector<256x128xf32>
    %7 = arith.addf %4, %6 : vector<256x128xf32>
    %cst = arith.constant 0.000000e+00 : f32
    %8 = vector.broadcast %cst : f32 to vector<256x128xf32>
    %9 = arith.cmpf ogt, %7, %8 : vector<256x128xf32>
    %cst_5 = arith.constant 2.000000e-01 : f32
    %10 = vector.broadcast %cst_5 : f32 to vector<256x128xf32>
    %11 = arith.mulf %10, %7 : vector<256x128xf32>
    %12 = arith.select %9, %7, %11 : vector<256x128xi1>, vector<256x128xf32>
    %13 = arith.truncf %12 : vector<256x128xf32> to vector<256x128xbf16>
    %c0_6 = arith.constant 0 : index
    %c0_7 = arith.constant 0 : index
    %14 = vector.load %arg4[%c0_6, %c0_7] : memref<256x128xbf16, #tpu.memory_space<vmem>>, vector<256x128xbf16>
    tpu.vector_store %arg4[%c0_6, %c0_7], %13 {strides = array<i32>} : memref<256x128xbf16, #tpu.memory_space<vmem>>, vector<256x128xbf16>,
    return
  }
  func.func @transform_0(%arg0: i32) -> (i32, i32) {
    %c0_i32 = arith.constant 0 : i32
    %c0_i32_0 = arith.constant 0 : i32
    return %arg0, %c0_i32 : i32, i32
  }
  func.func @transform_1(%arg0: i32) -> (i32, i32) {
    %c0_i32 = arith.constant 0 : i32
    %c0_i32_0 = arith.constant 0 : i32
    %c0_i32_1 = arith.constant 0 : i32
    return %c0_i32, %c0_i32_0 : i32, i32
  }
  func.func @transform_2(%arg0: i32) -> (i32, i32) {
    %c0_i32 = arith.constant 0 : i32
    %c0_i32_0 = arith.constant 0 : i32
    %c0_i32_1 = arith.constant 0 : i32
    return %c0_i32, %c0_i32_0 : i32, i32
  }
  func.func @transform_3(%arg0: i32) -> (i32, i32) {
    %c0_i32 = arith.constant 0 : i32
    %c0_i32_0 = arith.constant 0 : i32
    return %arg0, %c0_i32 : i32, i32
  }
}

module attributes {stable_mosaic.version = 11 : i64} {
  func.func @_mm_kernel(%arg0: i32, %arg1: i32, %arg2: memref<128x576xbf16, #tpu.memory_space<vmem>>, %arg3: memref<576x128xbf16, #tpu.memory_space<vmem>>, %arg4: memref<1x128xf32, #tpu.memory_space<vmem>>, %arg5: memref<128x128xbf16, #tpu.memory_space<vmem>>, %arg6: memref<1x128xf32, #tpu.memory_space<vmem>>, %arg7: memref<1x128xf32, #tpu.memory_space<vmem>>) attributes {dimension_semantics = [#tpu.dimension_semantics<parallel>, #tpu.dimension_semantics<arbitrary>], iteration_bounds = array<i64: 1, 1>, scalar_prefetch = 0 : i64, scratch_operands = 0 : i64, tpu.core_type = #tpu.core_type<tc>, window_params = [{transform_indices = @transform_0, window_bounds = array<i64: 128, 576>}, {transform_indices = @transform_1, window_bounds = array<i64: 576, 128>}, {transform_indices = @transform_2, window_bounds = array<i64: 1, 128>}, {transform_indices = @transform_3, window_bounds = array<i64: 128, 128>}, {transform_indices = @transform_4, window_bounds = array<i64: 1, 128>}, {transform_indices = @transform_5, window_bounds = array<i64: 1, 128>}]} {
    %c0 = arith.constant 0 : index
    %c0_0 = arith.constant 0 : index
    %0 = vector.load %arg2[%c0, %c0_0] : memref<128x576xbf16, #tpu.memory_space<vmem>>, vector<128x576xbf16>
    %c0_1 = arith.constant 0 : index
    %c0_2 = arith.constant 0 : index
    %1 = vector.load %arg3[%c0_1, %c0_2] : memref<576x128xbf16, #tpu.memory_space<vmem>>, vector<576x128xbf16>
    %cst = arith.constant dense<0.000000e+00> : vector<128x128xf32>
    %2 = tpu.matmul %0, %1, %cst {dimension_numbers = #tpu.dot_dimension_numbers<[1], [0], [0], [1], [0, 0, 1, 1], [], []>} : vector<128x576xbf16>, vector<576x128xbf16>, vector<128x128xf32> -> vector<128x128xf32>
    %cst_3 = arith.constant dense<0.000000e+00> : vector<128xf32>
    %3 = vector.multi_reduction <add>, %2, %cst_3 [0] : vector<128x128xf32> to vector<128xf32>
    %4 = vector.shape_cast %3 : vector<128xf32> to vector<1x128xf32>
    %5 = arith.mulf %2, %2 : vector<128x128xf32>
    %cst_4 = arith.constant dense<0.000000e+00> : vector<128xf32>
    %6 = vector.multi_reduction <add>, %5, %cst_4 [0] : vector<128x128xf32> to vector<128xf32>
    %7 = vector.shape_cast %6 : vector<128xf32> to vector<1x128xf32>
    %c0_i32 = arith.constant 0 : i32
    %8 = arith.cmpi eq, %arg1, %c0_i32 : i32
    %9 = arith.extui %8 : i1 to i32
    %c0_i32_5 = arith.constant 0 : i32
    %10 = arith.cmpi ne, %9, %c0_i32_5 : i32
    scf.if %10 {
      %cst_18 = arith.constant 0.000000e+00 : f32
      %22 = vector.broadcast %cst_18 : f32 to vector<1x128xf32>
      %c0_19 = arith.constant 0 : index
      %c0_20 = arith.constant 0 : index
      %23 = vector.load %arg6[%c0_19, %c0_20] : memref<1x128xf32, #tpu.memory_space<vmem>>, vector<1x128xf32>
      tpu.vector_store %arg6[%c0_19, %c0_20], %22 {strides = array<i32>} : memref<1x128xf32, #tpu.memory_space<vmem>>, vector<1x128xf32>,
      %cst_21 = arith.constant 0.000000e+00 : f32
      %24 = vector.broadcast %cst_21 : f32 to vector<1x128xf32>
      %c0_22 = arith.constant 0 : index
      %c0_23 = arith.constant 0 : index
      %25 = vector.load %arg7[%c0_22, %c0_23] : memref<1x128xf32, #tpu.memory_space<vmem>>, vector<1x128xf32>
      tpu.vector_store %arg7[%c0_22, %c0_23], %24 {strides = array<i32>} : memref<1x128xf32, #tpu.memory_space<vmem>>, vector<1x128xf32>,
    } else {
    }
    %c0_6 = arith.constant 0 : index
    %c0_7 = arith.constant 0 : index
    %11 = vector.load %arg6[%c0_6, %c0_7] : memref<1x128xf32, #tpu.memory_space<vmem>>, vector<1x128xf32>
    %12 = arith.addf %11, %4 : vector<1x128xf32>
    %c0_8 = arith.constant 0 : index
    %c0_9 = arith.constant 0 : index
    %13 = vector.load %arg6[%c0_8, %c0_9] : memref<1x128xf32, #tpu.memory_space<vmem>>, vector<1x128xf32>
    tpu.vector_store %arg6[%c0_8, %c0_9], %12 {strides = array<i32>} : memref<1x128xf32, #tpu.memory_space<vmem>>, vector<1x128xf32>,
    %c0_10 = arith.constant 0 : index
    %c0_11 = arith.constant 0 : index
    %14 = vector.load %arg7[%c0_10, %c0_11] : memref<1x128xf32, #tpu.memory_space<vmem>>, vector<1x128xf32>
    %15 = arith.addf %14, %7 : vector<1x128xf32>
    %c0_12 = arith.constant 0 : index
    %c0_13 = arith.constant 0 : index
    %16 = vector.load %arg7[%c0_12, %c0_13] : memref<1x128xf32, #tpu.memory_space<vmem>>, vector<1x128xf32>
    tpu.vector_store %arg7[%c0_12, %c0_13], %15 {strides = array<i32>} : memref<1x128xf32, #tpu.memory_space<vmem>>, vector<1x128xf32>,
    %c0_14 = arith.constant 0 : index
    %c0_15 = arith.constant 0 : index
    %17 = vector.load %arg4[%c0_14, %c0_15] : memref<1x128xf32, #tpu.memory_space<vmem>>, vector<1x128xf32>
    %18 = vector.broadcast %17 : vector<1x128xf32> to vector<128x128xf32>
    %19 = arith.addf %2, %18 : vector<128x128xf32>
    %20 = arith.truncf %19 : vector<128x128xf32> to vector<128x128xbf16>
    %c0_16 = arith.constant 0 : index
    %c0_17 = arith.constant 0 : index
    %21 = vector.load %arg5[%c0_16, %c0_17] : memref<128x128xbf16, #tpu.memory_space<vmem>>, vector<128x128xbf16>
    tpu.vector_store %arg5[%c0_16, %c0_17], %20 {strides = array<i32>} : memref<128x128xbf16, #tpu.memory_space<vmem>>, vector<128x128xbf16>,
    return
  }
  func.func @transform_0(%arg0: i32, %arg1: i32) -> (i32, i32) {
    %c0_i32 = arith.constant 0 : i32
    %c0_i32_0 = arith.constant 0 : i32
    return %arg1, %c0_i32 : i32, i32
  }
  func.func @transform_1(%arg0: i32, %arg1: i32) -> (i32, i32) {
    %c0_i32 = arith.constant 0 : i32
    %c0_i32_0 = arith.constant 0 : i32
    return %c0_i32, %arg0 : i32, i32
  }
  func.func @transform_2(%arg0: i32, %arg1: i32) -> (i32, i32) {
    %c0_i32 = arith.constant 0 : i32
    %c0_i32_0 = arith.constant 0 : i32
    return %c0_i32, %arg0 : i32, i32
  }
  func.func @transform_3(%arg0: i32, %arg1: i32) -> (i32, i32) {
    %c0_i32 = arith.constant 0 : i32
    return %arg1, %arg0 : i32, i32
  }
  func.func @transform_4(%arg0: i32, %arg1: i32) -> (i32, i32) {
    %c0_i32 = arith.constant 0 : i32
    %c0_i32_0 = arith.constant 0 : i32
    return %c0_i32, %arg0 : i32, i32
  }
  func.func @transform_5(%arg0: i32, %arg1: i32) -> (i32, i32) {
    %c0_i32 = arith.constant 0 : i32
    %c0_i32_0 = arith.constant 0 : i32
    return %c0_i32, %arg0 : i32, i32
  }
}

module attributes {stable_mosaic.version = 11 : i64} {
  func.func @_affine_leaky_kernel(%arg0: i32, %arg1: memref<128x128xbf16, #tpu.memory_space<vmem>>, %arg2: memref<1x128xf32, #tpu.memory_space<vmem>>, %arg3: memref<1x128xf32, #tpu.memory_space<vmem>>, %arg4: memref<128x128xbf16, #tpu.memory_space<vmem>>) attributes {dimension_semantics = [#tpu.dimension_semantics<parallel>], iteration_bounds = array<i64: 1>, scalar_prefetch = 0 : i64, scratch_operands = 0 : i64, tpu.core_type = #tpu.core_type<tc>, window_params = [{transform_indices = @transform_0, window_bounds = array<i64: 128, 128>}, {pipeline_mode = #tpu.pipeline_mode<synchronous>, transform_indices = @transform_1, window_bounds = array<i64: 1, 128>}, {pipeline_mode = #tpu.pipeline_mode<synchronous>, transform_indices = @transform_2, window_bounds = array<i64: 1, 128>}, {transform_indices = @transform_3, window_bounds = array<i64: 128, 128>}]} {
    %c0 = arith.constant 0 : index
    %c0_0 = arith.constant 0 : index
    %0 = vector.load %arg1[%c0, %c0_0] : memref<128x128xbf16, #tpu.memory_space<vmem>>, vector<128x128xbf16>
    %1 = arith.extf %0 : vector<128x128xbf16> to vector<128x128xf32>
    %c0_1 = arith.constant 0 : index
    %c0_2 = arith.constant 0 : index
    %2 = vector.load %arg2[%c0_1, %c0_2] : memref<1x128xf32, #tpu.memory_space<vmem>>, vector<1x128xf32>
    %3 = vector.broadcast %2 : vector<1x128xf32> to vector<128x128xf32>
    %4 = arith.mulf %1, %3 : vector<128x128xf32>
    %c0_3 = arith.constant 0 : index
    %c0_4 = arith.constant 0 : index
    %5 = vector.load %arg3[%c0_3, %c0_4] : memref<1x128xf32, #tpu.memory_space<vmem>>, vector<1x128xf32>
    %6 = vector.broadcast %5 : vector<1x128xf32> to vector<128x128xf32>
    %7 = arith.addf %4, %6 : vector<128x128xf32>
    %cst = arith.constant 0.000000e+00 : f32
    %8 = vector.broadcast %cst : f32 to vector<128x128xf32>
    %9 = arith.cmpf ogt, %7, %8 : vector<128x128xf32>
    %cst_5 = arith.constant 2.000000e-01 : f32
    %10 = vector.broadcast %cst_5 : f32 to vector<128x128xf32>
    %11 = arith.mulf %10, %7 : vector<128x128xf32>
    %12 = arith.select %9, %7, %11 : vector<128x128xi1>, vector<128x128xf32>
    %13 = arith.truncf %12 : vector<128x128xf32> to vector<128x128xbf16>
    %c0_6 = arith.constant 0 : index
    %c0_7 = arith.constant 0 : index
    %14 = vector.load %arg4[%c0_6, %c0_7] : memref<128x128xbf16, #tpu.memory_space<vmem>>, vector<128x128xbf16>
    tpu.vector_store %arg4[%c0_6, %c0_7], %13 {strides = array<i32>} : memref<128x128xbf16, #tpu.memory_space<vmem>>, vector<128x128xbf16>,
    return
  }
  func.func @transform_0(%arg0: i32) -> (i32, i32) {
    %c0_i32 = arith.constant 0 : i32
    %c0_i32_0 = arith.constant 0 : i32
    return %arg0, %c0_i32 : i32, i32
  }
  func.func @transform_1(%arg0: i32) -> (i32, i32) {
    %c0_i32 = arith.constant 0 : i32
    %c0_i32_0 = arith.constant 0 : i32
    %c0_i32_1 = arith.constant 0 : i32
    return %c0_i32, %c0_i32_0 : i32, i32
  }
  func.func @transform_2(%arg0: i32) -> (i32, i32) {
    %c0_i32 = arith.constant 0 : i32
    %c0_i32_0 = arith.constant 0 : i32
    %c0_i32_1 = arith.constant 0 : i32
    return %c0_i32, %c0_i32_0 : i32, i32
  }
  func.func @transform_3(%arg0: i32) -> (i32, i32) {
    %c0_i32 = arith.constant 0 : i32
    %c0_i32_0 = arith.constant 0 : i32
    return %arg0, %c0_i32 : i32, i32
  }
}

</mosaic_0001>

<bundles_post_ra>
// kernel: discriminator_forward.5
= control target key start
LH: loop header
LB: loop body
LE: loop exit
PB: predicated region body
PF: predicated region fallthrough
CT: control target
= control target key end

     0   :  { %8 = vsyncpa [#allocation3], 0  ;;  %s2486_s0 = inlined_call_operand.vmem [shape: bf16[2048,27], index: 0, kind: input, shape index: {}]   ;;  %s2487_s1 = inlined_call_operand.hbm [shape: bf16[27,128], index: 1, kind: input, shape index: {}]   ;;  %s2488_s2 = inlined_call_operand.hbm [shape: f32[1,128], index: 2, kind: input, shape index: {}]   ;;  %s2489_s3 = inlined_call_operand.vmem [shape: bf16[2048,128], index: 3, kind: output, shape index: {}]  }
   0x1   :  { %9 = vsyncpa [#allocation5], 0  ;;  %s2191_s12 = smov 0   ;;  %s2193_s13 = smov 0  }
   0x2   :  { %s2195_s14 = smov 0  }
   0x3 LB: > { %s1489_s15 = sadd.s32 4294967295, %s2164_s14   ;;  %s24_s16 = sadd.s32 1, %s2160_s13  ;;  %s2164_s14 = sphi %s2195_s14, %s15_s14   ;;  %s2160_s13 = sphi %s2193_s13, %s2499_s13   ;;  %s2156_s12 = sphi %s2191_s12, %s2498_s12  }
   0x4   : > { %p25_p0 = scmp.ge.s32.totalorder %s24_s16, 4  ;;  %p1491_p1 = scmp.ge.s32.totalorder %s2164_s14, 1 }
   0x5   : > { %p138_p2 = scmp.lt.s32.totalorder %s2164_s14, 5  ;;  %p2216_p4 = scmp.eq.s32.totalorder %s1489_s15, 0 }
   0x6   : > { %s2501_s16 = smov (%p25_p0, %s24_s16), 0  ;;  %s2166_s19 = smov [#allocation2]  }
   0x7   : > { %p2212_p3 = pnand %p1491_p1, %p138_p2  ;;  %s152_s20 = sshll.u32 %s2166_s19, 4  ;;  %s153_s20 = int_to_ptr.vmem [resolvable:$true] %s152_s20 }
   0x8   : > { %s2494_s18 = scalar_select %p2216_p4, 1, 0 }
   0x9   : > { %s2493_s17 = scalar_select %p2212_p3, 1, 0 }
   0xa   : > { %p2004_p5 = pneg %p2212_p3  ;;  %s2167_s22 = smov [#allocation4]  }
   0xb   : > { %s168_s23 = sshll.u32 %s2167_s22, 4  ;;  %s2078_s26 = scalar_lea.hbm %s2487_s1, 256  ;;  %s2228_s23 = int_to_ptr.vmem [resolvable:$true] %s168_s23 }
   0xc   : > { %p2224_p6 = pnand %p2216_p4, %p2004_p5  ;;  %p2079_p7 = scmp.ne.s32.totalorder %s2487_s1, %s2078_s26 }
   0xd   : > { %p2085_p11 = scmp.lt.u32.totalorder %s2078_s26, %s2487_s1 }
   0xe   : > { %p2080_p8 = pneg %p2224_p6 }
  0x10   : > { %p2081_p9 = pnand %p2080_p8, %p2079_p7 }
  0x12   : > { %p2082_p10 = pneg %p2081_p9 }
  0x14   : > { %p2087_p12 = pnand %p2085_p11, %p2082_p10 }
  0x16   : > { %2090 = shalt.err (!%p2087_p12)
}
  0x17   : > { %s2091_s4 = scalar_lea.vmem %s153_s20, 256  ;;  %p2099_p2 = scmp.lt.s32.totalorder %s153_s20, %s153_s20 }
  0x18   : > { %p2092_p13 = scmp.ne.s32.totalorder %s153_s20, %s2091_s4  ;;  %p2100_p5 = scmp.lt.s32.totalorder %s2091_s4, %s2091_s4 }
  0x1a   : > { %p2094_p0 = pnand %p2092_p13, %p2080_p8  ;;  %p2101_p4 = por %p2100_p5, %p2099_p2 }
  0x1c   : > { %p2095_p1 = pneg %p2094_p0 }
  0x1e   : > { %p2102_p3 = pnand %p2101_p4, %p2095_p1 }
  0x20   : > { %2105 = shalt.err (!%p2102_p3)
}
  0x21   : > { %s2168_s5 = smov 64   ;;  %s2169_s6 = smov 4  }
  0x22   : > { %2007 = dma.hbm_to_vmem [thread:$0]  (!%p2224_p6), %s2487_s1, 256, %s153_s20, [#allocation3], %s2168_s5, %s2168_s5, %s2169_s6  }
  0x23   : > { %s2106_s11 = scalar_lea.hbm %s2488_s2, 16 }
  0x24   : > { %p2107_p7 = scmp.ne.s32.totalorder %s2488_s2, %s2106_s11  ;;  %p2113_p9 = scmp.lt.u32.totalorder %s2106_s11, %s2488_s2 }
  0x26   : > { %p2109_p3 = pnand %p2107_p7, %p2080_p8 }
  0x28   : > { %p2110_p4 = pneg %p2109_p3 }
  0x2a   : > { %p2115_p10 = pnand %p2113_p9, %p2110_p4 }
  0x2c   : > { %2118 = shalt.err (!%p2115_p10)
}
  0x2d   : > { %s2119_s20 = scalar_lea.vmem %s2228_s23, 16  ;;  %s2126_s25 = scalar_lea.vmem %s2228_s23, 32 }
  0x2e   : > { %p2120_p11 = scmp.ne.s32.totalorder %s2228_s23, %s2119_s20  ;;  %p2127_p0 = scmp.lt.s32.totalorder %s2228_s23, %s2228_s23 }
  0x2f   : > { %p2128_p1 = scmp.lt.s32.totalorder %s2126_s25, %s2119_s20 }
  0x30   : > { %p2122_p12 = pnand %p2120_p11, %p2080_p8 }
  0x31   : > { %p2129_p2 = por %p2128_p1, %p2127_p0 }
  0x32   : > { %p2123_p13 = pneg %p2122_p12 }
  0x34   : > { %p2130_p5 = pnand %p2129_p2, %p2123_p13 }
  0x36   : > { %2133 = shalt.err (!%p2130_p5)
}
  0x37   : > { %2010 = dma.hbm_to_vmem [thread:$0]  (!%p2224_p6), %s2488_s2, 16, %s2228_s23, [#allocation5]  }
  0x38   : > { %p2496_p7 = scmp.ne.s32.totalorder %s2493_s17, 0 }
  0x39   : > { %p2497_p8 = scmp.ne.s32.totalorder (!%p2496_p7), %s2494_s18, 0 }
  0x3a   : > { %190 = sbr.rel (%p2496_p7) target bundleno = 367 (0x16f), region = 32 }
  0x41   : > { %2147 = dma.done.wait (%p2497_p8), [#allocation3], 256  }
  0x42   : > { %2149 = vsyncadd (%p2497_p8), [#allocation3], 4294967040 }
  0x43   : > { %2151 = dma.done.wait (%p2497_p8), [#allocation5], 16  }
  0x44   : > { %2153 = vsyncadd (%p2497_p8), [#allocation5], 4294967280  ;;  %s1498_s21 = sshll.u32 %s2156_s12, 6  ;;  %vm580_vm0 = vcmask 1044480   ;;  %vm581_vm1 = vcmask 1045504   ;;  %v2170_v0 = vmov 65535  }
  0x45   : > { %p222_p3 = scmp.lt.s32.totalorder %s1498_s21, 255  ;;  %v582_v1 = vsel %vm580_vm0, 4294967295, %v2170_v0  ;;  %vm483_vm2 = vcmask 220160   ;;  %v2044_v2 = vld [vmem:[#allocation2] sm:$0xff]   ;;  %v2045_v4 = vld [vmem:[#allocation2 + $0x8] sm:$0x3f]  }
  0x46   : > { %v583_v3 = vsel %vm581_vm1, %v582_v1, 0  ;;  %1924 = vmatprep.subr.bf16.mxu0 %v2044_v2  ;;  %1992 = vmatprep.subr.bf16.mxu1 %v2044_v2  ;;  %v2363_v38 = vld [vmem:[#allocation4] ss:$0 sm:$0xff] }
  0x47   : > { %s2503_s21 = smov (!%p222_p3, %s1498_s21), 255  ;;  %1925 = vmatpush3.bf16.msra.mxu0 %v2044_v2  ;;  %1994 = vmatpush3.bf16.msra.mxu1 %v2044_v2  ;;  %v585_v6 = vand.u32 %v2045_v4, %v583_v3 }
  0x48   : > { %s1499_s17 = sshll.u32 %s2503_s21, 2 }
  0x49   : > { %s2297_s29 = scalar_lea.vmem %s2486_s0, %s1499_s17  ;;  %1926 = vmatprep.subr.bf16.mxu0 %v585_v6  ;;  %1993 = vmatprep.subr.bf16.mxu1 %v585_v6  ;;  %s2380_s30 = scalar_lea.vmem %s2489_s3, %s1499_s17 }
  0x4a   : > { %v2046_v5 = vld [vmem:[%s2297_s29] sm:$0xff]   ;;  %v2048_v8 = vld [vmem:[%s2297_s29 + $0x8] sm:$0xff]   ;;  %v2050_v10 = vld [vmem:[%s2297_s29 + $0x10] sm:$0xff]  }
  0x4b   : > { %v2047_v7 = vld [vmem:[%s2297_s29 + $0x80] sm:$0xff]   ;;  %1928 = vmatprep.mubr.msk.bf16.mxu0 %vm483_vm2, %v2046_v5  ;;  %v2049_v9 = vld [vmem:[%s2297_s29 + $0x88] sm:$0xff]   ;;  %1927 = vmatpush3.bf16.msra.mxu0 %v585_v6  ;;  %v2051_v11 = vld [vmem:[%s2297_s29 + $0x90] sm:$0xff]  }
  0x4c   : > { %1960 = vmatprep.mubr.msk.bf16.mxu1 %vm483_vm2, %v2047_v7  ;;  %1995 = vmatpush3.bf16.msra.mxu1 %v585_v6  ;;  %v2052_v12 = vld [vmem:[%s2297_s29 + $0x18] sm:$0xff]   ;;  %v2054_v14 = vld [vmem:[%s2297_s29 + $0x20] sm:$0xff]   ;;  %v2056_v16 = vld [vmem:[%s2297_s29 + $0x28] sm:$0xff]  }
  0x4d   : > { %v2053_v13 = vld [vmem:[%s2297_s29 + $0x98] sm:$0xff]   ;;  %v2055_v15 = vld [vmem:[%s2297_s29 + $0xa0] sm:$0xff]   ;;  %v2057_v17 = vld [vmem:[%s2297_s29 + $0xa8] sm:$0xff]  }
  0x4e   : > { %1929 = vmatmul.mubr.msk.bf16.vlgmr.msra.gmra.mrb[0].mxu0 %vm483_vm2, %v2048_v8  ;;  %v2058_v18 = vld [vmem:[%s2297_s29 + $0x30] sm:$0xff]   ;;  %v2060_v20 = vld [vmem:[%s2297_s29 + $0x38] sm:$0xff]   ;;  %v2062_v22 = vld [vmem:[%s2297_s29 + $0x40] sm:$0xff]  }
  0x4f   : > { %1961 = vmatmul.mubr.msk.bf16.vlgmr.msra.gmra.mrb[0].mxu1 %vm483_vm2, %v2049_v9  ;;  %1932 = vmatprep.mubr.msk.bf16.mxu0 %vm483_vm2, %v2050_v10  ;;  %v2059_v19 = vld [vmem:[%s2297_s29 + $0xb0] sm:$0xff]   ;;  %v2061_v21 = vld [vmem:[%s2297_s29 + $0xb8] sm:$0xff]   ;;  %v2063_v23 = vld [vmem:[%s2297_s29 + $0xc0] sm:$0xff]  }
  0x50   : > { %1964 = vmatprep.mubr.msk.bf16.mxu1 %vm483_vm2, %v2051_v11  ;;  %v2064_v24 = vld [vmem:[%s2297_s29 + $0x48] sm:$0xff]   ;;  %v2066_v26 = vld [vmem:[%s2297_s29 + $0x50] sm:$0xff]   ;;  %v2068_v28 = vld [vmem:[%s2297_s29 + $0x58] sm:$0xff]  }
  0x51   : > { %v2065_v25 = vld [vmem:[%s2297_s29 + $0xc8] sm:$0xff]   ;;  %v2067_v27 = vld [vmem:[%s2297_s29 + $0xd0] sm:$0xff]   ;;  %v2069_v29 = vld [vmem:[%s2297_s29 + $0xd8] sm:$0xff]  }
  0x52   : > { %v2070_v30 = vld [vmem:[%s2297_s29 + $0x60] sm:$0xff]   ;;  %v2072_v32 = vld [vmem:[%s2297_s29 + $0x68] sm:$0xff]   ;;  %v2074_v34 = vld [vmem:[%s2297_s29 + $0x70] sm:$0xff]  }
  0x53   : > { %v2071_v31 = vld [vmem:[%s2297_s29 + $0xe0] sm:$0xff]   ;;  %v2073_v33 = vld [vmem:[%s2297_s29 + $0xe8] sm:$0xff]   ;;  %v2075_v35 = vld [vmem:[%s2297_s29 + $0xf0] sm:$0xff]  }
  0x54   : > { %v2076_v36 = vld [vmem:[%s2297_s29 + $0x78] sm:$0xff]  }
  0x55   : > { %v2077_v37 = vld [vmem:[%s2297_s29 + $0xf8] sm:$0xff]  }
  0x56   : > { %1933 = vmatmul.mubr.msk.bf16.gmra.mrb[4].mxu0 %vm483_vm2, %v2052_v12 }
  0x57   : > { %1965 = vmatmul.mubr.msk.bf16.gmra.mrb[4].mxu1 %vm483_vm2, %v2053_v13  ;;  %1936 = vmatprep.mubr.msk.bf16.mxu0 %vm483_vm2, %v2054_v14 }
  0x58   : > { %1968 = vmatprep.mubr.msk.bf16.mxu1 %vm483_vm2, %v2055_v15 }
  0x5e   : > { %1937 = vmatmul.mubr.msk.bf16.gmra.mrb[8].mxu0 %vm483_vm2, %v2056_v16 }
  0x5f   : > { %1969 = vmatmul.mubr.msk.bf16.gmra.mrb[8].mxu1 %vm483_vm2, %v2057_v17  ;;  %1940 = vmatprep.mubr.msk.bf16.mxu0 %vm483_vm2, %v2058_v18 }
  0x60   : > { %1972 = vmatprep.mubr.msk.bf16.mxu1 %vm483_vm2, %v2059_v19 }
  0x66   : > { %1941 = vmatmul.mubr.msk.bf16.gmra.mrb[12].mxu0 %vm483_vm2, %v2060_v20 }
  0x67   : > { %1973 = vmatmul.mubr.msk.bf16.gmra.mrb[12].mxu1 %vm483_vm2, %v2061_v21  ;;  %1944 = vmatprep.mubr.msk.bf16.mxu0 %vm483_vm2, %v2062_v22 }
  0x68   : > { %1976 = vmatprep.mubr.msk.bf16.mxu1 %vm483_vm2, %v2063_v23 }
  0x6e   : > { %1945 = vmatmul.mubr.msk.bf16.gmra.mrb[16].mxu0 %vm483_vm2, %v2064_v24 }
  0x6f   : > { %1977 = vmatmul.mubr.msk.bf16.gmra.mrb[16].mxu1 %vm483_vm2, %v2065_v25  ;;  %1948 = vmatprep.mubr.msk.bf16.mxu0 %vm483_vm2, %v2066_v26 }
  0x70   : > { %1980 = vmatprep.mubr.msk.bf16.mxu1 %vm483_vm2, %v2067_v27 }
  0x76   : > { %1949 = vmatmul.mubr.msk.bf16.gmra.mrb[20].mxu0 %vm483_vm2, %v2068_v28 }
  0x77   : > { %1981 = vmatmul.mubr.msk.bf16.gmra.mrb[20].mxu1 %vm483_vm2, %v2069_v29  ;;  %1952 = vmatprep.mubr.msk.bf16.mxu0 %vm483_vm2, %v2070_v30 }
  0x78   : > { %1984 = vmatprep.mubr.msk.bf16.mxu1 %vm483_vm2, %v2071_v31 }
  0x7e   : > { %1953 = vmatmul.mubr.msk.bf16.gmra.mrb[24].mxu0 %vm483_vm2, %v2072_v32 }
  0x7f   : > { %1985 = vmatmul.mubr.msk.bf16.gmra.mrb[24].mxu1 %vm483_vm2, %v2073_v33  ;;  %1956 = vmatprep.mubr.msk.bf16.mxu0 %vm483_vm2, %v2074_v34 }
  0x80   : > { %1988 = vmatprep.mubr.msk.bf16.mxu1 %vm483_vm2, %v2075_v35 }
  0x86   : > { %1957 = vmatmul.mubr.msk.bf16.gmra.mrb[28].mxu0 %vm483_vm2, %v2076_v36 }
  0x87   : > { %1989 = vmatmul.mubr.msk.bf16.gmra.mrb[28].mxu1 %vm483_vm2, %v2077_v37 }
 0x121   : > { %v1930_v39 = vpop.f32.mrb[0].mxu0 }
 0x122   : > { %v1962_v40 = vpop.f32.mrb[0].mxu1  ;;  %v630_v41 = vadd.f32 %v1930_v39, %v2363_v38  ;;  %v621_v43 = vpop.f32.mrb[1].mxu0 }
 0x123   : > { %v758_v42 = vadd.f32 %v1962_v40, %v2363_v38  ;;  %v749_v44 = vpop.f32.mrb[1].mxu1  ;;  %v622_v45 = vadd.f32 %v2363_v38, %v621_v43  ;;  %v1931_v47 = vpop.f32.mrb[2].mxu0 }
 0x124   : > { %v750_v46 = vadd.f32 %v2363_v38, %v749_v44  ;;  %v1963_v48 = vpop.f32.mrb[2].mxu1  ;;  %vm878_vm3 = vcmp.gt.f32.partialorder %v630_v41, 0.0  ;;  %v942_v49 = vmul.f32 0.2, %v630_v41  ;;  %v633_v53 = vadd.f32 %v1931_v47, %v2363_v38  ;;  %v624_v55 = vpop.f32.mrb[3].mxu0 }
 0x125   : > { %vm910_vm4 = vcmp.gt.f32.partialorder %v758_v42, 0.0  ;;  %v974_v50 = vmul.f32 0.2, %v758_v42  ;;  %vm876_vm5 = vcmp.gt.f32.partialorder %v622_v45, 0.0  ;;  %v940_v51 = vmul.f32 0.2, %v622_v45 }
 0x126   : > { %vm908_vm6 = vcmp.gt.f32.partialorder %v750_v46, 0.0  ;;  %v972_v52 = vmul.f32 0.2, %v750_v46  ;;  %v761_v54 = vadd.f32 %v1963_v48, %v2363_v38  ;;  %v752_v56 = vpop.f32.mrb[3].mxu1  ;;  %v1006_v57 = vsel %vm878_vm3, %v630_v41, %v942_v49 }
 0x127   : > { %v1038_v58 = vsel %vm910_vm4, %v758_v42, %v974_v50  ;;  %v625_v59 = vadd.f32 %v2363_v38, %v624_v55  ;;  %v753_v60 = vadd.f32 %v2363_v38, %v752_v56  ;;  %vm879_vm7 = vcmp.gt.f32.partialorder %v633_v53, 0.0 }
 0x128   : > { %v943_v61 = vmul.f32 0.2, %v633_v53  ;;  %vm911_vm8 = vcmp.gt.f32.partialorder %v761_v54, 0.0  ;;  %v975_v62 = vmul.f32 0.2, %v761_v54  ;;  %v1004_v1 = vsel %vm876_vm5, %v622_v45, %v940_v51 }
 0x129   : > { %vm877_vm9 = vcmp.gt.f32.partialorder %v625_v59, 0.0  ;;  %v941_v63 = vmul.f32 0.2, %v625_v59  ;;  %vm909_vm10 = vcmp.gt.f32.partialorder %v753_v60, 0.0  ;;  %v973_v0 = vmul.f32 0.2, %v753_v60 }
 0x12a   : > { %v1036_v2 = vsel %vm908_vm6, %v750_v46, %v972_v52  ;;  %v1007_v3 = vsel %vm879_vm7, %v633_v53, %v943_v61  ;;  %v1039_v4 = vsel %vm911_vm8, %v761_v54, %v975_v62  ;;  %v1934_v5 = vpop.f32.mrb[4].mxu0  ;;  %v1966_v6 = vpop.f32.mrb[4].mxu1 }
 0x12b   : > { %v1707_v7 = vpack.c.bf16 %v1007_v3, %v1006_v57  ;;  %v1787_v8 = vpack.c.bf16 %v1039_v4, %v1038_v58  ;;  %v1005_v9 = vsel %vm877_vm9, %v625_v59, %v941_v63  ;;  %v1037_v10 = vsel %vm909_vm10, %v753_v60, %v973_v0  ;;  %v637_v11 = vpop.f32.mrb[5].mxu0  ;;  %v765_v12 = vpop.f32.mrb[5].mxu1 }
 0x12c   : > { %v1702_v13 = vpack.c.bf16 %v1005_v9, %v1004_v1  ;;  %v1782_v14 = vpack.c.bf16 %v1037_v10, %v1036_v2  ;;  %v646_v15 = vadd.f32 %v1934_v5, %v2363_v38  ;;  %v774_v16 = vadd.f32 %v1966_v6, %v2363_v38  ;;  %v1935_v17 = vpop.f32.mrb[6].mxu0  ;;  %v1967_v18 = vpop.f32.mrb[6].mxu1 }
 0x12d   : > { %1859 = vst [vmem:[%s2380_s30 + $0x8] sm:$0xff] %v1707_v7   ;;  %1875 = vst [vmem:[%s2380_s30 + $0x88] sm:$0xff] %v1787_v8   ;;  %v638_v19 = vadd.f32 %v2363_v38, %v637_v11  ;;  %v766_v20 = vadd.f32 %v2363_v38, %v765_v12  ;;  %v649_v21 = vadd.f32 %v1935_v17, %v2363_v38  ;;  %v640_v23 = vpop.f32.mrb[7].mxu0  ;;  %v768_v24 = vpop.f32.mrb[7].mxu1 }
 0x12e   : > { %v777_v22 = vadd.f32 %v1967_v18, %v2363_v38  ;;  %1703 = vst [vmem:[%s2380_s30] sm:$0xff] %v1702_v13   ;;  %1874 = vst [vmem:[%s2380_s30 + $0x80] sm:$0xff] %v1782_v14   ;;  %vm882_vm11 = vcmp.gt.f32.partialorder %v646_v15, 0.0  ;;  %v946_v25 = vmul.f32 0.2, %v646_v15  ;;  %vm914_vm12 = vcmp.gt.f32.partialorder %v774_v16, 0.0 }
 0x12f   : > { %v978_v26 = vmul.f32 0.2, %v774_v16  ;;  %vm880_vm13 = vcmp.gt.f32.partialorder %v638_v19, 0.0  ;;  %v944_v27 = vmul.f32 0.2, %v638_v19  ;;  %vm912_vm14 = vcmp.gt.f32.partialorder %v766_v20, 0.0 }
 0x130   : > { %v976_v28 = vmul.f32 0.2, %v766_v20  ;;  %v1010_v29 = vsel %vm882_vm11, %v646_v15, %v946_v25  ;;  %vm883_vm15 = vcmp.gt.f32.partialorder %v649_v21, 0.0  ;;  %v947_v31 = vmul.f32 0.2, %v649_v21 }
 0x131   : > { %v1042_v30 = vsel %vm914_vm12, %v774_v16, %v978_v26  ;;  %v1008_v32 = vsel %vm880_vm13, %v638_v19, %v944_v27  ;;  %vm915_vm0 = vcmp.gt.f32.partialorder %v777_v22, 0.0  ;;  %v979_v34 = vmul.f32 0.2, %v777_v22  ;;  %v1938_v35 = vpop.f32.mrb[8].mxu0 }
 0x132   : > { %v1040_v33 = vsel %vm912_vm14, %v766_v20, %v976_v28  ;;  %v1970_v36 = vpop.f32.mrb[8].mxu1  ;;  %v1011_v37 = vsel %vm883_vm15, %v649_v21, %v947_v31  ;;  %v641_v39 = vadd.f32 %v2363_v38, %v640_v23  ;;  %v769_v40 = vadd.f32 %v2363_v38, %v768_v24  ;;  %v653_v42 = vpop.f32.mrb[9].mxu0 }
 0x133   : > { %v662_v41 = vadd.f32 %v1938_v35, %v2363_v38  ;;  %v781_v43 = vpop.f32.mrb[9].mxu1  ;;  %v1717_v44 = vpack.c.bf16 %v1011_v37, %v1010_v29  ;;  %v1043_v45 = vsel %vm915_vm0, %v777_v22, %v979_v34  ;;  %v790_v46 = vadd.f32 %v1970_v36, %v2363_v38  ;;  %v1939_v48 = vpop.f32.mrb[10].mxu0 }
 0x134   : > { %v654_v47 = vadd.f32 %v2363_v38, %v653_v42  ;;  %v1971_v49 = vpop.f32.mrb[10].mxu1  ;;  %v1797_v50 = vpack.c.bf16 %v1043_v45, %v1042_v30  ;;  %vm881_vm1 = vcmp.gt.f32.partialorder %v641_v39, 0.0  ;;  %v945_v51 = vmul.f32 0.2, %v641_v39  ;;  %v656_v52 = vpop.f32.mrb[11].mxu0 }
 0x135   : > { %vm913_vm2 = vcmp.gt.f32.partialorder %v769_v40, 0.0  ;;  %v784_v53 = vpop.f32.mrb[11].mxu1  ;;  %1861 = vst [vmem:[%s2380_s30 + $0x18] sm:$0xff] %v1717_v44   ;;  %v977_v54 = vmul.f32 0.2, %v769_v40  ;;  %vm886_vm3 = vcmp.gt.f32.partialorder %v662_v41, 0.0  ;;  %v782_v62 = vadd.f32 %v2363_v38, %v781_v43 }
 0x136   : > { %v950_v55 = vmul.f32 0.2, %v662_v41  ;;  %vm918_vm4 = vcmp.gt.f32.partialorder %v790_v46, 0.0  ;;  %1877 = vst [vmem:[%s2380_s30 + $0x98] sm:$0xff] %v1797_v50   ;;  %v1009_v56 = vsel %vm881_vm1, %v641_v39, %v945_v51  ;;  %v982_v57 = vmul.f32 0.2, %v790_v46 }
 0x137   : > { %vm884_vm5 = vcmp.gt.f32.partialorder %v654_v47, 0.0  ;;  %v948_v58 = vmul.f32 0.2, %v654_v47  ;;  %v1712_v59 = vpack.c.bf16 %v1009_v56, %v1008_v32  ;;  %v1041_v60 = vsel %vm913_vm2, %v769_v40, %v977_v54 }
 0x138   : > { %v1014_v61 = vsel %vm886_vm3, %v662_v41, %v950_v55  ;;  %v1792_v63 = vpack.c.bf16 %v1041_v60, %v1040_v33  ;;  %v1046_v0 = vsel %vm918_vm4, %v790_v46, %v982_v57  ;;  %v665_v2 = vadd.f32 %v1939_v48, %v2363_v38 }
 0x139   : > { %v1012_v1 = vsel %vm884_vm5, %v654_v47, %v948_v58  ;;  %1860 = vst [vmem:[%s2380_s30 + $0x10] sm:$0xff] %v1712_v59   ;;  %vm916_vm6 = vcmp.gt.f32.partialorder %v782_v62, 0.0  ;;  %v980_v3 = vmul.f32 0.2, %v782_v62  ;;  %v793_v4 = vadd.f32 %v1971_v49, %v2363_v38  ;;  %v1942_v6 = vpop.f32.mrb[12].mxu0 }
 0x13a   : > { %v657_v5 = vadd.f32 %v2363_v38, %v656_v52  ;;  %v1974_v7 = vpop.f32.mrb[12].mxu1  ;;  %1876 = vst [vmem:[%s2380_s30 + $0x90] sm:$0xff] %v1792_v63   ;;  %vm887_vm7 = vcmp.gt.f32.partialorder %v665_v2, 0.0  ;;  %v951_v8 = vmul.f32 0.2, %v665_v2  ;;  %v785_v9 = vadd.f32 %v2363_v38, %v784_v53  ;;  %v669_v11 = vpop.f32.mrb[13].mxu0 }
 0x13b   : > { %v678_v10 = vadd.f32 %v1942_v6, %v2363_v38  ;;  %v797_v12 = vpop.f32.mrb[13].mxu1  ;;  %v1044_v13 = vsel %vm916_vm6, %v782_v62, %v980_v3  ;;  %vm919_vm8 = vcmp.gt.f32.partialorder %v793_v4, 0.0  ;;  %v983_v14 = vmul.f32 0.2, %v793_v4  ;;  %v1943_v15 = vpop.f32.mrb[14].mxu0 }
 0x13c   : > { %vm885_vm9 = vcmp.gt.f32.partialorder %v657_v5, 0.0  ;;  %v1975_v16 = vpop.f32.mrb[14].mxu1  ;;  %v1015_v17 = vsel %vm887_vm7, %v665_v2, %v951_v8  ;;  %v949_v18 = vmul.f32 0.2, %v657_v5  ;;  %vm917_vm10 = vcmp.gt.f32.partialorder %v785_v9, 0.0  ;;  %v672_v20 = vpop.f32.mrb[15].mxu0 }
 0x13d   : > { %v981_v19 = vmul.f32 0.2, %v785_v9  ;;  %v1727_v21 = vpack.c.bf16 %v1015_v17, %v1014_v61  ;;  %v1047_v22 = vsel %vm919_vm8, %v793_v4, %v983_v14  ;;  %vm890_vm11 = vcmp.gt.f32.partialorder %v678_v10, 0.0  ;;  %v800_v24 = vpop.f32.mrb[15].mxu1 }
 0x13e   : > { %v954_v23 = vmul.f32 0.2, %v678_v10  ;;  %v1807_v25 = vpack.c.bf16 %v1047_v22, %v1046_v0  ;;  %v1013_v26 = vsel %vm885_vm9, %v657_v5, %v949_v18  ;;  %v806_v28 = vadd.f32 %v1974_v7, %v2363_v38 }
 0x13f   : > { %v1045_v27 = vsel %vm917_vm10, %v785_v9, %v981_v19  ;;  %1863 = vst [vmem:[%s2380_s30 + $0x28] sm:$0xff] %v1727_v21   ;;  %v1722_v29 = vpack.c.bf16 %v1013_v26, %v1012_v1  ;;  %v670_v32 = vadd.f32 %v2363_v38, %v669_v11  ;;  %v798_v34 = vadd.f32 %v2363_v38, %v797_v12 }
 0x140   : > { %v1802_v30 = vpack.c.bf16 %v1045_v27, %v1044_v13  ;;  %v1018_v31 = vsel %vm890_vm11, %v678_v10, %v954_v23  ;;  %1879 = vst [vmem:[%s2380_s30 + $0xa8] sm:$0xff] %v1807_v25   ;;  %vm922_vm12 = vcmp.gt.f32.partialorder %v806_v28, 0.0  ;;  %v986_v33 = vmul.f32 0.2, %v806_v28 }
 0x141   : > { %v681_v35 = vadd.f32 %v1943_v15, %v2363_v38  ;;  %1862 = vst [vmem:[%s2380_s30 + $0x20] sm:$0xff] %v1722_v29   ;;  %vm888_vm13 = vcmp.gt.f32.partialorder %v670_v32, 0.0  ;;  %v952_v36 = vmul.f32 0.2, %v670_v32  ;;  %v809_v37 = vadd.f32 %v1975_v16, %v2363_v38  ;;  %v1946_v40 = vpop.f32.mrb[16].mxu0 }
 0x142   : > { %1878 = vst [vmem:[%s2380_s30 + $0xa0] sm:$0xff] %v1802_v30   ;;  %v673_v39 = vadd.f32 %v2363_v38, %v672_v20  ;;  %v1978_v41 = vpop.f32.mrb[16].mxu1  ;;  %v1050_v42 = vsel %vm922_vm12, %v806_v28, %v986_v33  ;;  %vm920_vm14 = vcmp.gt.f32.partialorder %v798_v34, 0.0  ;;  %v984_v43 = vmul.f32 0.2, %v798_v34  ;;  %v685_v44 = vpop.f32.mrb[17].mxu0 }
 0x143   : > { %vm891_vm15 = vcmp.gt.f32.partialorder %v681_v35, 0.0  ;;  %v813_v45 = vpop.f32.mrb[17].mxu1  ;;  %v1016_v46 = vsel %vm888_vm13, %v670_v32, %v952_v36  ;;  %v955_v47 = vmul.f32 0.2, %v681_v35  ;;  %vm923_vm0 = vcmp.gt.f32.partialorder %v809_v37, 0.0  ;;  %v1947_v49 = vpop.f32.mrb[18].mxu0 }
 0x144   : > { %v987_v48 = vmul.f32 0.2, %v809_v37  ;;  %v1048_v50 = vsel %vm920_vm14, %v798_v34, %v984_v43  ;;  %vm889_vm1 = vcmp.gt.f32.partialorder %v673_v39, 0.0  ;;  %v953_v51 = vmul.f32 0.2, %v673_v39  ;;  %v1979_v53 = vpop.f32.mrb[18].mxu1 }
 0x145   : > { %v801_v52 = vadd.f32 %v2363_v38, %v800_v24  ;;  %v688_v54 = vpop.f32.mrb[19].mxu0  ;;  %v1019_v55 = vsel %vm891_vm15, %v681_v35, %v955_v47  ;;  %v694_v57 = vadd.f32 %v1946_v40, %v2363_v38  ;;  %v822_v58 = vadd.f32 %v1978_v41, %v2363_v38  ;;  %v816_v59 = vpop.f32.mrb[19].mxu1 }
 0x146   : > { %v1051_v56 = vsel %vm923_vm0, %v809_v37, %v987_v48  ;;  %v1737_v60 = vpack.c.bf16 %v1019_v55, %v1018_v31  ;;  %v1017_v62 = vsel %vm889_vm1, %v673_v39, %v953_v51  ;;  %v686_v3 = vadd.f32 %v2363_v38, %v685_v44 }
 0x147   : > { %v1817_v61 = vpack.c.bf16 %v1051_v56, %v1050_v42  ;;  %vm921_vm2 = vcmp.gt.f32.partialorder %v801_v52, 0.0  ;;  %v1732_v63 = vpack.c.bf16 %v1017_v62, %v1016_v46  ;;  %v985_v0 = vmul.f32 0.2, %v801_v52 }
 0x148   : > { %vm894_vm3 = vcmp.gt.f32.partialorder %v694_v57, 0.0  ;;  %v958_v1 = vmul.f32 0.2, %v694_v57  ;;  %1865 = vst [vmem:[%s2380_s30 + $0x38] sm:$0xff] %v1737_v60   ;;  %vm926_vm4 = vcmp.gt.f32.partialorder %v822_v58, 0.0  ;;  %v814_v4 = vadd.f32 %v2363_v38, %v813_v45 }
 0x149   : > { %1881 = vst [vmem:[%s2380_s30 + $0xb8] sm:$0xff] %v1817_v61   ;;  %v990_v2 = vmul.f32 0.2, %v822_v58  ;;  %1864 = vst [vmem:[%s2380_s30 + $0x30] sm:$0xff] %v1732_v63   ;;  %v1049_v5 = vsel %vm921_vm2, %v801_v52, %v985_v0  ;;  %v697_v7 = vadd.f32 %v1947_v49, %v2363_v38  ;;  %v825_v8 = vadd.f32 %v1979_v53, %v2363_v38  ;;  %v1950_v9 = vpop.f32.mrb[20].mxu0 }
 0x14a   : > { %v1022_v6 = vsel %vm894_vm3, %v694_v57, %v958_v1  ;;  %v1982_v10 = vpop.f32.mrb[20].mxu1  ;;  %v1812_v11 = vpack.c.bf16 %v1049_v5, %v1048_v50  ;;  %vm892_vm5 = vcmp.gt.f32.partialorder %v686_v3, 0.0  ;;  %v956_v13 = vmul.f32 0.2, %v686_v3  ;;  %v701_v14 = vpop.f32.mrb[21].mxu0 }
 0x14b   : > { %v1054_v12 = vsel %vm926_vm4, %v822_v58, %v990_v2  ;;  %v829_v15 = vpop.f32.mrb[21].mxu1  ;;  %vm924_vm6 = vcmp.gt.f32.partialorder %v814_v4, 0.0  ;;  %v988_v16 = vmul.f32 0.2, %v814_v4  ;;  %vm895_vm7 = vcmp.gt.f32.partialorder %v697_v7, 0.0  ;;  %v1951_v21 = vpop.f32.mrb[22].mxu0 }
 0x14c   : > { %v959_v17 = vmul.f32 0.2, %v697_v7  ;;  %1880 = vst [vmem:[%s2380_s30 + $0xb0] sm:$0xff] %v1812_v11   ;;  %v1020_v18 = vsel %vm892_vm5, %v686_v3, %v956_v13  ;;  %vm927_vm8 = vcmp.gt.f32.partialorder %v825_v8, 0.0  ;;  %v991_v19 = vmul.f32 0.2, %v825_v8 }
 0x14d   : > { %v689_v20 = vadd.f32 %v2363_v38, %v688_v54  ;;  %v1983_v22 = vpop.f32.mrb[22].mxu1  ;;  %v1052_v23 = vsel %vm924_vm6, %v814_v4, %v988_v16  ;;  %v817_v25 = vadd.f32 %v2363_v38, %v816_v59  ;;  %v710_v26 = vadd.f32 %v1950_v9, %v2363_v38  ;;  %v704_v27 = vpop.f32.mrb[23].mxu0 }
 0x14e   : > { %v1023_v24 = vsel %vm895_vm7, %v697_v7, %v959_v17  ;;  %v832_v28 = vpop.f32.mrb[23].mxu1  ;;  %v1055_v30 = vsel %vm927_vm8, %v825_v8, %v991_v19  ;;  %v838_v36 = vadd.f32 %v1982_v10, %v2363_v38  ;;  %v702_v37 = vadd.f32 %v2363_v38, %v701_v14 }
 0x14f   : > { %v1747_v29 = vpack.c.bf16 %v1023_v24, %v1022_v6  ;;  %vm893_vm9 = vcmp.gt.f32.partialorder %v689_v20, 0.0  ;;  %v957_v31 = vmul.f32 0.2, %v689_v20  ;;  %v1827_v32 = vpack.c.bf16 %v1055_v30, %v1054_v12 }
 0x150   : > { %vm925_vm10 = vcmp.gt.f32.partialorder %v817_v25, 0.0  ;;  %v989_v33 = vmul.f32 0.2, %v817_v25  ;;  %vm898_vm11 = vcmp.gt.f32.partialorder %v710_v26, 0.0  ;;  %v962_v35 = vmul.f32 0.2, %v710_v26 }
 0x151   : > { %1867 = vst [vmem:[%s2380_s30 + $0x48] sm:$0xff] %v1747_v29   ;;  %v1021_v34 = vsel %vm893_vm9, %v689_v20, %v957_v31  ;;  %1883 = vst [vmem:[%s2380_s30 + $0xc8] sm:$0xff] %v1827_v32   ;;  %v830_v41 = vadd.f32 %v2363_v38, %v829_v15  ;;  %v713_v42 = vadd.f32 %v1951_v21, %v2363_v38  ;;  %v1954_v43 = vpop.f32.mrb[24].mxu0  ;;  %vm930_vm12 = vcmp.gt.f32.partialorder %v838_v36, 0.0 }
 0x152   : > { %v1742_v39 = vpack.c.bf16 %v1021_v34, %v1020_v18  ;;  %v1053_v40 = vsel %vm925_vm10, %v817_v25, %v989_v33  ;;  %v1986_v44 = vpop.f32.mrb[24].mxu1  ;;  %v994_v46 = vmul.f32 0.2, %v838_v36  ;;  %v717_v47 = vpop.f32.mrb[25].mxu0  ;;  %v1026_v49 = vsel %vm898_vm11, %v710_v26, %v962_v35 }
 0x153   : > { %v1822_v45 = vpack.c.bf16 %v1053_v40, %v1052_v23  ;;  %v845_v48 = vpop.f32.mrb[25].mxu1  ;;  %vm896_vm13 = vcmp.gt.f32.partialorder %v702_v37, 0.0  ;;  %v960_v50 = vmul.f32 0.2, %v702_v37  ;;  %v992_v51 = vmul.f32 0.2, %v830_v41 }
 0x154   : > { %1866 = vst [vmem:[%s2380_s30 + $0x40] sm:$0xff] %v1742_v39   ;;  %vm928_vm14 = vcmp.gt.f32.partialorder %v830_v41, 0.0  ;;  %vm899_vm15 = vcmp.gt.f32.partialorder %v713_v42, 0.0  ;;  %v963_v52 = vmul.f32 0.2, %v713_v42  ;;  %v841_v53 = vadd.f32 %v1983_v22, %v2363_v38  ;;  %v1955_v54 = vpop.f32.mrb[26].mxu0 }
 0x155   : > { %1882 = vst [vmem:[%s2380_s30 + $0xc0] sm:$0xff] %v1822_v45   ;;  %v1987_v55 = vpop.f32.mrb[26].mxu1  ;;  %v1058_v56 = vsel %vm930_vm12, %v838_v36, %v994_v46  ;;  %v1024_v57 = vsel %vm896_vm13, %v702_v37, %v960_v50  ;;  %v705_v58 = vadd.f32 %v2363_v38, %v704_v27  ;;  %v833_v59 = vadd.f32 %v2363_v38, %v832_v28  ;;  %v720_v60 = vpop.f32.mrb[27].mxu0 }
 0x156   : > { %v848_v61 = vpop.f32.mrb[27].mxu1  ;;  %v1027_v62 = vsel %vm899_vm15, %v713_v42, %v963_v52  ;;  %vm931_vm0 = vcmp.gt.f32.partialorder %v841_v53, 0.0  ;;  %v995_v63 = vmul.f32 0.2, %v841_v53  ;;  %v726_v0 = vadd.f32 %v1954_v43, %v2363_v38 }
 0x157   : > { %v1757_v1 = vpack.c.bf16 %v1027_v62, %v1026_v49  ;;  %vm897_vm1 = vcmp.gt.f32.partialorder %v705_v58, 0.0  ;;  %v961_v2 = vmul.f32 0.2, %v705_v58  ;;  %vm929_vm2 = vcmp.gt.f32.partialorder %v833_v59, 0.0 }
 0x158   : > { %v1059_v3 = vsel %vm931_vm0, %v841_v53, %v995_v63  ;;  %v993_v4 = vmul.f32 0.2, %v833_v59  ;;  %vm902_vm3 = vcmp.gt.f32.partialorder %v726_v0, 0.0  ;;  %v966_v5 = vmul.f32 0.2, %v726_v0 }
 0x159   : > { %1869 = vst [vmem:[%s2380_s30 + $0x58] sm:$0xff] %v1757_v1   ;;  %v1837_v6 = vpack.c.bf16 %v1059_v3, %v1058_v56  ;;  %v1025_v7 = vsel %vm897_vm1, %v705_v58, %v961_v2  ;;  %v854_v8 = vadd.f32 %v1986_v44, %v2363_v38  ;;  %v718_v9 = vadd.f32 %v2363_v38, %v717_v47  ;;  %v1958_v10 = vpop.f32.mrb[28].mxu0 }
 0x15a   : > { %v1990_v11 = vpop.f32.mrb[28].mxu1  ;;  %v1056_v12 = vsel %vm928_vm14, %v830_v41, %v992_v51  ;;  %v1752_v13 = vpack.c.bf16 %v1025_v7, %v1024_v57  ;;  %v1057_v14 = vsel %vm929_vm2, %v833_v59, %v993_v4  ;;  %v846_v15 = vadd.f32 %v2363_v38, %v845_v48  ;;  %v733_v16 = vpop.f32.mrb[29].mxu0 }
 0x15b   : > { %v861_v17 = vpop.f32.mrb[29].mxu1  ;;  %1885 = vst [vmem:[%s2380_s30 + $0xd8] sm:$0xff] %v1837_v6   ;;  %v1832_v18 = vpack.c.bf16 %v1057_v14, %v1056_v12  ;;  %vm934_vm4 = vcmp.gt.f32.partialorder %v854_v8, 0.0  ;;  %v998_v19 = vmul.f32 0.2, %v854_v8  ;;  %vm900_vm5 = vcmp.gt.f32.partialorder %v718_v9, 0.0 }
 0x15c   : > { %v1959_v20 = vpop.f32.mrb[30].mxu0  ;;  %v1991_v21 = vpop.f32.mrb[30].mxu1  ;;  %1868 = vst [vmem:[%s2380_s30 + $0x50] sm:$0xff] %v1752_v13   ;;  %v1030_v22 = vsel %vm902_vm3, %v726_v0, %v966_v5  ;;  %v964_v23 = vmul.f32 0.2, %v718_v9  ;;  %vm932_vm6 = vcmp.gt.f32.partialorder %v846_v15, 0.0  ;;  %v729_v24 = vadd.f32 %v1955_v54, %v2363_v38 }
 0x15d   : > { %v736_v25 = vpop.f32.mrb[31].mxu0  ;;  %1884 = vst [vmem:[%s2380_s30 + $0xd0] sm:$0xff] %v1832_v18   ;;  %v996_v26 = vmul.f32 0.2, %v846_v15  ;;  %v857_v27 = vadd.f32 %v1987_v55, %v2363_v38  ;;  %v721_v28 = vadd.f32 %v2363_v38, %v720_v60  ;;  %v849_v29 = vadd.f32 %v2363_v38, %v848_v61  ;;  %v864_v30 = vpop.f32.mrb[31].mxu1 }
 0x15e   : > { %v1062_v31 = vsel %vm934_vm4, %v854_v8, %v998_v19  ;;  %v1028_v32 = vsel %vm900_vm5, %v718_v9, %v964_v23  ;;  %vm903_vm7 = vcmp.gt.f32.partialorder %v729_v24, 0.0  ;;  %v967_v33 = vmul.f32 0.2, %v729_v24 }
 0x15f   : > { %vm935_vm8 = vcmp.gt.f32.partialorder %v857_v27, 0.0  ;;  %v999_v34 = vmul.f32 0.2, %v857_v27  ;;  %vm901_vm9 = vcmp.gt.f32.partialorder %v721_v28, 0.0  ;;  %v965_v35 = vmul.f32 0.2, %v721_v28 }
 0x160   : > { %v1031_v36 = vsel %vm903_vm7, %v729_v24, %v967_v33  ;;  %vm933_vm10 = vcmp.gt.f32.partialorder %v849_v29, 0.0  ;;  %v997_v37 = vmul.f32 0.2, %v849_v29  ;;  %v742_v39 = vadd.f32 %v1958_v10, %v2363_v38 }
 0x161   : > { %v1767_v40 = vpack.c.bf16 %v1031_v36, %v1030_v22  ;;  %v1063_v41 = vsel %vm935_vm8, %v857_v27, %v999_v34  ;;  %v1029_v42 = vsel %vm901_vm9, %v721_v28, %v965_v35  ;;  %v870_v43 = vadd.f32 %v1990_v11, %v2363_v38 }
 0x162   : > { %v1060_v44 = vsel %vm932_vm6, %v846_v15, %v996_v26  ;;  %v1847_v45 = vpack.c.bf16 %v1063_v41, %v1062_v31  ;;  %v1762_v46 = vpack.c.bf16 %v1029_v42, %v1028_v32  ;;  %v1061_v47 = vsel %vm933_vm10, %v849_v29, %v997_v37 }
 0x163   : > { %1871 = vst [vmem:[%s2380_s30 + $0x68] sm:$0xff] %v1767_v40   ;;  %v1842_v48 = vpack.c.bf16 %v1061_v47, %v1060_v44  ;;  %vm906_vm11 = vcmp.gt.f32.partialorder %v742_v39, 0.0  ;;  %v970_v49 = vmul.f32 0.2, %v742_v39  ;;  %v1002_v50 = vmul.f32 0.2, %v870_v43 }
 0x164   : > { %1887 = vst [vmem:[%s2380_s30 + $0xe8] sm:$0xff] %v1847_v45   ;;  %1870 = vst [vmem:[%s2380_s30 + $0x60] sm:$0xff] %v1762_v46   ;;  %v734_v51 = vadd.f32 %v2363_v38, %v733_v16  ;;  %v862_v52 = vadd.f32 %v2363_v38, %v861_v17  ;;  %v745_v53 = vadd.f32 %v1959_v20, %v2363_v38  ;;  %vm938_vm12 = vcmp.gt.f32.partialorder %v870_v43, 0.0 }
 0x165   : > { %v873_v54 = vadd.f32 %v1991_v21, %v2363_v38  ;;  %1886 = vst [vmem:[%s2380_s30 + $0xe0] sm:$0xff] %v1842_v48   ;;  %v737_v55 = vadd.f32 %v2363_v38, %v736_v25  ;;  %v865_v56 = vadd.f32 %v2363_v38, %v864_v30  ;;  %v1034_v57 = vsel %vm906_vm11, %v742_v39, %v970_v49 }
 0x166   : > { %vm904_vm13 = vcmp.gt.f32.partialorder %v734_v51, 0.0  ;;  %v968_v58 = vmul.f32 0.2, %v734_v51  ;;  %v1000_v59 = vmul.f32 0.2, %v862_v52  ;;  %vm907_vm14 = vcmp.gt.f32.partialorder %v745_v53, 0.0 }
 0x167   : > { %v971_v60 = vmul.f32 0.2, %v745_v53  ;;  %vm939_vm15 = vcmp.gt.f32.partialorder %v873_v54, 0.0  ;;  %v1003_v61 = vmul.f32 0.2, %v873_v54  ;;  %v1066_v62 = vsel %vm938_vm12, %v870_v43, %v1002_v50 }
 0x168   : > { %vm936_vm0 = vcmp.gt.f32.partialorder %v862_v52, 0.0  ;;  %vm905_vm1 = vcmp.gt.f32.partialorder %v737_v55, 0.0  ;;  %v969_v63 = vmul.f32 0.2, %v737_v55  ;;  %vm937_vm2 = vcmp.gt.f32.partialorder %v865_v56, 0.0 }
 0x169   : > { %v1035_v0 = vsel %vm907_vm14, %v745_v53, %v971_v60  ;;  %v1067_v1 = vsel %vm939_vm15, %v873_v54, %v1003_v61  ;;  %v1001_v38 = vmul.f32 0.2, %v865_v56  ;;  %v1032_v2 = vsel %vm904_vm13, %v734_v51, %v968_v58 }
 0x16a   : > { %v1777_v3 = vpack.c.bf16 %v1035_v0, %v1034_v57  ;;  %v1857_v4 = vpack.c.bf16 %v1067_v1, %v1066_v62  ;;  %v1033_v5 = vsel %vm905_vm1, %v737_v55, %v969_v63  ;;  %v1064_v6 = vsel %vm936_vm0, %v862_v52, %v1000_v59 }
 0x16b   : > { %v1772_v7 = vpack.c.bf16 %v1033_v5, %v1032_v2  ;;  %v1065_v8 = vsel %vm937_vm2, %v865_v56, %v1001_v38 }
 0x16c   : > { %1873 = vst [vmem:[%s2380_s30 + $0x78] sm:$0xff] %v1777_v3   ;;  %1889 = vst [vmem:[%s2380_s30 + $0xf8] sm:$0xff] %v1857_v4   ;;  %v1852_v9 = vpack.c.bf16 %v1065_v8, %v1064_v6 }
 0x16d   : > { %1872 = vst [vmem:[%s2380_s30 + $0x70] sm:$0xff] %v1772_v7  }
 0x16e   : > { %1888 = vst [vmem:[%s2380_s30 + $0xf0] sm:$0xff] %v1852_v9  }
 0x16f PF: > { %s15_s14 = sadd.s32 1, %s2164_s14   ;;  %s2498_s12 = smov %s2160_s13 }
 0x170   : > { %p12_p6 = scmp.ge.s32.totalorder %s15_s14, 6   ;;  %s2499_s13 = smov %s2501_s16 }
 0x172   :  { %14 = sbr.rel (!%p12_p6) target bundleno = 3 (0x3), region = 73 }
 0x179   :  { %1416 = vsyncpa [#allocation3], 1 }
 0x17a   :  { %1418 = vsyncpa [#allocation3 + $0x1], 1 }
 0x17b   :  { %1419 = vsyncpa [#allocation5], 1 }

// kernel: tile.13
= control target key start
LH: loop header
LB: loop body
LE: loop exit
PB: predicated region body
PF: predicated region fallthrough
CT: control target
= control target key end

     0   :  { %s22_s0 = inlined_call_operand.vmem [shape: f32[64], index: 0, kind: input, shape index: {}]   ;;  %s23_s1 = inlined_call_operand.vmem [shape: f32[2,64], index: 1, kind: output, shape index: {}]  }
   0x1   :  { %v4_v0 = vld [vmem:[%s22_s0] ss:$0 sm:$0xff] }
   0x2   :  { %5 = vst [vmem:[%s23_s1] sm:$0x3] %v4_v0 }

// kernel: tile.18
= control target key start
LH: loop header
LB: loop body
LE: loop exit
PB: predicated region body
PF: predicated region fallthrough
CT: control target
= control target key end

     0   :  { %vm7_vm0 = vcmask 523264   ;;  %vm13_vm1 = vcmask 1048064   ;;  %s39_s0 = inlined_call_operand.vmem [shape: f32[2,64], index: 0, kind: input, shape index: {}]   ;;  %s40_s1 = inlined_call_operand.vmem [shape: f32[1,128], index: 1, kind: output, shape index: {}]  }
   0x1   :  { %v4_v0 = vld [vmem:[%s39_s0] sm:$0x3]  ;;  %s22_s0 = smov 64  }
   0x2   :  { %5 = vst [vmem:[#allocation1] sm:$0x3] %v4_v0 }
   0x9   :  { %v10_v1 = vld [vmem:[#allocation1 + $0x1] sm:$0x1]   ;;  %v6_v2 = vld [vmem:[#allocation1] sm:$0x1]  }
   0xa   :  { %11 = vrot.lane.b32.xlu0 %v10_v1, %s22_s0  ;;  %8 = vst.msk [vmem:[#allocation0] sm:$0x1] %vm7_vm0, %v6_v2  }
  0x7c   :  { %v12_v3 = vpop.permute.xlu0 %11  }
  0x7d   :  { %14 = vst.msk [vmem:[#allocation0] sm:$0x1] %vm13_vm1, %v12_v3  }
  0x84   :  { %v18_v4 = vld [vmem:[#allocation0] sm:$0x1] }
  0x85   :  { %20 = vst [vmem:[%s40_s1] sm:$0x1] %v18_v4 }

// kernel: discriminator_forward.7
= control target key start
LH: loop header
LB: loop body
LE: loop exit
PB: predicated region body
PF: predicated region fallthrough
CT: control target
= control target key end

     0   :  { %s847_s0 = inlined_call_operand.vmem [shape: bf16[256,128], index: 0, kind: input, shape index: {}]   ;;  %s848_s1 = inlined_call_operand.vmem [shape: f32[1,128], index: 1, kind: input, shape index: {}]   ;;  %s849_s2 = inlined_call_operand.vmem [shape: f32[1,128], index: 2, kind: input, shape index: {}]   ;;  %s850_s3 = inlined_call_operand.vmem [shape: bf16[256,128], index: 3, kind: output, shape index: {}]  }
   0x1   :  { %v483_v0 = vld [vmem:[%s847_s0] sm:$0xff]   ;;  %v626_v4 = vld [vmem:[%s847_s0 + $0x8] sm:$0xff]   ;;  %v627_v5 = vld [vmem:[%s847_s0 + $0x10] sm:$0xff]  }
   0x2   :  { %v682_v1 = vld [vmem:[%s848_s1] ss:$0 sm:$0xff]  ;;  %v484_v2 = vunpack.c.l.bf16 %v483_v0  ;;  %v485_v3 = vunpack.c.h.bf16 %v483_v0  ;;  %v628_v6 = vld [vmem:[%s847_s0 + $0x18] sm:$0xff]   ;;  %v488_v8 = vunpack.c.l.bf16 %v626_v4  ;;  %v489_v9 = vunpack.c.h.bf16 %v626_v4  ;;  %v630_v35 = vld [vmem:[%s847_s0 + $0x28] sm:$0xff]  }
   0x3   :  { %v696_v7 = vld [vmem:[%s849_s2] ss:$0 sm:$0xff]  ;;  %v492_v10 = vunpack.c.l.bf16 %v627_v5  ;;  %v493_v11 = vunpack.c.h.bf16 %v627_v5  ;;  %v496_v14 = vunpack.c.l.bf16 %v628_v6  ;;  %v497_v15 = vunpack.c.h.bf16 %v628_v6  ;;  %v631_v48 = vld [vmem:[%s847_s0 + $0x30] sm:$0xff]   ;;  %v632_v4 = vld [vmem:[%s847_s0 + $0x38] sm:$0xff]  }
   0x4   :  { %v85_v12 = vmul.f32 %v484_v2, %v682_v1  ;;  %v86_v13 = vmul.f32 %v485_v3, %v682_v1  ;;  %v87_v16 = vmul.f32 %v488_v8, %v682_v1  ;;  %v88_v17 = vmul.f32 %v489_v9, %v682_v1  ;;  %v629_v34 = vld [vmem:[%s847_s0 + $0x20] sm:$0xff]  }
   0x5   :  { %v89_v18 = vmul.f32 %v492_v10, %v682_v1  ;;  %v90_v19 = vmul.f32 %v493_v11, %v682_v1  ;;  %v91_v22 = vmul.f32 %v496_v14, %v682_v1  ;;  %v92_v23 = vmul.f32 %v497_v15, %v682_v1  ;;  %v633_v15 = vld [vmem:[%s847_s0 + $0x40] sm:$0xff]  }
   0x6   :  { %v124_v20 = vadd.f32 %v696_v7, %v85_v12  ;;  %v125_v21 = vadd.f32 %v696_v7, %v86_v13  ;;  %v126_v24 = vadd.f32 %v696_v7, %v87_v16  ;;  %v127_v25 = vadd.f32 %v696_v7, %v88_v17 }
   0x7   :  { %v128_v26 = vadd.f32 %v696_v7, %v89_v18  ;;  %v129_v27 = vadd.f32 %v696_v7, %v90_v19  ;;  %v130_v42 = vadd.f32 %v696_v7, %v91_v22  ;;  %v131_v43 = vadd.f32 %v696_v7, %v92_v23 }
   0x8   :  { %vm156_vm0 = vcmp.gt.f32.partialorder %v124_v20, 0.0  ;;  %vm157_vm1 = vcmp.gt.f32.partialorder %v125_v21, 0.0  ;;  %v188_v28 = vmul.f32 0.2, %v124_v20  ;;  %v189_v29 = vmul.f32 0.2, %v125_v21 }
   0x9   :  { %vm158_vm2 = vcmp.gt.f32.partialorder %v126_v24, 0.0  ;;  %vm159_vm3 = vcmp.gt.f32.partialorder %v127_v25, 0.0  ;;  %v190_v30 = vmul.f32 0.2, %v126_v24  ;;  %v191_v31 = vmul.f32 0.2, %v127_v25 }
   0xa   :  { %v220_v32 = vsel %vm156_vm0, %v124_v20, %v188_v28  ;;  %v221_v33 = vsel %vm157_vm1, %v125_v21, %v189_v29  ;;  %vm160_vm4 = vcmp.gt.f32.partialorder %v128_v26, 0.0  ;;  %vm161_vm5 = vcmp.gt.f32.partialorder %v129_v27, 0.0 }
   0xb   :  { %v549_v36 = vpack.c.bf16 %v221_v33, %v220_v32  ;;  %v222_v37 = vsel %vm158_vm2, %v126_v24, %v190_v30  ;;  %v223_v38 = vsel %vm159_vm3, %v127_v25, %v191_v31  ;;  %v192_v39 = vmul.f32 0.2, %v128_v26 }
   0xc   :  { %v554_v40 = vpack.c.bf16 %v223_v38, %v222_v37  ;;  %v193_v41 = vmul.f32 0.2, %v129_v27  ;;  %v500_v45 = vunpack.c.l.bf16 %v629_v34  ;;  %v501_v46 = vunpack.c.h.bf16 %v629_v34 }
   0xd   :  { %550 = vst [vmem:[%s850_s3] sm:$0xff] %v549_v36   ;;  %v224_v44 = vsel %vm160_vm4, %v128_v26, %v192_v39  ;;  %v504_v47 = vunpack.c.l.bf16 %v630_v35  ;;  %vm162_vm6 = vcmp.gt.f32.partialorder %v130_v42, 0.0  ;;  %vm163_vm7 = vcmp.gt.f32.partialorder %v131_v43, 0.0  ;;  %v634_v26 = vld [vmem:[%s847_s0 + $0x48] sm:$0xff]  }
   0xe   :  { %641 = vst [vmem:[%s850_s3 + $0x8] sm:$0xff] %v554_v40   ;;  %v225_v49 = vsel %vm161_vm5, %v129_v27, %v193_v41  ;;  %v194_v50 = vmul.f32 0.2, %v130_v42  ;;  %v195_v52 = vmul.f32 0.2, %v131_v43  ;;  %v93_v53 = vmul.f32 %v500_v45, %v682_v1  ;;  %v635_v27 = vld [vmem:[%s847_s0 + $0x50] sm:$0xff]  }
   0xf   :  { %v559_v51 = vpack.c.bf16 %v225_v49, %v224_v44  ;;  %v94_v54 = vmul.f32 %v501_v46, %v682_v1  ;;  %v505_v56 = vunpack.c.h.bf16 %v630_v35  ;;  %v95_v57 = vmul.f32 %v504_v47, %v682_v1 }
  0x10   :  { %v226_v55 = vsel %vm162_vm6, %v130_v42, %v194_v50  ;;  %v508_v58 = vunpack.c.l.bf16 %v631_v48  ;;  %v227_v59 = vsel %vm163_vm7, %v131_v43, %v195_v52  ;;  %v132_v60 = vadd.f32 %v696_v7, %v93_v53 }
  0x11   :  { %642 = vst [vmem:[%s850_s3 + $0x10] sm:$0xff] %v559_v51   ;;  %v133_v61 = vadd.f32 %v696_v7, %v94_v54  ;;  %v509_v62 = vunpack.c.h.bf16 %v631_v48  ;;  %v564_v63 = vpack.c.bf16 %v227_v59, %v226_v55  ;;  %v96_v0 = vmul.f32 %v505_v56, %v682_v1  ;;  %v636_v55 = vld [vmem:[%s847_s0 + $0x58] sm:$0xff]  }
  0x12   :  { %v134_v2 = vadd.f32 %v696_v7, %v95_v57  ;;  %v97_v3 = vmul.f32 %v508_v58, %v682_v1  ;;  %vm164_vm8 = vcmp.gt.f32.partialorder %v132_v60, 0.0  ;;  %v196_v5 = vmul.f32 0.2, %v132_v60 }
  0x13   :  { %vm165_vm9 = vcmp.gt.f32.partialorder %v133_v61, 0.0  ;;  %v197_v6 = vmul.f32 0.2, %v133_v61  ;;  %643 = vst [vmem:[%s850_s3 + $0x18] sm:$0xff] %v564_v63   ;;  %v135_v8 = vadd.f32 %v696_v7, %v96_v0  ;;  %v98_v10 = vmul.f32 %v509_v62, %v682_v1 }
  0x14   :  { %vm166_vm10 = vcmp.gt.f32.partialorder %v134_v2, 0.0  ;;  %v198_v9 = vmul.f32 0.2, %v134_v2  ;;  %v228_v11 = vsel %vm164_vm8, %v132_v60, %v196_v5  ;;  %v136_v13 = vadd.f32 %v696_v7, %v97_v3  ;;  %v637_v60 = vld [vmem:[%s847_s0 + $0x60] sm:$0xff]  }
  0x15   :  { %v229_v12 = vsel %vm165_vm9, %v133_v61, %v197_v6  ;;  %v512_v14 = vunpack.c.l.bf16 %v632_v4  ;;  %vm167_vm11 = vcmp.gt.f32.partialorder %v135_v8, 0.0  ;;  %v199_v17 = vmul.f32 0.2, %v135_v8 }
  0x16   :  { %v569_v16 = vpack.c.bf16 %v229_v12, %v228_v11  ;;  %v230_v18 = vsel %vm166_vm10, %v134_v2, %v198_v9  ;;  %v137_v19 = vadd.f32 %v696_v7, %v98_v10  ;;  %vm168_vm12 = vcmp.gt.f32.partialorder %v136_v13, 0.0  ;;  %v638_v9 = vld [vmem:[%s847_s0 + $0x68] sm:$0xff]  }
  0x17   :  { %v200_v20 = vmul.f32 0.2, %v136_v13  ;;  %v513_v21 = vunpack.c.h.bf16 %v632_v4  ;;  %v231_v22 = vsel %vm167_vm11, %v135_v8, %v199_v17  ;;  %v99_v23 = vmul.f32 %v512_v14, %v682_v1 }
  0x18   :  { %644 = vst [vmem:[%s850_s3 + $0x20] sm:$0xff] %v569_v16   ;;  %v516_v24 = vunpack.c.l.bf16 %v633_v15  ;;  %v517_v25 = vunpack.c.h.bf16 %v633_v15  ;;  %v574_v28 = vpack.c.bf16 %v231_v22, %v230_v18  ;;  %vm169_vm13 = vcmp.gt.f32.partialorder %v137_v19, 0.0 }
  0x19   :  { %v201_v29 = vmul.f32 0.2, %v137_v19  ;;  %v232_v30 = vsel %vm168_vm12, %v136_v13, %v200_v20  ;;  %v100_v31 = vmul.f32 %v513_v21, %v682_v1  ;;  %v138_v32 = vadd.f32 %v696_v7, %v99_v23 }
  0x1a   :  { %v101_v33 = vmul.f32 %v516_v24, %v682_v1  ;;  %v102_v34 = vmul.f32 %v517_v25, %v682_v1  ;;  %645 = vst [vmem:[%s850_s3 + $0x28] sm:$0xff] %v574_v28   ;;  %v520_v36 = vunpack.c.l.bf16 %v634_v26  ;;  %v521_v37 = vunpack.c.h.bf16 %v634_v26  ;;  %v639_v28 = vld [vmem:[%s847_s0 + $0x70] sm:$0xff]  }
  0x1b   :  { %v233_v35 = vsel %vm169_vm13, %v137_v19, %v201_v29  ;;  %v524_v38 = vunpack.c.l.bf16 %v635_v27  ;;  %v139_v40 = vadd.f32 %v696_v7, %v100_v31  ;;  %vm170_vm14 = vcmp.gt.f32.partialorder %v138_v32, 0.0 }
  0x1c   :  { %v579_v39 = vpack.c.bf16 %v233_v35, %v232_v30  ;;  %v202_v41 = vmul.f32 0.2, %v138_v32  ;;  %v140_v42 = vadd.f32 %v696_v7, %v101_v33  ;;  %v141_v43 = vadd.f32 %v696_v7, %v102_v34 }
  0x1d   :  { %v103_v44 = vmul.f32 %v520_v36, %v682_v1  ;;  %v104_v45 = vmul.f32 %v521_v37, %v682_v1  ;;  %vm171_vm15 = vcmp.gt.f32.partialorder %v139_v40, 0.0  ;;  %v203_v46 = vmul.f32 0.2, %v139_v40  ;;  %v640_v37 = vld [vmem:[%s847_s0 + $0x78] sm:$0xff]  }
  0x1e   :  { %646 = vst [vmem:[%s850_s3 + $0x30] sm:$0xff] %v579_v39   ;;  %v234_v47 = vsel %vm170_vm14, %v138_v32, %v202_v41  ;;  %v525_v48 = vunpack.c.h.bf16 %v635_v27  ;;  %vm172_vm0 = vcmp.gt.f32.partialorder %v140_v42, 0.0  ;;  %vm173_vm1 = vcmp.gt.f32.partialorder %v141_v43, 0.0 }
  0x1f   :  { %v204_v49 = vmul.f32 0.2, %v140_v42  ;;  %v205_v50 = vmul.f32 0.2, %v141_v43  ;;  %v235_v51 = vsel %vm171_vm15, %v139_v40, %v203_v46  ;;  %v142_v52 = vadd.f32 %v696_v7, %v103_v44 }
  0x20   :  { %v143_v53 = vadd.f32 %v696_v7, %v104_v45  ;;  %v105_v54 = vmul.f32 %v524_v38, %v682_v1  ;;  %v584_v56 = vpack.c.bf16 %v235_v51, %v234_v47  ;;  %v106_v59 = vmul.f32 %v525_v48, %v682_v1 }
  0x21   :  { %v236_v57 = vsel %vm172_vm0, %v140_v42, %v204_v49  ;;  %v237_v58 = vsel %vm173_vm1, %v141_v43, %v205_v50  ;;  %vm174_vm2 = vcmp.gt.f32.partialorder %v142_v52, 0.0  ;;  %v206_v62 = vmul.f32 0.2, %v142_v52 }
  0x22   :  { %v589_v61 = vpack.c.bf16 %v237_v58, %v236_v57  ;;  %vm175_vm3 = vcmp.gt.f32.partialorder %v143_v53, 0.0  ;;  %647 = vst [vmem:[%s850_s3 + $0x38] sm:$0xff] %v584_v56   ;;  %v207_v63 = vmul.f32 0.2, %v143_v53  ;;  %v144_v0 = vadd.f32 %v696_v7, %v105_v54 }
  0x23   :  { %v145_v2 = vadd.f32 %v696_v7, %v106_v59  ;;  %v528_v3 = vunpack.c.l.bf16 %v636_v55  ;;  %v238_v4 = vsel %vm174_vm2, %v142_v52, %v206_v62  ;;  %v529_v5 = vunpack.c.h.bf16 %v636_v55 }
  0x24   :  { %648 = vst [vmem:[%s850_s3 + $0x40] sm:$0xff] %v589_v61   ;;  %v532_v6 = vunpack.c.l.bf16 %v637_v60  ;;  %v533_v8 = vunpack.c.h.bf16 %v637_v60  ;;  %v239_v10 = vsel %vm175_vm3, %v143_v53, %v207_v63  ;;  %vm176_vm4 = vcmp.gt.f32.partialorder %v144_v0, 0.0 }
  0x25   :  { %vm177_vm5 = vcmp.gt.f32.partialorder %v145_v2, 0.0  ;;  %v208_v11 = vmul.f32 0.2, %v144_v0  ;;  %v594_v12 = vpack.c.bf16 %v239_v10, %v238_v4  ;;  %v209_v13 = vmul.f32 0.2, %v145_v2 }
  0x26   :  { %v107_v14 = vmul.f32 %v528_v3, %v682_v1  ;;  %v108_v15 = vmul.f32 %v529_v5, %v682_v1  ;;  %v109_v17 = vmul.f32 %v532_v6, %v682_v1  ;;  %v110_v18 = vmul.f32 %v533_v8, %v682_v1 }
  0x27   :  { %v240_v16 = vsel %vm176_vm4, %v144_v0, %v208_v11  ;;  %v536_v19 = vunpack.c.l.bf16 %v638_v9  ;;  %649 = vst [vmem:[%s850_s3 + $0x48] sm:$0xff] %v594_v12   ;;  %v241_v20 = vsel %vm177_vm5, %v145_v2, %v209_v13  ;;  %v537_v23 = vunpack.c.h.bf16 %v638_v9 }
  0x28   :  { %v146_v21 = vadd.f32 %v696_v7, %v107_v14  ;;  %v147_v22 = vadd.f32 %v696_v7, %v108_v15  ;;  %v599_v24 = vpack.c.bf16 %v241_v20, %v240_v16  ;;  %v148_v25 = vadd.f32 %v696_v7, %v109_v17 }
  0x29   :  { %v149_v26 = vadd.f32 %v696_v7, %v110_v18  ;;  %v111_v27 = vmul.f32 %v536_v19, %v682_v1  ;;  %v112_v35 = vmul.f32 %v537_v23, %v682_v1  ;;  %v540_v41 = vunpack.c.l.bf16 %v639_v28 }
  0x2a   :  { %vm178_vm6 = vcmp.gt.f32.partialorder %v146_v21, 0.0  ;;  %vm179_vm7 = vcmp.gt.f32.partialorder %v147_v22, 0.0  ;;  %v210_v29 = vmul.f32 0.2, %v146_v21  ;;  %v211_v30 = vmul.f32 0.2, %v147_v22 }
  0x2b   :  { %650 = vst [vmem:[%s850_s3 + $0x50] sm:$0xff] %v599_v24   ;;  %vm180_vm8 = vcmp.gt.f32.partialorder %v148_v25, 0.0  ;;  %vm181_vm9 = vcmp.gt.f32.partialorder %v149_v26, 0.0  ;;  %v212_v31 = vmul.f32 0.2, %v148_v25  ;;  %v150_v36 = vadd.f32 %v696_v7, %v111_v27 }
  0x2c   :  { %v213_v32 = vmul.f32 0.2, %v149_v26  ;;  %v242_v33 = vsel %vm178_vm6, %v146_v21, %v210_v29  ;;  %v243_v34 = vsel %vm179_vm7, %v147_v22, %v211_v30  ;;  %v151_v43 = vadd.f32 %v696_v7, %v112_v35 }
  0x2d   :  { %v604_v38 = vpack.c.bf16 %v243_v34, %v242_v33  ;;  %v244_v39 = vsel %vm180_vm8, %v148_v25, %v212_v31  ;;  %vm182_vm10 = vcmp.gt.f32.partialorder %v150_v36, 0.0  ;;  %v214_v44 = vmul.f32 0.2, %v150_v36 }
  0x2e   :  { %v245_v40 = vsel %vm181_vm9, %v149_v26, %v213_v32  ;;  %v541_v45 = vunpack.c.h.bf16 %v639_v28  ;;  %v113_v46 = vmul.f32 %v540_v41, %v682_v1  ;;  %v544_v47 = vunpack.c.l.bf16 %v640_v37 }
  0x2f   :  { %v609_v42 = vpack.c.bf16 %v245_v40, %v244_v39  ;;  %651 = vst [vmem:[%s850_s3 + $0x58] sm:$0xff] %v604_v38   ;;  %v545_v48 = vunpack.c.h.bf16 %v640_v37  ;;  %vm183_vm11 = vcmp.gt.f32.partialorder %v151_v43, 0.0  ;;  %v215_v49 = vmul.f32 0.2, %v151_v43 }
  0x30   :  { %v246_v50 = vsel %vm182_vm10, %v150_v36, %v214_v44  ;;  %v114_v51 = vmul.f32 %v541_v45, %v682_v1  ;;  %v152_v52 = vadd.f32 %v696_v7, %v113_v46  ;;  %v115_v53 = vmul.f32 %v544_v47, %v682_v1 }
  0x31   :  { %652 = vst [vmem:[%s850_s3 + $0x60] sm:$0xff] %v609_v42   ;;  %v116_v54 = vmul.f32 %v545_v48, %v682_v1  ;;  %v247_v55 = vsel %vm183_vm11, %v151_v43, %v215_v49 }
  0x32   :  { %v614_v56 = vpack.c.bf16 %v247_v55, %v246_v50  ;;  %v153_v57 = vadd.f32 %v696_v7, %v114_v51  ;;  %vm184_vm12 = vcmp.gt.f32.partialorder %v152_v52, 0.0  ;;  %v216_v58 = vmul.f32 0.2, %v152_v52 }
  0x33   :  { %v154_v59 = vadd.f32 %v696_v7, %v115_v53  ;;  %v155_v60 = vadd.f32 %v696_v7, %v116_v54 }
  0x34   :  { %653 = vst [vmem:[%s850_s3 + $0x68] sm:$0xff] %v614_v56   ;;  %vm185_vm13 = vcmp.gt.f32.partialorder %v153_v57, 0.0  ;;  %v217_v61 = vmul.f32 0.2, %v153_v57  ;;  %v248_v62 = vsel %vm184_vm12, %v152_v52, %v216_v58 }
  0x35   :  { %vm186_vm14 = vcmp.gt.f32.partialorder %v154_v59, 0.0  ;;  %vm187_vm15 = vcmp.gt.f32.partialorder %v155_v60, 0.0  ;;  %v218_v1 = vmul.f32 0.2, %v154_v59  ;;  %v219_v63 = vmul.f32 0.2, %v155_v60 }
  0x36   :  { %v249_v0 = vsel %vm185_vm13, %v153_v57, %v217_v61 }
  0x37   :  { %v619_v2 = vpack.c.bf16 %v249_v0, %v248_v62  ;;  %v250_v3 = vsel %vm186_vm14, %v154_v59, %v218_v1  ;;  %v251_v4 = vsel %vm187_vm15, %v155_v60, %v219_v63 }
  0x38   :  { %v624_v5 = vpack.c.bf16 %v251_v4, %v250_v3 }
  0x39   :  { %654 = vst [vmem:[%s850_s3 + $0x70] sm:$0xff] %v619_v2  }
  0x3a   :  { %655 = vst [vmem:[%s850_s3 + $0x78] sm:$0xff] %v624_v5  }

// kernel: discriminator_forward.6
= control target key start
LH: loop header
LB: loop body
LE: loop exit
PB: predicated region body
PF: predicated region fallthrough
CT: control target
= control target key end

     0   :  { %v3910_v0 = vmov 0   ;;  %vm1298_vm0 = vcmask 523264   ;;  %s5110_s1 = inlined_call_operand.vmem [shape: bf16[576,128], index: 1, kind: input, shape index: {}]   ;;  %s5111_s0 = inlined_call_operand.vmem [shape: bf16[512,576], index: 0, kind: input, shape index: {}]   ;;  %s5112_s2 = inlined_call_operand.vmem [shape: f32[1,128], index: 2, kind: input, shape index: {}]   ;;  %s5113_s3 = inlined_call_operand.vmem [shape: bf16[512,128], index: 3, kind: output, shape index: {0}]   ;;  %s5114_s4 = inlined_call_operand.vmem [shape: f32[1,128], index: 4, kind: output, shape index: {1}]   ;;  %s5115_s5 = inlined_call_operand.vmem [shape: f32[1,128], index: 5, kind: output, shape index: {2}]  }
   0x1   :  { %1395 = vmatprep.subr.bf16.mxu0 %v3910_v0  ;;  %3535 = vmatprep.subr.bf16.mxu1 %v3910_v0  ;;  %v3649_v1 = vld [vmem:[%s5110_s1] sm:$0xff]   ;;  %v3650_v2 = vld [vmem:[%s5110_s1 + $0x8] sm:$0xff]   ;;  %v3651_v3 = vld [vmem:[%s5110_s1 + $0x10] sm:$0xff]  }
   0x2   :  { %1396 = vmatpush1.bf16.msra.mxu0 %v3649_v1  ;;  %3551 = vmatpush1.bf16.msra.mxu1 %v3649_v1  ;;  %v3652_v4 = vld [vmem:[%s5110_s1 + $0x18] sm:$0xff]   ;;  %v3653_v5 = vld [vmem:[%s5110_s1 + $0x20] sm:$0xff]   ;;  %v3654_v7 = vld [vmem:[%s5110_s1 + $0x28] sm:$0xff]  }
   0x3   :  { %1397 = vmatprep.subr.bf16.mxu0 %v3910_v0  ;;  %3536 = vmatprep.subr.bf16.mxu1 %v3910_v0  ;;  %v3667_v6 = vld [vmem:[%s5111_s0 + $0x4] ss:$20 sps:$4 sm:$0xff]   ;;  %v3655_v9 = vld [vmem:[%s5110_s1 + $0x30] sm:$0xff]   ;;  %v3658_v12 = vld [vmem:[%s5110_s1 + $0x48] sm:$0xff]  }
   0x4   :  { %v3670_v8 = vld [vmem:[%s5111_s0 + $0x144] ss:$20 sps:$4 sm:$0xff]   ;;  %1427 = vmatprep.mubr.bf16.mxu0 %v3667_v6  ;;  %v3659_v13 = vld [vmem:[%s5110_s1 + $0x50] sm:$0xff]   ;;  %v3662_v16 = vld [vmem:[%s5110_s1 + $0x68] sm:$0xff]  }
   0x5   :  { %1491 = vmatprep.mubr.bf16.mxu1 %v3670_v8  ;;  %v3656_v10 = vld [vmem:[%s5110_s1 + $0x38] sm:$0xff]   ;;  %v3657_v11 = vld [vmem:[%s5110_s1 + $0x40] sm:$0xff]   ;;  %v3663_v17 = vld [vmem:[%s5110_s1 + $0x70] sm:$0xff]  }
   0x6   :  { %1398 = vmatpush1.bf16.msra.mxu0 %v3650_v2  ;;  %3552 = vmatpush1.bf16.msra.mxu1 %v3650_v2  ;;  %v3660_v14 = vld [vmem:[%s5110_s1 + $0x58] sm:$0xff]   ;;  %v3661_v15 = vld [vmem:[%s5110_s1 + $0x60] sm:$0xff]   ;;  %v3720_v25 = vld [vmem:[%s5110_s1 + $0x108] sm:$0xff]  }
   0x7   :  { %1399 = vmatprep.subr.bf16.mxu0 %v3910_v0  ;;  %3537 = vmatprep.subr.bf16.mxu1 %v3910_v0  ;;  %v3664_v18 = vld [vmem:[%s5110_s1 + $0x78] sm:$0xff]   ;;  %v3671_v19 = vld [vmem:[%s5110_s1 + $0x100] sm:$0xff]   ;;  %v3673_v26 = vld [vmem:[%s5110_s1 + $0x88] sm:$0xff]  }
   0x8   :  { %v3665_v20 = vld [vmem:[%s5111_s0] ss:$20 sps:$4 sm:$0xff]   ;;  %v3678_v27 = vld [vmem:[%s5111_s0 + $0x28] ss:$20 sps:$4 sm:$0xff]   ;;  %v3686_v34 = vld [vmem:[%s5111_s0 + $0x50] ss:$20 sps:$4 sm:$0xff]  }
   0x9   :  { %v3668_v21 = vld [vmem:[%s5111_s0 + $0x140] ss:$20 sps:$4 sm:$0xff]   ;;  %v3679_v28 = vld [vmem:[%s5111_s0 + $0x168] ss:$20 sps:$4 sm:$0xff]   ;;  %v3687_v35 = vld [vmem:[%s5111_s0 + $0x190] ss:$20 sps:$4 sm:$0xff]  }
   0xa   :  { %1400 = vmatpush1.bf16.msra.mxu0 %v3651_v3  ;;  %3553 = vmatpush1.bf16.msra.mxu1 %v3651_v3  ;;  %v3672_v22 = vld [vmem:[%s5110_s1 + $0x80] sm:$0xff]   ;;  %v3680_v29 = vld [vmem:[%s5110_s1 + $0x90] sm:$0xff]   ;;  %v3681_v33 = vld [vmem:[%s5110_s1 + $0x98] sm:$0xff]  }
   0xb   :  { %1401 = vmatprep.subr.bf16.mxu0 %v3910_v0  ;;  %3538 = vmatprep.subr.bf16.mxu1 %v3910_v0  ;;  %v3674_v23 = vld [vmem:[%s5111_s0 + $0x2c] ss:$20 sps:$4 sm:$0xff]   ;;  %v3761_v30 = vld [vmem:[%s5110_s1 + $0x110] sm:$0xff]   ;;  %v3698_v43 = vld [vmem:[%s5111_s0 + $0xa4] ss:$20 sps:$4 sm:$0xff]  }
   0xc   :  { %v3676_v24 = vld [vmem:[%s5111_s0 + $0x16c] ss:$20 sps:$4 sm:$0xff]   ;;  %v3682_v31 = vld [vmem:[%s5111_s0 + $0x54] ss:$20 sps:$4 sm:$0xff]   ;;  %v3690_v37 = vld [vmem:[%s5111_s0 + $0x7c] ss:$20 sps:$4 sm:$0xff]  }
   0xd   :  { %v3684_v32 = vld [vmem:[%s5111_s0 + $0x194] ss:$20 sps:$4 sm:$0xff]   ;;  %v3688_v36 = vld [vmem:[%s5110_s1 + $0xa0] sm:$0xff]   ;;  %v3692_v38 = vld [vmem:[%s5111_s0 + $0x1bc] ss:$20 sps:$4 sm:$0xff]  }
   0xe   :  { %1402 = vmatpush1.bf16.msra.mxu0 %v3652_v4  ;;  %3554 = vmatpush1.bf16.msra.mxu1 %v3652_v4  ;;  %v3689_v39 = vld [vmem:[%s5110_s1 + $0xa8] sm:$0xff]   ;;  %v3696_v42 = vld [vmem:[%s5110_s1 + $0xb0] sm:$0xff]   ;;  %v3798_v44 = vld [vmem:[%s5110_s1 + $0x118] sm:$0xff]  }
   0xf   :  { %1403 = vmatprep.subr.bf16.mxu0 %v3910_v0  ;;  %3539 = vmatprep.subr.bf16.mxu1 %v3910_v0  ;;  %v3694_v40 = vld [vmem:[%s5111_s0 + $0x78] ss:$20 sps:$4 sm:$0xff]   ;;  %v3702_v47 = vld [vmem:[%s5111_s0 + $0xa0] ss:$20 sps:$4 sm:$0xff]   ;;  %v3710_v53 = vld [vmem:[%s5111_s0 + $0xc8] ss:$20 sps:$4 sm:$0xff]  }
  0x10   :  { %v3695_v41 = vld [vmem:[%s5111_s0 + $0x1b8] ss:$20 sps:$4 sm:$0xff]   ;;  %v3703_v48 = vld [vmem:[%s5111_s0 + $0x1e0] ss:$20 sps:$4 sm:$0xff]   ;;  %v3711_v54 = vld [vmem:[%s5111_s0 + $0x208] ss:$20 sps:$4 sm:$0xff]  }
  0x11   :  { %v3700_v45 = vld [vmem:[%s5111_s0 + $0x1e4] ss:$20 sps:$4 sm:$0xff]   ;;  %v3706_v50 = vld [vmem:[%s5111_s0 + $0xcc] ss:$20 sps:$4 sm:$0xff]   ;;  %v3712_v55 = vld [vmem:[%s5110_s1 + $0xd0] sm:$0xff]  }
  0x12   :  { %1404 = vmatpush1.bf16.msra.mxu0 %v3653_v5  ;;  %3555 = vmatpush1.bf16.msra.mxu1 %v3653_v5  ;;  %v3697_v46 = vld [vmem:[%s5110_s1 + $0xb8] sm:$0xff]   ;;  %v3704_v49 = vld [vmem:[%s5110_s1 + $0xc0] sm:$0xff]   ;;  %v3705_v52 = vld [vmem:[%s5110_s1 + $0xc8] sm:$0xff]  }
  0x13   :  { %1405 = vmatprep.subr.bf16.mxu0 %v3910_v0  ;;  %3540 = vmatprep.subr.bf16.mxu1 %v3910_v0  ;;  %v3708_v51 = vld [vmem:[%s5111_s0 + $0x20c] ss:$20 sps:$4 sm:$0xff]   ;;  %v3714_v56 = vld [vmem:[%s5111_s0 + $0xf4] ss:$20 sps:$4 sm:$0xff]   ;;  %v3713_v58 = vld [vmem:[%s5110_s1 + $0xd8] sm:$0xff]  }
  0x14   :  { %v3716_v57 = vld [vmem:[%s5111_s0 + $0x234] ss:$20 sps:$4 sm:$0xff]   ;;  %v3718_v59 = vld [vmem:[%s5111_s0 + $0xf0] ss:$20 sps:$4 sm:$0xff]   ;;  %v3727_v2 = vld [vmem:[%s5111_s0 + $0x118] ss:$20 sps:$4 sm:$0xff]  }
  0x15   :  { %v3719_v60 = vld [vmem:[%s5111_s0 + $0x230] ss:$20 sps:$4 sm:$0xff]   ;;  %v3722_v1 = vld [vmem:[%s5110_s1 + $0xe8] sm:$0xff]  }
  0x16   :  { %1406 = vmatpush1.bf16.msra.mxu0 %v3654_v7  ;;  %3556 = vmatpush1.bf16.msra.mxu1 %v3654_v7  ;;  %v3721_v61 = vld [vmem:[%s5110_s1 + $0xe0] sm:$0xff]   ;;  %v3723_v62 = vld [vmem:[%s5111_s0 + $0x11c] ss:$20 sps:$4 sm:$0xff]   ;;  %v3728_v3 = vld [vmem:[%s5111_s0 + $0x258] ss:$20 sps:$4 sm:$0xff]  }
  0x17   :  { %1407 = vmatprep.subr.bf16.mxu0 %v3910_v0  ;;  %3541 = vmatprep.subr.bf16.mxu1 %v3910_v0  ;;  %v3725_v63 = vld [vmem:[%s5111_s0 + $0x25c] ss:$20 sps:$4 sm:$0xff]   ;;  %v3731_v5 = vld [vmem:[%s5111_s0 + $0x284] ss:$20 sps:$4 sm:$0xff]   ;;  %v3735_v6 = vld [vmem:[%s5111_s0 + $0xc] ss:$20 sps:$4 sm:$0xff]  }
  0x18   :  { %v3729_v4 = vld [vmem:[%s5110_s1 + $0xf0] sm:$0xff]   ;;  %v3730_v7 = vld [vmem:[%s5110_s1 + $0xf8] sm:$0xff]  }
  0x19   :  { %v3733_v8 = vld [vmem:[%s5111_s0 + $0x8] ss:$20 sps:$4 sm:$0xff]  }
  0x1a   :  { %1408 = vmatpush1.bf16.msra.mxu0 %v3655_v9  ;;  %3557 = vmatpush1.bf16.msra.mxu1 %v3655_v9  ;;  %v3736_v9 = vld [vmem:[%s5111_s0 + $0x280] ss:$20 sps:$4 sm:$0xff]  }
  0x1b   :  { %1409 = vmatprep.subr.bf16.mxu0 %v3910_v0  ;;  %3542 = vmatprep.subr.bf16.mxu1 %v3910_v0 }
  0x1e   :  { %1410 = vmatpush1.bf16.msra.mxu0 %v3656_v10  ;;  %3558 = vmatpush1.bf16.msra.mxu1 %v3656_v10  ;;  %v3737_v10 = vld [vmem:[%s5111_s0 + $0x2ac] ss:$20 sps:$4 sm:$0xff]  }
  0x1f   :  { %1411 = vmatprep.subr.bf16.mxu0 %v3910_v0  ;;  %3543 = vmatprep.subr.bf16.mxu1 %v3910_v0 }
  0x22   :  { %1412 = vmatpush1.bf16.msra.mxu0 %v3657_v11  ;;  %3559 = vmatpush1.bf16.msra.mxu1 %v3657_v11  ;;  %v3739_v11 = vld [vmem:[%s5111_s0 + $0x34] ss:$20 sps:$4 sm:$0xff]  }
  0x23   :  { %1413 = vmatprep.subr.bf16.mxu0 %v3910_v0  ;;  %3544 = vmatprep.subr.bf16.mxu1 %v3910_v0 }
  0x26   :  { %1414 = vmatpush1.bf16.msra.mxu0 %v3658_v12  ;;  %3560 = vmatpush1.bf16.msra.mxu1 %v3658_v12  ;;  %v3742_v12 = vld [vmem:[%s5111_s0 + $0x30] ss:$20 sps:$4 sm:$0xff]  }
  0x27   :  { %1415 = vmatprep.subr.bf16.mxu0 %v3910_v0  ;;  %3545 = vmatprep.subr.bf16.mxu1 %v3910_v0 }
  0x2a   :  { %1416 = vmatpush1.bf16.msra.mxu0 %v3659_v13  ;;  %3561 = vmatpush1.bf16.msra.mxu1 %v3659_v13  ;;  %v3743_v13 = vld [vmem:[%s5111_s0 + $0x2d4] ss:$20 sps:$4 sm:$0xff]  }
  0x2b   :  { %1417 = vmatprep.subr.bf16.mxu0 %v3910_v0  ;;  %3546 = vmatprep.subr.bf16.mxu1 %v3910_v0 }
  0x2e   :  { %1418 = vmatpush1.bf16.msra.mxu0 %v3660_v14  ;;  %3562 = vmatpush1.bf16.msra.mxu1 %v3660_v14  ;;  %v3745_v14 = vld [vmem:[%s5111_s0 + $0x5c] ss:$20 sps:$4 sm:$0xff]  }
  0x2f   :  { %1419 = vmatprep.subr.bf16.mxu0 %v3910_v0  ;;  %3547 = vmatprep.subr.bf16.mxu1 %v3910_v0 }
  0x32   :  { %1420 = vmatpush1.bf16.msra.mxu0 %v3661_v15  ;;  %3563 = vmatpush1.bf16.msra.mxu1 %v3661_v15  ;;  %v3747_v15 = vld [vmem:[%s5111_s0 + $0x2d0] ss:$20 sps:$4 sm:$0xff]  }
  0x33   :  { %1421 = vmatprep.subr.bf16.mxu0 %v3910_v0  ;;  %3548 = vmatprep.subr.bf16.mxu1 %v3910_v0 }
  0x36   :  { %1422 = vmatpush1.bf16.msra.mxu0 %v3662_v16  ;;  %3564 = vmatpush1.bf16.msra.mxu1 %v3662_v16  ;;  %v3748_v16 = vld [vmem:[%s5111_s0 + $0x58] ss:$20 sps:$4 sm:$0xff]  }
  0x37   :  { %1423 = vmatprep.subr.bf16.mxu0 %v3910_v0  ;;  %3549 = vmatprep.subr.bf16.mxu1 %v3910_v0 }
  0x3a   :  { %1424 = vmatpush1.bf16.msra.mxu0 %v3663_v17  ;;  %3565 = vmatpush1.bf16.msra.mxu1 %v3663_v17  ;;  %v3749_v17 = vld [vmem:[%s5111_s0 + $0x2fc] ss:$20 sps:$4 sm:$0xff]  }
  0x3b   :  { %1425 = vmatprep.subr.bf16.mxu0 %v3910_v0  ;;  %3550 = vmatprep.subr.bf16.mxu1 %v3910_v0 }
  0x3e   :  { %1426 = vmatpush1.bf16.msra.mxu0 %v3664_v18  ;;  %3566 = vmatpush1.bf16.msra.mxu1 %v3664_v18  ;;  %v3751_v18 = vld [vmem:[%s5111_s0 + $0x84] ss:$20 sps:$4 sm:$0xff]  }
  0x3f   :  { %1684 = vmatprep.subr.bf16.mxu0 %v3910_v0  ;;  %3463 = vmatprep.subr.bf16.mxu1 %v3671_v19 }
  0x41   :  { %1428 = vmatmul.mubr.bf16.vlgmr.msra.gmra.mrb[0].mxu0 %v3665_v20  ;;  %1492 = vmatmul.mubr.bf16.vlgmr.msra.gmra.mrb[0].mxu1 %v3668_v21  ;;  %v3754_v20 = vld [vmem:[%s5111_s0 + $0x80] ss:$20 sps:$4 sm:$0xff]   ;;  %v3755_v21 = vld [vmem:[%s5111_s0 + $0x324] ss:$20 sps:$4 sm:$0xff]  }
  0x42   :  { %1685 = vmatpush1.bf16.msra.mxu0 %v3672_v22  ;;  %3464 = vmatpush3.bf16.msra.mxu1 %v3671_v19  ;;  %v3753_v19 = vld [vmem:[%s5111_s0 + $0x2f8] ss:$20 sps:$4 sm:$0xff]  }
  0x43   :  { %1686 = vmatprep.subr.bf16.mxu0 %v3910_v0  ;;  %1435 = vmatprep.mubr.bf16.mxu0 %v3674_v23  ;;  %v3757_v22 = vld [vmem:[%s5111_s0 + $0xac] ss:$20 sps:$4 sm:$0xff]  }
  0x44   :  { %1499 = vmatprep.mubr.bf16.mxu1 %v3676_v24  ;;  %3465 = vmatprep.subr.bf16.mxu1 %v3720_v25  ;;  %v3759_v23 = vld [vmem:[%s5111_s0 + $0x320] ss:$20 sps:$4 sm:$0xff]   ;;  %v3760_v24 = vld [vmem:[%s5111_s0 + $0xa8] ss:$20 sps:$4 sm:$0xff]  }
  0x46   :  { %1687 = vmatpush1.bf16.msra.mxu0 %v3673_v26  ;;  %3466 = vmatpush3.bf16.msra.mxu1 %v3720_v25  ;;  %v3762_v25 = vld [vmem:[%s5111_s0 + $0x34c] ss:$20 sps:$4 sm:$0xff]   ;;  %v3764_v26 = vld [vmem:[%s5111_s0 + $0xd4] ss:$20 sps:$4 sm:$0xff]  }
  0x47   :  { %1688 = vmatprep.subr.bf16.mxu0 %v3910_v0  ;;  %3467 = vmatprep.subr.bf16.mxu1 %v3761_v30 }
  0x49   :  { %1436 = vmatmul.mubr.bf16.gmra.mrb[4].mxu0 %v3678_v27  ;;  %1500 = vmatmul.mubr.bf16.gmra.mrb[4].mxu1 %v3679_v28  ;;  %v3766_v27 = vld [vmem:[%s5111_s0 + $0x348] ss:$20 sps:$4 sm:$0xff]   ;;  %v3767_v28 = vld [vmem:[%s5111_s0 + $0xd0] ss:$20 sps:$4 sm:$0xff]  }
  0x4a   :  { %1689 = vmatpush1.bf16.msra.mxu0 %v3680_v29  ;;  %1443 = vmatprep.mubr.bf16.mxu0 %v3682_v31  ;;  %v3768_v29 = vld [vmem:[%s5111_s0 + $0x374] ss:$20 sps:$4 sm:$0xff]   ;;  %v3772_v31 = vld [vmem:[%s5111_s0 + $0x370] ss:$20 sps:$4 sm:$0xff]  }
  0x4b   :  { %1690 = vmatprep.subr.bf16.mxu0 %v3910_v0  ;;  %1507 = vmatprep.mubr.bf16.mxu1 %v3684_v32  ;;  %v3773_v32 = vld [vmem:[%s5111_s0 + $0xf8] ss:$20 sps:$4 sm:$0xff]  }
  0x4c   :  { %3468 = vmatpush3.bf16.msra.mxu1 %v3761_v30  ;;  %v3770_v30 = vld [vmem:[%s5111_s0 + $0xfc] ss:$20 sps:$4 sm:$0xff]  }
  0x4d   :  { %3469 = vmatprep.subr.bf16.mxu1 %v3798_v44 }
  0x4e   :  { %1691 = vmatpush1.bf16.msra.mxu0 %v3681_v33  ;;  %v3774_v33 = vld [vmem:[%s5111_s0 + $0x39c] ss:$20 sps:$4 sm:$0xff]  }
  0x4f   :  { %1692 = vmatprep.subr.bf16.mxu0 %v3910_v0 }
  0x50   :  { %3470 = vmatpush3.bf16.msra.mxu1 %v3798_v44  ;;  %v3791_v44 = vld [vmem:[%s5111_s0 + $0x170] ss:$20 sps:$4 sm:$0xff]  }
  0x51   :  { %1444 = vmatmul.mubr.bf16.gmra.mrb[8].mxu0 %v3686_v34  ;;  %1508 = vmatmul.mubr.bf16.gmra.mrb[8].mxu1 %v3687_v35  ;;  %v3776_v34 = vld [vmem:[%s5111_s0 + $0x124] ss:$20 sps:$4 sm:$0xff]  }
  0x52   :  { %1693 = vmatpush1.bf16.msra.mxu0 %v3688_v36  ;;  %1451 = vmatprep.mubr.bf16.mxu0 %v3690_v37  ;;  %v3778_v35 = vld [vmem:[%s5111_s0 + $0x398] ss:$20 sps:$4 sm:$0xff]   ;;  %v3779_v36 = vld [vmem:[%s5111_s0 + $0x120] ss:$20 sps:$4 sm:$0xff]  }
  0x53   :  { %1694 = vmatprep.subr.bf16.mxu0 %v3910_v0  ;;  %1515 = vmatprep.mubr.bf16.mxu1 %v3692_v38  ;;  %v3780_v37 = vld [vmem:[%s5111_s0 + $0x3c4] ss:$20 sps:$4 sm:$0xff]   ;;  %v3782_v38 = vld [vmem:[%s5111_s0 + $0x14c] ss:$20 sps:$4 sm:$0xff]  }
  0x56   :  { %1695 = vmatpush1.bf16.msra.mxu0 %v3689_v39  ;;  %v3784_v39 = vld [vmem:[%s5111_s0 + $0x3c0] ss:$20 sps:$4 sm:$0xff]  }
  0x57   :  { %1696 = vmatprep.subr.bf16.mxu0 %v3910_v0 }
  0x59   :  { %1452 = vmatmul.mubr.bf16.gmra.mrb[12].mxu0 %v3694_v40  ;;  %1516 = vmatmul.mubr.bf16.gmra.mrb[12].mxu1 %v3695_v41  ;;  %v3785_v40 = vld [vmem:[%s5111_s0 + $0x148] ss:$20 sps:$4 sm:$0xff]   ;;  %v3786_v41 = vld [vmem:[%s5111_s0 + $0x3ec] ss:$20 sps:$4 sm:$0xff]  }
  0x5a   :  { %1697 = vmatpush1.bf16.msra.mxu0 %v3696_v42  ;;  %1459 = vmatprep.mubr.bf16.mxu0 %v3698_v43  ;;  %v3788_v42 = vld [vmem:[%s5111_s0 + $0x174] ss:$20 sps:$4 sm:$0xff]  }
  0x5b   :  { %1698 = vmatprep.subr.bf16.mxu0 %v3910_v0  ;;  %1523 = vmatprep.mubr.bf16.mxu1 %v3700_v45  ;;  %v3790_v43 = vld [vmem:[%s5111_s0 + $0x3e8] ss:$20 sps:$4 sm:$0xff]  }
  0x5c   :  { %v3792_v45 = vld [vmem:[%s5111_s0 + $0x414] ss:$20 sps:$4 sm:$0xff]  }
  0x5e   :  { %1699 = vmatpush1.bf16.msra.mxu0 %v3697_v46  ;;  %v3794_v46 = vld [vmem:[%s5111_s0 + $0x19c] ss:$20 sps:$4 sm:$0xff]  }
  0x5f   :  { %1700 = vmatprep.subr.bf16.mxu0 %v3910_v0 }
  0x61   :  { %1460 = vmatmul.mubr.bf16.gmra.mrb[16].mxu0 %v3702_v47  ;;  %1524 = vmatmul.mubr.bf16.gmra.mrb[16].mxu1 %v3703_v48  ;;  %v3796_v47 = vld [vmem:[%s5111_s0 + $0x410] ss:$20 sps:$4 sm:$0xff]   ;;  %v3797_v48 = vld [vmem:[%s5111_s0 + $0x198] ss:$20 sps:$4 sm:$0xff]  }
  0x62   :  { %1701 = vmatpush1.bf16.msra.mxu0 %v3704_v49  ;;  %1467 = vmatprep.mubr.bf16.mxu0 %v3706_v50  ;;  %v3799_v49 = vld [vmem:[%s5111_s0 + $0x43c] ss:$20 sps:$4 sm:$0xff]   ;;  %v3801_v50 = vld [vmem:[%s5111_s0 + $0x1c4] ss:$20 sps:$4 sm:$0xff]  }
  0x63   :  { %1702 = vmatprep.subr.bf16.mxu0 %v3910_v0  ;;  %1531 = vmatprep.mubr.bf16.mxu1 %v3708_v51  ;;  %v3803_v51 = vld [vmem:[%s5111_s0 + $0x438] ss:$20 sps:$4 sm:$0xff]  }
  0x66   :  { %1703 = vmatpush1.bf16.msra.mxu0 %v3705_v52  ;;  %v3804_v52 = vld [vmem:[%s5111_s0 + $0x1c0] ss:$20 sps:$4 sm:$0xff]  }
  0x67   :  { %1704 = vmatprep.subr.bf16.mxu0 %v3910_v0 }
  0x69   :  { %1468 = vmatmul.mubr.bf16.gmra.mrb[20].mxu0 %v3710_v53  ;;  %1532 = vmatmul.mubr.bf16.gmra.mrb[20].mxu1 %v3711_v54  ;;  %v3805_v53 = vld [vmem:[%s5111_s0 + $0x464] ss:$20 sps:$4 sm:$0xff]   ;;  %v3807_v54 = vld [vmem:[%s5111_s0 + $0x1ec] ss:$20 sps:$4 sm:$0xff]  }
  0x6a   :  { %1705 = vmatpush1.bf16.msra.mxu0 %v3712_v55  ;;  %1475 = vmatprep.mubr.bf16.mxu0 %v3714_v56  ;;  %v3809_v55 = vld [vmem:[%s5111_s0 + $0x460] ss:$20 sps:$4 sm:$0xff]   ;;  %v3810_v56 = vld [vmem:[%s5111_s0 + $0x1e8] ss:$20 sps:$4 sm:$0xff]  }
  0x6b   :  { %1706 = vmatprep.subr.bf16.mxu0 %v3910_v0  ;;  %1539 = vmatprep.mubr.bf16.mxu1 %v3716_v57  ;;  %v3811_v57 = vld [vmem:[%s5111_s0 + $0x48c] ss:$20 sps:$4 sm:$0xff]  }
  0x6e   :  { %1707 = vmatpush1.bf16.msra.mxu0 %v3713_v58  ;;  %v3813_v58 = vld [vmem:[%s5111_s0 + $0x214] ss:$20 sps:$4 sm:$0xff]  }
  0x6f   :  { %1708 = vmatprep.subr.bf16.mxu0 %v3910_v0 }
  0x71   :  { %1476 = vmatmul.mubr.bf16.gmra.mrb[24].mxu0 %v3718_v59  ;;  %1540 = vmatmul.mubr.bf16.gmra.mrb[24].mxu1 %v3719_v60  ;;  %v3815_v59 = vld [vmem:[%s5111_s0 + $0x488] ss:$20 sps:$4 sm:$0xff]   ;;  %v3816_v60 = vld [vmem:[%s5111_s0 + $0x210] ss:$20 sps:$4 sm:$0xff]  }
  0x72   :  { %1709 = vmatpush1.bf16.msra.mxu0 %v3721_v61  ;;  %1483 = vmatprep.mubr.bf16.mxu0 %v3723_v62  ;;  %v3817_v61 = vld [vmem:[%s5111_s0 + $0x4b4] ss:$20 sps:$4 sm:$0xff]   ;;  %v3819_v62 = vld [vmem:[%s5111_s0 + $0x23c] ss:$20 sps:$4 sm:$0xff]  }
  0x73   :  { %1710 = vmatprep.subr.bf16.mxu0 %v3910_v0  ;;  %1547 = vmatprep.mubr.bf16.mxu1 %v3725_v63  ;;  %v3821_v63 = vld [vmem:[%s5111_s0 + $0x4b0] ss:$20 sps:$4 sm:$0xff]  }
  0x76   :  { %1711 = vmatpush1.bf16.msra.mxu0 %v3722_v1  ;;  %v3822_v1 = vld [vmem:[%s5111_s0 + $0x238] ss:$20 sps:$4 sm:$0xff]  }
  0x77   :  { %1712 = vmatprep.subr.bf16.mxu0 %v3910_v0 }
  0x79   :  { %1484 = vmatmul.mubr.bf16.gmra.mrb[28].mxu0 %v3727_v2  ;;  %1548 = vmatmul.mubr.bf16.gmra.mrb[28].mxu1 %v3728_v3  ;;  %v3823_v2 = vld [vmem:[%s5111_s0 + $0x4dc] ss:$20 sps:$4 sm:$0xff]   ;;  %v3825_v3 = vld [vmem:[%s5111_s0 + $0x264] ss:$20 sps:$4 sm:$0xff]  }
  0x7a   :  { %1713 = vmatpush1.bf16.msra.mxu0 %v3729_v4  ;;  %1555 = vmatprep.mubr.bf16.mxu1 %v3731_v5  ;;  %v3827_v4 = vld [vmem:[%s5111_s0 + $0x4d8] ss:$20 sps:$4 sm:$0xff]   ;;  %v3828_v5 = vld [vmem:[%s5111_s0 + $0x260] ss:$20 sps:$4 sm:$0xff]  }
  0x7b   :  { %1714 = vmatprep.subr.bf16.mxu0 %v3910_v0  ;;  %1716 = vmatprep.mubr.bf16.mxu0 %v3735_v6  ;;  %v3741_v0 = vld [vmem:[%s5111_s0 + $0x2a8] ss:$20 sps:$4 sm:$0xff]   ;;  %v3829_v6 = vld [vmem:[%s5111_s0 + $0x28c] ss:$20 sps:$4 sm:$0xff]  }
  0x7e   :  { %1715 = vmatpush1.bf16.msra.mxu0 %v3730_v7  ;;  %v3831_v7 = vld [vmem:[%s5111_s0 + $0x10] ss:$20 sps:$4 sm:$0xff]  }
  0x81   :  { %1556 = vmatmul.mubr.bf16.gmra.mrb[32].mxu1 %v3736_v9  ;;  %1717 = vmatmul.mubr.bf16.vlgmr.msra.gmra.mrb[0].mxu0 %v3733_v8  ;;  %v3832_v8 = vld [vmem:[%s5111_s0 + $0x288] ss:$20 sps:$4 sm:$0xff]   ;;  %v3833_v9 = vld [vmem:[%s5111_s0 + $0x38] ss:$20 sps:$4 sm:$0xff]  }
  0x82   :  { %1563 = vmatprep.mubr.bf16.mxu1 %v3737_v10  ;;  %1724 = vmatprep.mubr.bf16.mxu0 %v3739_v11  ;;  %v3834_v10 = vld [vmem:[%s5111_s0 + $0x2b4] ss:$20 sps:$4 sm:$0xff]  }
  0x83   :  { %v3836_v11 = vld [vmem:[%s5111_s0 + $0x60] ss:$20 sps:$4 sm:$0xff]  }
  0x89   :  { %1564 = vmatmul.mubr.bf16.gmra.mrb[36].mxu1 %v3741_v0  ;;  %1725 = vmatmul.mubr.bf16.gmra.mrb[4].mxu0 %v3742_v12  ;;  %v3837_v0 = vld [vmem:[%s5111_s0 + $0x2b0] ss:$20 sps:$4 sm:$0xff]   ;;  %v3838_v12 = vld [vmem:[%s5111_s0 + $0x88] ss:$20 sps:$4 sm:$0xff]  }
  0x8a   :  { %1571 = vmatprep.mubr.bf16.mxu1 %v3743_v13  ;;  %1732 = vmatprep.mubr.bf16.mxu0 %v3745_v14  ;;  %v3839_v13 = vld [vmem:[%s5111_s0 + $0x2dc] ss:$20 sps:$4 sm:$0xff]  }
  0x8b   :  { %v3841_v14 = vld [vmem:[%s5111_s0 + $0xb0] ss:$20 sps:$4 sm:$0xff]  }
  0x91   :  { %1572 = vmatmul.mubr.bf16.gmra.mrb[40].mxu1 %v3747_v15  ;;  %1733 = vmatmul.mubr.bf16.gmra.mrb[8].mxu0 %v3748_v16  ;;  %v3842_v15 = vld [vmem:[%s5111_s0 + $0x2d8] ss:$20 sps:$4 sm:$0xff]  }
  0x92   :  { %1579 = vmatprep.mubr.bf16.mxu1 %v3749_v17  ;;  %1740 = vmatprep.mubr.bf16.mxu0 %v3751_v18  ;;  %v3843_v16 = vld [vmem:[%s5111_s0 + $0xd8] ss:$20 sps:$4 sm:$0xff]   ;;  %v3846_v18 = vld [vmem:[%s5111_s0 + $0x100] ss:$20 sps:$4 sm:$0xff]  }
  0x93   :  { %v3844_v17 = vld [vmem:[%s5111_s0 + $0x304] ss:$20 sps:$4 sm:$0xff]  }
  0x99   :  { %1580 = vmatmul.mubr.bf16.gmra.mrb[44].mxu1 %v3753_v19  ;;  %1741 = vmatmul.mubr.bf16.gmra.mrb[12].mxu0 %v3754_v20 }
  0x9a   :  { %1587 = vmatprep.mubr.bf16.mxu1 %v3755_v21  ;;  %1748 = vmatprep.mubr.bf16.mxu0 %v3757_v22  ;;  %v3847_v21 = vld [vmem:[%s5111_s0 + $0x300] ss:$20 sps:$4 sm:$0xff]   ;;  %v3848_v22 = vld [vmem:[%s5111_s0 + $0x128] ss:$20 sps:$4 sm:$0xff]  }
  0xa1   :  { %1588 = vmatmul.mubr.bf16.gmra.mrb[48].mxu1 %v3759_v23  ;;  %1749 = vmatmul.mubr.bf16.gmra.mrb[16].mxu0 %v3760_v24  ;;  %v3849_v24 = vld [vmem:[%s5111_s0 + $0x32c] ss:$20 sps:$4 sm:$0xff]  }
  0xa2   :  { %1595 = vmatprep.mubr.bf16.mxu1 %v3762_v25  ;;  %1756 = vmatprep.mubr.bf16.mxu0 %v3764_v26  ;;  %v3851_v25 = vld [vmem:[%s5111_s0 + $0x150] ss:$20 sps:$4 sm:$0xff]  }
  0xa9   :  { %1596 = vmatmul.mubr.bf16.gmra.mrb[52].mxu1 %v3766_v27  ;;  %1757 = vmatmul.mubr.bf16.gmra.mrb[20].mxu0 %v3767_v28 }
  0xaa   :  { %1603 = vmatprep.mubr.bf16.mxu1 %v3768_v29  ;;  %1764 = vmatprep.mubr.bf16.mxu0 %v3770_v30  ;;  %v3852_v29 = vld [vmem:[%s5111_s0 + $0x328] ss:$20 sps:$4 sm:$0xff]   ;;  %v3853_v30 = vld [vmem:[%s5111_s0 + $0x178] ss:$20 sps:$4 sm:$0xff]  }
  0xb1   :  { %1604 = vmatmul.mubr.bf16.gmra.mrb[56].mxu1 %v3772_v31  ;;  %1765 = vmatmul.mubr.bf16.gmra.mrb[24].mxu0 %v3773_v32  ;;  %v3854_v32 = vld [vmem:[%s5111_s0 + $0x354] ss:$20 sps:$4 sm:$0xff]  }
  0xb2   :  { %1611 = vmatprep.mubr.bf16.mxu1 %v3774_v33  ;;  %1772 = vmatprep.mubr.bf16.mxu0 %v3776_v34  ;;  %v3856_v33 = vld [vmem:[%s5111_s0 + $0x1a0] ss:$20 sps:$4 sm:$0xff]  }
  0xb9   :  { %1612 = vmatmul.mubr.bf16.gmra.mrb[60].mxu1 %v3778_v35  ;;  %1773 = vmatmul.mubr.bf16.gmra.mrb[28].mxu0 %v3779_v36 }
  0xba   :  { %1619 = vmatprep.mubr.bf16.mxu1 %v3780_v37  ;;  %1780 = vmatprep.mubr.bf16.mxu0 %v3782_v38  ;;  %v3857_v37 = vld [vmem:[%s5111_s0 + $0x350] ss:$20 sps:$4 sm:$0xff]   ;;  %v3858_v38 = vld [vmem:[%s5111_s0 + $0x1c8] ss:$20 sps:$4 sm:$0xff]  }
  0xc1   :  { %1620 = vmatmul.mubr.bf16.gmra.mrb[64].mxu1 %v3784_v39  ;;  %1781 = vmatmul.mubr.bf16.gmra.mrb[32].mxu0 %v3785_v40  ;;  %v3859_v40 = vld [vmem:[%s5111_s0 + $0x37c] ss:$20 sps:$4 sm:$0xff]  }
  0xc2   :  { %1627 = vmatprep.mubr.bf16.mxu1 %v3786_v41  ;;  %1788 = vmatprep.mubr.bf16.mxu0 %v3788_v42  ;;  %v3861_v41 = vld [vmem:[%s5111_s0 + $0x1f0] ss:$20 sps:$4 sm:$0xff]  }
  0xc9   :  { %1628 = vmatmul.mubr.bf16.gmra.mrb[68].mxu1 %v3790_v43  ;;  %1789 = vmatmul.mubr.bf16.gmra.mrb[36].mxu0 %v3791_v44 }
  0xca   :  { %1635 = vmatprep.mubr.bf16.mxu1 %v3792_v45  ;;  %1796 = vmatprep.mubr.bf16.mxu0 %v3794_v46  ;;  %v3862_v45 = vld [vmem:[%s5111_s0 + $0x378] ss:$20 sps:$4 sm:$0xff]  }
  0xcb   :  { %v3863_v46 = vld [vmem:[%s5111_s0 + $0x218] ss:$20 sps:$4 sm:$0xff]  }
  0xd1   :  { %1636 = vmatmul.mubr.bf16.gmra.mrb[72].mxu1 %v3796_v47  ;;  %1797 = vmatmul.mubr.bf16.gmra.mrb[40].mxu0 %v3797_v48  ;;  %v3864_v48 = vld [vmem:[%s5111_s0 + $0x3a4] ss:$20 sps:$4 sm:$0xff]  }
  0xd2   :  { %1643 = vmatprep.mubr.bf16.mxu1 %v3799_v49  ;;  %1804 = vmatprep.mubr.bf16.mxu0 %v3801_v50  ;;  %v3866_v49 = vld [vmem:[%s5111_s0 + $0x240] ss:$20 sps:$4 sm:$0xff]  }
  0xd9   :  { %1644 = vmatmul.mubr.bf16.gmra.mrb[76].mxu1 %v3803_v51  ;;  %1805 = vmatmul.mubr.bf16.gmra.mrb[44].mxu0 %v3804_v52 }
  0xda   :  { %1651 = vmatprep.mubr.bf16.mxu1 %v3805_v53  ;;  %1812 = vmatprep.mubr.bf16.mxu0 %v3807_v54  ;;  %v3867_v53 = vld [vmem:[%s5111_s0 + $0x3a0] ss:$20 sps:$4 sm:$0xff]   ;;  %v3868_v54 = vld [vmem:[%s5111_s0 + $0x268] ss:$20 sps:$4 sm:$0xff]  }
  0xe1   :  { %1652 = vmatmul.mubr.bf16.gmra.mrb[80].mxu1 %v3809_v55  ;;  %1813 = vmatmul.mubr.bf16.gmra.mrb[48].mxu0 %v3810_v56  ;;  %v3869_v56 = vld [vmem:[%s5111_s0 + $0x3cc] ss:$20 sps:$4 sm:$0xff]  }
  0xe2   :  { %1659 = vmatprep.mubr.bf16.mxu1 %v3811_v57  ;;  %1820 = vmatprep.mubr.bf16.mxu0 %v3813_v58  ;;  %v3871_v57 = vld [vmem:[%s5111_s0 + $0x290] ss:$20 sps:$4 sm:$0xff]  }
  0xe9   :  { %1660 = vmatmul.mubr.bf16.gmra.mrb[84].mxu1 %v3815_v59  ;;  %1821 = vmatmul.mubr.bf16.gmra.mrb[52].mxu0 %v3816_v60 }
  0xea   :  { %1667 = vmatprep.mubr.bf16.mxu1 %v3817_v61  ;;  %1828 = vmatprep.mubr.bf16.mxu0 %v3819_v62  ;;  %v3872_v61 = vld [vmem:[%s5111_s0 + $0x3c8] ss:$20 sps:$4 sm:$0xff]   ;;  %v3873_v62 = vld [vmem:[%s5111_s0 + $0x2b8] ss:$20 sps:$4 sm:$0xff]  }
  0xf1   :  { %1668 = vmatmul.mubr.bf16.gmra.mrb[88].mxu1 %v3821_v63  ;;  %1829 = vmatmul.mubr.bf16.gmra.mrb[56].mxu0 %v3822_v1  ;;  %v3874_v1 = vld [vmem:[%s5111_s0 + $0x3f4] ss:$20 sps:$4 sm:$0xff]  }
  0xf2   :  { %1675 = vmatprep.mubr.bf16.mxu1 %v3823_v2  ;;  %1836 = vmatprep.mubr.bf16.mxu0 %v3825_v3  ;;  %v3876_v2 = vld [vmem:[%s5111_s0 + $0x2e0] ss:$20 sps:$4 sm:$0xff]  }
  0xf9   :  { %1676 = vmatmul.mubr.bf16.gmra.mrb[92].mxu1 %v3827_v4  ;;  %1837 = vmatmul.mubr.bf16.gmra.mrb[60].mxu0 %v3828_v5 }
  0xfa   :  { %1844 = vmatprep.mubr.bf16.mxu0 %v3829_v6  ;;  %3471 = vmatprep.mubr.msk.bf16.mxu1 %vm1298_vm0, %v3831_v7  ;;  %v3877_v6 = vld [vmem:[%s5111_s0 + $0x3f0] ss:$20 sps:$4 sm:$0xff]   ;;  %v3878_v7 = vld [vmem:[%s5111_s0 + $0x308] ss:$20 sps:$4 sm:$0xff]  }
 0x101   :  { %1845 = vmatmul.mubr.bf16.gmra.mrb[64].mxu0 %v3832_v8  ;;  %3472 = vmatmul.mubr.msk.bf16.vlgmr.msra.gmra.mrb[96].mxu1 %vm1298_vm0, %v3833_v9  ;;  %v3879_v9 = vld [vmem:[%s5111_s0 + $0x41c] ss:$20 sps:$4 sm:$0xff]  }
 0x102   :  { %1852 = vmatprep.mubr.bf16.mxu0 %v3834_v10  ;;  %3475 = vmatprep.mubr.msk.bf16.mxu1 %vm1298_vm0, %v3836_v11  ;;  %v3881_v10 = vld [vmem:[%s5111_s0 + $0x330] ss:$20 sps:$4 sm:$0xff]  }
 0x109   :  { %1853 = vmatmul.mubr.bf16.gmra.mrb[68].mxu0 %v3837_v0  ;;  %3476 = vmatmul.mubr.msk.bf16.gmra.mrb[100].mxu1 %vm1298_vm0, %v3838_v12 }
 0x10a   :  { %1860 = vmatprep.mubr.bf16.mxu0 %v3839_v13  ;;  %3479 = vmatprep.mubr.msk.bf16.mxu1 %vm1298_vm0, %v3841_v14  ;;  %v3882_v13 = vld [vmem:[%s5111_s0 + $0x418] ss:$20 sps:$4 sm:$0xff]  }
 0x10b   :  { %v3883_v14 = vld [vmem:[%s5111_s0 + $0x358] ss:$20 sps:$4 sm:$0xff]  }
 0x111   :  { %1861 = vmatmul.mubr.bf16.gmra.mrb[72].mxu0 %v3842_v15  ;;  %3480 = vmatmul.mubr.msk.bf16.gmra.mrb[104].mxu1 %vm1298_vm0, %v3843_v16  ;;  %v3884_v16 = vld [vmem:[%s5111_s0 + $0x444] ss:$20 sps:$4 sm:$0xff]  }
 0x112   :  { %1868 = vmatprep.mubr.bf16.mxu0 %v3844_v17  ;;  %3483 = vmatprep.mubr.msk.bf16.mxu1 %vm1298_vm0, %v3846_v18  ;;  %v3886_v17 = vld [vmem:[%s5111_s0 + $0x380] ss:$20 sps:$4 sm:$0xff]  }
 0x114   :  { %v4435_v19 = vpop.f32.mrb[0].mxu1 }
 0x115   :  { %v1495_v20 = vpop.f32.mrb[1].mxu1 }
 0x116   :  { %v4443_v23 = vpop.f32.mrb[2].mxu1 }
 0x117   :  { %v1498_v26 = vpop.f32.mrb[3].mxu1 }
 0x118   :  { %v3888_v26 = vld [vmem:[%s5111_s0 + $0x3a8] ss:$20 sps:$4 sm:$0xff]  }
 0x119   :  { %1869 = vmatmul.mubr.bf16.gmra.mrb[76].mxu0 %v3847_v21  ;;  %3484 = vmatmul.mubr.msk.bf16.gmra.mrb[108].mxu1 %vm1298_vm0, %v3848_v22 }
 0x11a   :  { %1876 = vmatprep.mubr.bf16.mxu0 %v3849_v24  ;;  %3487 = vmatprep.mubr.msk.bf16.mxu1 %vm1298_vm0, %v3851_v25  ;;  %v3887_v25 = vld [vmem:[%s5111_s0 + $0x440] ss:$20 sps:$4 sm:$0xff]  }
 0x11c   :  { %v4453_v27 = vpop.f32.mrb[4].mxu1 }
 0x11d   :  { %v1503_v28 = vpop.f32.mrb[5].mxu1 }
 0x11e   :  { %v4461_v31 = vpop.f32.mrb[6].mxu1 }
 0x11f   :  { %v1506_v34 = vpop.f32.mrb[7].mxu1 }
 0x121   :  { %1877 = vmatmul.mubr.bf16.gmra.mrb[80].mxu0 %v3852_v29  ;;  %3488 = vmatmul.mubr.msk.bf16.gmra.mrb[112].mxu1 %vm1298_vm0, %v3853_v30  ;;  %v3889_v30 = vld [vmem:[%s5111_s0 + $0x46c] ss:$20 sps:$4 sm:$0xff]  }
 0x122   :  { %1884 = vmatprep.mubr.bf16.mxu0 %v3854_v32  ;;  %3491 = vmatprep.mubr.msk.bf16.mxu1 %vm1298_vm0, %v3856_v33  ;;  %v3891_v32 = vld [vmem:[%s5111_s0 + $0x3d0] ss:$20 sps:$4 sm:$0xff]  }
 0x124   :  { %v4471_v35 = vpop.f32.mrb[8].mxu1 }
 0x125   :  { %v1511_v36 = vpop.f32.mrb[9].mxu1 }
 0x126   :  { %v4479_v39 = vpop.f32.mrb[10].mxu1 }
 0x127   :  { %v1514_v42 = vpop.f32.mrb[11].mxu1 }
 0x128   :  { %v3893_v42 = vld [vmem:[%s5111_s0 + $0x3f8] ss:$20 sps:$4 sm:$0xff]  }
 0x129   :  { %1885 = vmatmul.mubr.bf16.gmra.mrb[84].mxu0 %v3857_v37  ;;  %3492 = vmatmul.mubr.msk.bf16.gmra.mrb[116].mxu1 %vm1298_vm0, %v3858_v38 }
 0x12a   :  { %1892 = vmatprep.mubr.bf16.mxu0 %v3859_v40  ;;  %3495 = vmatprep.mubr.msk.bf16.mxu1 %vm1298_vm0, %v3861_v41  ;;  %v3892_v41 = vld [vmem:[%s5111_s0 + $0x468] ss:$20 sps:$4 sm:$0xff]  }
 0x12c   :  { %v4489_v43 = vpop.f32.mrb[12].mxu1 }
 0x12d   :  { %v1519_v44 = vpop.f32.mrb[13].mxu1 }
 0x12e   :  { %v4497_v47 = vpop.f32.mrb[14].mxu1 }
 0x12f   :  { %v1522_v50 = vpop.f32.mrb[15].mxu1 }
 0x131   :  { %1893 = vmatmul.mubr.bf16.gmra.mrb[88].mxu0 %v3862_v45  ;;  %3496 = vmatmul.mubr.msk.bf16.gmra.mrb[120].mxu1 %vm1298_vm0, %v3863_v46  ;;  %v3894_v46 = vld [vmem:[%s5111_s0 + $0x494] ss:$20 sps:$4 sm:$0xff]  }
 0x132   :  { %1900 = vmatprep.mubr.bf16.mxu0 %v3864_v48  ;;  %3499 = vmatprep.mubr.msk.bf16.mxu1 %vm1298_vm0, %v3866_v49  ;;  %v3896_v48 = vld [vmem:[%s5111_s0 + $0x420] ss:$20 sps:$4 sm:$0xff]  }
 0x134   :  { %v4507_v51 = vpop.f32.mrb[16].mxu1 }
 0x135   :  { %v1527_v52 = vpop.f32.mrb[17].mxu1 }
 0x136   :  { %v4515_v55 = vpop.f32.mrb[18].mxu1 }
 0x137   :  { %v1530_v58 = vpop.f32.mrb[19].mxu1 }
 0x138   :  { %v3898_v58 = vld [vmem:[%s5111_s0 + $0x448] ss:$20 sps:$4 sm:$0xff]  }
 0x139   :  { %1901 = vmatmul.mubr.bf16.gmra.mrb[92].mxu0 %v3867_v53  ;;  %3500 = vmatmul.mubr.msk.bf16.gmra.mrb[124].mxu1 %vm1298_vm0, %v3868_v54 }
 0x13a   :  { %1908 = vmatprep.mubr.bf16.mxu0 %v3869_v56  ;;  %3503 = vmatprep.mubr.msk.bf16.mxu1 %vm1298_vm0, %v3871_v57  ;;  %v3897_v57 = vld [vmem:[%s5111_s0 + $0x490] ss:$20 sps:$4 sm:$0xff]  }
 0x13c   :  { %v4525_v59 = vpop.f32.mrb[20].mxu1 }
 0x13d   :  { %v1535_v60 = vpop.f32.mrb[21].mxu1 }
 0x13e   :  { %v4533_v63 = vpop.f32.mrb[22].mxu1 }
 0x13f   :  { %v1538_v3 = vpop.f32.mrb[23].mxu1 }
 0x141   :  { %1909 = vmatmul.mubr.bf16.gmra.mrb[96].mxu0 %v3872_v61  ;;  %3504 = vmatmul.mubr.msk.bf16.gmra.mrb[128].mxu1 %vm1298_vm0, %v3873_v62  ;;  %v3899_v62 = vld [vmem:[%s5111_s0 + $0x4bc] ss:$20 sps:$4 sm:$0xff]  }
 0x142   :  { %1916 = vmatprep.mubr.bf16.mxu0 %v3874_v1  ;;  %3507 = vmatprep.mubr.msk.bf16.mxu1 %vm1298_vm0, %v3876_v2  ;;  %v3901_v1 = vld [vmem:[%s5111_s0 + $0x470] ss:$20 sps:$4 sm:$0xff]  }
 0x144   :  { %v4543_v4 = vpop.f32.mrb[24].mxu1 }
 0x145   :  { %v1543_v5 = vpop.f32.mrb[25].mxu1 }
 0x146   :  { %v4551_v8 = vpop.f32.mrb[26].mxu1 }
 0x147   :  { %v1546_v11 = vpop.f32.mrb[27].mxu1 }
 0x148   :  { %v3903_v11 = vld [vmem:[%s5111_s0 + $0x498] ss:$20 sps:$4 sm:$0xff]  }
 0x149   :  { %1917 = vmatmul.mubr.bf16.gmra.mrb[100].mxu0 %v3877_v6  ;;  %3508 = vmatmul.mubr.msk.bf16.gmra.mrb[132].mxu1 %vm1298_vm0, %v3878_v7 }
 0x14a   :  { %1924 = vmatprep.mubr.bf16.mxu0 %v3879_v9  ;;  %3511 = vmatprep.mubr.msk.bf16.mxu1 %vm1298_vm0, %v3881_v10  ;;  %v3902_v10 = vld [vmem:[%s5111_s0 + $0x4b8] ss:$20 sps:$4 sm:$0xff]  }
 0x14c   :  { %v4561_v0 = vpop.f32.mrb[28].mxu1 }
 0x14d   :  { %v1551_v12 = vpop.f32.mrb[29].mxu1 }
 0x14e   :  { %v4569_v15 = vpop.f32.mrb[30].mxu1 }
 0x14f   :  { %v1554_v18 = vpop.f32.mrb[31].mxu1 }
 0x151   :  { %1925 = vmatmul.mubr.bf16.gmra.mrb[104].mxu0 %v3882_v13  ;;  %3512 = vmatmul.mubr.msk.bf16.gmra.mrb[136].mxu1 %vm1298_vm0, %v3883_v14  ;;  %v3904_v14 = vld [vmem:[%s5111_s0 + $0x4e4] ss:$20 sps:$4 sm:$0xff]  }
 0x152   :  { %1932 = vmatprep.mubr.bf16.mxu0 %v3884_v16  ;;  %3515 = vmatprep.mubr.msk.bf16.mxu1 %vm1298_vm0, %v3886_v17  ;;  %v3906_v16 = vld [vmem:[%s5111_s0 + $0x4c0] ss:$20 sps:$4 sm:$0xff]  }
 0x154   :  { %v4579_v20 = vpop.f32.mrb[32].mxu1  ;;  %v4581_v21 = vpop.f32.mrb[0].mxu0 }
 0x155   :  { %v1559_v22 = vpop.f32.mrb[33].mxu1  ;;  %v1720_v24 = vpop.f32.mrb[1].mxu0 }
 0x156   :  { %v4589_v28 = vpop.f32.mrb[34].mxu1  ;;  %v4591_v29 = vpop.f32.mrb[2].mxu0 }
 0x157   :  { %v1562_v33 = vpop.f32.mrb[35].mxu1  ;;  %v1723_v34 = vpop.f32.mrb[3].mxu0 }
 0x159   :  { %1933 = vmatmul.mubr.bf16.gmra.mrb[108].mxu0 %v3887_v25  ;;  %3516 = vmatmul.mubr.msk.bf16.gmra.mrb[140].mxu1 %vm1298_vm0, %v3888_v26 }
 0x15a   :  { %1940 = vmatprep.mubr.bf16.mxu0 %v3889_v30  ;;  %3519 = vmatprep.mubr.msk.bf16.mxu1 %vm1298_vm0, %v3891_v32  ;;  %v3907_v30 = vld [vmem:[%s5111_s0 + $0x4e0] ss:$20 sps:$4 sm:$0xff]   ;;  %v3908_v32 = vld [vmem:[%s5111_s0 + $0x4e8] ss:$20 sps:$4 sm:$0xff]  }
 0x15c   :  { %v4601_v36 = vpop.f32.mrb[36].mxu1  ;;  %v4603_v37 = vpop.f32.mrb[4].mxu0 }
 0x15d   :  { %v1567_v38 = vpop.f32.mrb[37].mxu1  ;;  %v1728_v40 = vpop.f32.mrb[5].mxu0 }
 0x15e   :  { %v4611_v44 = vpop.f32.mrb[38].mxu1  ;;  %v4613_v45 = vpop.f32.mrb[6].mxu0 }
 0x15f   :  { %v1570_v49 = vpop.f32.mrb[39].mxu1  ;;  %v1731_v50 = vpop.f32.mrb[7].mxu0 }
 0x161   :  { %1941 = vmatmul.mubr.bf16.gmra.mrb[112].mxu0 %v3892_v41  ;;  %3520 = vmatmul.mubr.msk.bf16.gmra.mrb[144].mxu1 %vm1298_vm0, %v3893_v42 }
 0x162   :  { %1948 = vmatprep.mubr.bf16.mxu0 %v3894_v46  ;;  %3523 = vmatprep.mubr.msk.bf16.mxu1 %vm1298_vm0, %v3896_v48 }
 0x164   :  { %v4623_v52 = vpop.f32.mrb[40].mxu1  ;;  %v4625_v53 = vpop.f32.mrb[8].mxu0 }
 0x165   :  { %v1575_v54 = vpop.f32.mrb[41].mxu1  ;;  %v1736_v56 = vpop.f32.mrb[9].mxu0 }
 0x166   :  { %v4633_v60 = vpop.f32.mrb[42].mxu1  ;;  %v4635_v61 = vpop.f32.mrb[10].mxu0 }
 0x167   :  { %v1578_v2 = vpop.f32.mrb[43].mxu1  ;;  %v1739_v3 = vpop.f32.mrb[11].mxu0 }
 0x169   :  { %1949 = vmatmul.mubr.bf16.gmra.mrb[116].mxu0 %v3897_v57  ;;  %3524 = vmatmul.mubr.msk.bf16.gmra.mrb[148].mxu1 %vm1298_vm0, %v3898_v58 }
 0x16a   :  { %1956 = vmatprep.mubr.bf16.mxu0 %v3899_v62  ;;  %3527 = vmatprep.mubr.msk.bf16.mxu1 %vm1298_vm0, %v3901_v1 }
 0x16c   :  { %v4645_v5 = vpop.f32.mrb[44].mxu1  ;;  %v4647_v6 = vpop.f32.mrb[12].mxu0 }
 0x16d   :  { %v1583_v7 = vpop.f32.mrb[45].mxu1  ;;  %v1744_v9 = vpop.f32.mrb[13].mxu0 }
 0x16e   :  { %v4655_v12 = vpop.f32.mrb[46].mxu1  ;;  %v4657_v13 = vpop.f32.mrb[14].mxu0 }
 0x16f   :  { %v1586_v17 = vpop.f32.mrb[47].mxu1  ;;  %v1747_v18 = vpop.f32.mrb[15].mxu0 }
 0x171   :  { %1957 = vmatmul.mubr.bf16.gmra.mrb[120].mxu0 %v3902_v10  ;;  %3528 = vmatmul.mubr.msk.bf16.gmra.mrb[152].mxu1 %vm1298_vm0, %v3903_v11 }
 0x172   :  { %1964 = vmatprep.mubr.bf16.mxu0 %v3904_v14  ;;  %3531 = vmatprep.mubr.msk.bf16.mxu1 %vm1298_vm0, %v3906_v16 }
 0x174   :  { %v4667_v22 = vpop.f32.mrb[48].mxu1  ;;  %v4669_v24 = vpop.f32.mrb[16].mxu0 }
 0x175   :  { %v1591_v25 = vpop.f32.mrb[49].mxu1  ;;  %v1752_v26 = vpop.f32.mrb[17].mxu0 }
 0x176   :  { %v4677_v33 = vpop.f32.mrb[50].mxu1  ;;  %v4679_v34 = vpop.f32.mrb[18].mxu0 }
 0x177   :  { %v1594_v38 = vpop.f32.mrb[51].mxu1  ;;  %v1755_v40 = vpop.f32.mrb[19].mxu0 }
 0x179   :  { %1965 = vmatmul.mubr.bf16.gmra.mrb[124].mxu0 %v3907_v30  ;;  %3532 = vmatmul.mubr.msk.bf16.gmra.mrb[156].mxu1 %vm1298_vm0, %v3908_v32 }
 0x17c   :  { %v4682_v41 = vpop.f32.mrb[52].mxu1  ;;  %v4684_v42 = vpop.f32.mrb[20].mxu0 }
 0x17d   :  { %v1599_v46 = vpop.f32.mrb[53].mxu1  ;;  %v1760_v48 = vpop.f32.mrb[21].mxu0 }
 0x17e   :  { %v4686_v49 = vpop.f32.mrb[54].mxu1  ;;  %v4688_v50 = vpop.f32.mrb[22].mxu0 }
 0x17f   :  { %v1602_v54 = vpop.f32.mrb[55].mxu1  ;;  %v1763_v56 = vpop.f32.mrb[23].mxu0 }
 0x184   :  { %v4690_v57 = vpop.f32.mrb[56].mxu1  ;;  %v4692_v58 = vpop.f32.mrb[24].mxu0 }
 0x185   :  { %v1607_v62 = vpop.f32.mrb[57].mxu1  ;;  %v1768_v1 = vpop.f32.mrb[25].mxu0 }
 0x186   :  { %v4694_v2 = vpop.f32.mrb[58].mxu1  ;;  %v4696_v3 = vpop.f32.mrb[26].mxu0 }
 0x187   :  { %v1610_v7 = vpop.f32.mrb[59].mxu1  ;;  %v1771_v9 = vpop.f32.mrb[27].mxu0 }
 0x18c   :  { %v4698_v10 = vpop.f32.mrb[60].mxu1  ;;  %v4700_v11 = vpop.f32.mrb[28].mxu0 }
 0x18d   :  { %v1615_v14 = vpop.f32.mrb[61].mxu1  ;;  %v1776_v16 = vpop.f32.mrb[29].mxu0 }
 0x18e   :  { %v4702_v17 = vpop.f32.mrb[62].mxu1  ;;  %v4704_v18 = vpop.f32.mrb[30].mxu0 }
 0x18f   :  { %v1618_v25 = vpop.f32.mrb[63].mxu1  ;;  %v1779_v26 = vpop.f32.mrb[31].mxu0 }
 0x194   :  { %v4706_v30 = vpop.f32.mrb[64].mxu1  ;;  %v1782_v32 = vpop.f32.mrb[32].mxu0 }
 0x195   :  { %5116 = vst [vmem:[#allocation2_spill] sm:$0xff] %v4706_v30  ;;  %v4709_v38 = vadd.f32 %v1782_v32, %v4435_v19  ;;  %v1623_v40 = vpop.f32.mrb[65].mxu1  ;;  %v1784_v46 = vpop.f32.mrb[33].mxu0 }
 0x196   :  { %v4711_v48 = vpop.f32.mrb[66].mxu1  ;;  %v1785_v54 = vpop.f32.mrb[34].mxu0 }
 0x197   :  { %5117 = vst [vmem:[#allocation3_spill] sm:$0xff] %v4711_v48  ;;  %v4714_v56 = vadd.f32 %v1785_v54, %v4443_v23  ;;  %v1626_v62 = vpop.f32.mrb[67].mxu1  ;;  %v1787_v1 = vpop.f32.mrb[35].mxu0 }
 0x19c   :  { %v4716_v7 = vpop.f32.mrb[68].mxu1  ;;  %v1790_v9 = vpop.f32.mrb[36].mxu0 }
 0x19d   :  { %5118 = vst [vmem:[#allocation4_spill] sm:$0xff] %v4716_v7  ;;  %v4719_v14 = vadd.f32 %v1790_v9, %v4453_v27  ;;  %v1631_v16 = vpop.f32.mrb[69].mxu1  ;;  %v1792_v25 = vpop.f32.mrb[37].mxu0 }
 0x19e   :  { %v4721_v19 = vpop.f32.mrb[70].mxu1  ;;  %v1793_v26 = vpop.f32.mrb[38].mxu0 }
 0x19f   :  { %5119 = vst [vmem:[#allocation5_spill] sm:$0xff] %v4721_v19  ;;  %v4724_v32 = vadd.f32 %v1793_v26, %v4461_v31  ;;  %v1634_v40 = vpop.f32.mrb[71].mxu1  ;;  %v1795_v46 = vpop.f32.mrb[39].mxu0 }
 0x1a4   :  { %v4726_v23 = vpop.f32.mrb[72].mxu1  ;;  %v1798_v54 = vpop.f32.mrb[40].mxu0 }
 0x1a5   :  { %5120 = vst [vmem:[#allocation6_spill] sm:$0xff] %v4726_v23  ;;  %v4729_v62 = vadd.f32 %v1798_v54, %v4471_v35  ;;  %v1639_v1 = vpop.f32.mrb[73].mxu1  ;;  %v1800_v7 = vpop.f32.mrb[41].mxu0 }
 0x1a6   :  { %v4731_v27 = vpop.f32.mrb[74].mxu1  ;;  %v1801_v9 = vpop.f32.mrb[42].mxu0 }
 0x1a7   :  { %5121 = vst [vmem:[#allocation7_spill] sm:$0xff] %v4731_v27  ;;  %v4734_v16 = vadd.f32 %v1801_v9, %v4479_v39  ;;  %v1642_v25 = vpop.f32.mrb[75].mxu1  ;;  %v1803_v19 = vpop.f32.mrb[43].mxu0 }
 0x1ac   :  { %v4736_v31 = vpop.f32.mrb[76].mxu1  ;;  %v1806_v26 = vpop.f32.mrb[44].mxu0 }
 0x1ad   :  { %5122 = vst [vmem:[#allocation8_spill] sm:$0xff] %v4736_v31  ;;  %v4739_v40 = vadd.f32 %v1806_v26, %v4489_v43  ;;  %v1647_v46 = vpop.f32.mrb[77].mxu1  ;;  %v1808_v23 = vpop.f32.mrb[45].mxu0 }
 0x1ae   :  { %v4741_v35 = vpop.f32.mrb[78].mxu1  ;;  %v1809_v54 = vpop.f32.mrb[46].mxu0 }
 0x1af   :  { %5123 = vst [vmem:[#allocation9_spill] sm:$0xff] %v4741_v35  ;;  %v4744_v7 = vadd.f32 %v1809_v54, %v4497_v47  ;;  %v1650_v1 = vpop.f32.mrb[79].mxu1  ;;  %v1811_v27 = vpop.f32.mrb[47].mxu0 }
 0x1b4   :  { %v4746_v39 = vpop.f32.mrb[80].mxu1  ;;  %v1814_v9 = vpop.f32.mrb[48].mxu0 }
 0x1b5   :  { %5124 = vst [vmem:[#allocation10_spill] sm:$0xff] %v4746_v39  ;;  %v4749_v19 = vadd.f32 %v1814_v9, %v4507_v51  ;;  %v1655_v25 = vpop.f32.mrb[81].mxu1  ;;  %v1816_v31 = vpop.f32.mrb[49].mxu0 }
 0x1b6   :  { %v4751_v43 = vpop.f32.mrb[82].mxu1  ;;  %v1817_v26 = vpop.f32.mrb[50].mxu0 }
 0x1b7   :  { %5125 = vst [vmem:[#allocation11_spill] sm:$0xff] %v4751_v43  ;;  %v4754_v23 = vadd.f32 %v1817_v26, %v4515_v55  ;;  %v1658_v46 = vpop.f32.mrb[83].mxu1  ;;  %v1819_v35 = vpop.f32.mrb[51].mxu0 }
 0x1bc   :  { %v4756_v47 = vpop.f32.mrb[84].mxu1  ;;  %v1822_v54 = vpop.f32.mrb[52].mxu0 }
 0x1bd   :  { %5126 = vst [vmem:[#allocation12_spill] sm:$0xff] %v4756_v47  ;;  %v4759_v27 = vadd.f32 %v1822_v54, %v4525_v59  ;;  %v1663_v1 = vpop.f32.mrb[85].mxu1  ;;  %v1824_v39 = vpop.f32.mrb[53].mxu0 }
 0x1be   :  { %v4761_v51 = vpop.f32.mrb[86].mxu1  ;;  %v1825_v9 = vpop.f32.mrb[54].mxu0 }
 0x1bf   :  { %5127 = vst [vmem:[#allocation13_spill] sm:$0xff] %v4761_v51  ;;  %v4764_v31 = vadd.f32 %v1825_v9, %v4533_v63  ;;  %v1666_v25 = vpop.f32.mrb[87].mxu1  ;;  %v1827_v43 = vpop.f32.mrb[55].mxu0 }
 0x1c4   :  { %v4766_v55 = vpop.f32.mrb[88].mxu1  ;;  %v1830_v26 = vpop.f32.mrb[56].mxu0 }
 0x1c5   :  { %5128 = vst [vmem:[#allocation14_spill] sm:$0xff] %v4766_v55  ;;  %v4769_v35 = vadd.f32 %v1830_v26, %v4543_v4  ;;  %v1671_v46 = vpop.f32.mrb[89].mxu1  ;;  %v1832_v47 = vpop.f32.mrb[57].mxu0 }
 0x1c6   :  { %v4771_v59 = vpop.f32.mrb[90].mxu1  ;;  %v1833_v54 = vpop.f32.mrb[58].mxu0 }
 0x1c7   :  { %5129 = vst [vmem:[#allocation15_spill] sm:$0xff] %v4771_v59  ;;  %v4774_v39 = vadd.f32 %v1833_v54, %v4551_v8  ;;  %v1674_v1 = vpop.f32.mrb[91].mxu1  ;;  %v1835_v51 = vpop.f32.mrb[59].mxu0 }
 0x1c9   :  { %5130 = vst [vmem:[#allocation16_spill] sm:$0xff] %v4774_v39 }
 0x1cc   :  { %v4776_v63 = vpop.f32.mrb[92].mxu1  ;;  %v1838_v9 = vpop.f32.mrb[60].mxu0 }
 0x1cd   :  { %5131 = vst [vmem:[#allocation17_spill] sm:$0xff] %v4776_v63  ;;  %v4779_v43 = vadd.f32 %v1838_v9, %v4561_v0  ;;  %v1679_v25 = vpop.f32.mrb[93].mxu1  ;;  %v1840_v55 = vpop.f32.mrb[61].mxu0 }
 0x1ce   :  { %v4781_v4 = vpop.f32.mrb[94].mxu1  ;;  %v1841_v26 = vpop.f32.mrb[62].mxu0  ;;  %v4793_v55 = vld [vmem:[%s5112_s2] ss:$0 sm:$0xff] }
 0x1cf   :  { %5132 = vst [vmem:[#allocation18_spill] sm:$0xff] %v4781_v4  ;;  %v4784_v47 = vadd.f32 %v1841_v26, %v4569_v15  ;;  %v1682_v46 = vpop.f32.mrb[95].mxu1  ;;  %v1843_v59 = vpop.f32.mrb[63].mxu0 }
 0x1d4   :  { %v1846_v8 = vpop.f32.mrb[64].mxu0  ;;  %v3473_v54 = vpop.f32.mrb[96].mxu1 }
 0x1d5   :  { %v4787_v51 = vadd.f32 %v1846_v8, %v4579_v20  ;;  %v2016_v1 = vadd.f32 %v3473_v54, %v4603_v37  ;;  %v1848_v63 = vpop.f32.mrb[65].mxu0  ;;  %v2007_v0 = vpop.f32.mrb[97].mxu1 }
 0x1d6   :  { %v2008_v9 = vadd.f32 %v2007_v0, %v4581_v21  ;;  %v1849_v15 = vpop.f32.mrb[66].mxu0  ;;  %v3474_v25 = vpop.f32.mrb[98].mxu1 }
 0x1d7   :  { %5133 = vst [vmem:[#allocation19_spill] sm:$0xff] %v4787_v51  ;;  %v4797_v59 = vadd.f32 %v1849_v15, %v4589_v28  ;;  %v2019_v26 = vadd.f32 %v3474_v25, %v4613_v45  ;;  %v2010_v20 = vpop.f32.mrb[99].mxu1  ;;  %v1851_v46 = vpop.f32.mrb[67].mxu0  ;;  %v2485_v63 = vadd.f32 %v4793_v55, %v2016_v1  ;;  %v2333_v28 = vmul.f32 %v2016_v1, %v2016_v1 }
 0x1d8   :  { %v2011_v37 = vadd.f32 %v2010_v20, %v4591_v29  ;;  %v2331_v8 = vmul.f32 %v2008_v9, %v2008_v9  ;;  %v2483_v4 = vadd.f32 %v4793_v55, %v2008_v9 }
 0x1d9   :  { %5134 = vst [vmem:[#allocation20_spill] sm:$0xff] %v4797_v59  ;;  %v2486_v54 = vadd.f32 %v4793_v55, %v2019_v26  ;;  %v2334_v39 = vmul.f32 %v2019_v26, %v2019_v26 }
 0x1da   :  { %v2262_v48 = vadd.f32 %v2011_v37, %v2008_v9  ;;  %v2332_v21 = vmul.f32 %v2011_v37, %v2011_v37  ;;  %v2484_v0 = vadd.f32 %v4793_v55, %v2011_v37 }
 0x1db   :  { %v3244_v51 = vpack.c.bf16 %v2486_v54, %v2485_v63 }
 0x1dc   :  { %v2263_v15 = vadd.f32 %v2262_v48, %v2016_v1  ;;  %v2395_v59 = vadd.f32 %v2332_v21, %v2331_v8  ;;  %v3239_v45 = vpack.c.bf16 %v2484_v0, %v2483_v4  ;;  %v1854_v25 = vpop.f32.mrb[68].mxu0  ;;  %v3477_v46 = vpop.f32.mrb[100].mxu1  ;;  %v3911_v8 = vmov 0.0  }
 0x1dd   :  { %3396 = vst [vmem:[%s5113_s3 + $0x8] sm:$0xff] %v3244_v51   ;;  %v4809_v29 = vadd.f32 %v1854_v25, %v4601_v36  ;;  %v2032_v20 = vadd.f32 %v3477_v46, %v4647_v6  ;;  %v1856_v9 = vpop.f32.mrb[69].mxu0  ;;  %v2023_v30 = vpop.f32.mrb[101].mxu1  ;;  %2468 = vst [vmem:[%s5114_s4] sm:$0x1] %v3911_v8 }
 0x1de   :  { %v2396_v37 = vadd.f32 %v2395_v59, %v2333_v28  ;;  %3240 = vst [vmem:[%s5113_s3] sm:$0xff] %v3239_v45   ;;  %v2024_v48 = vadd.f32 %v2023_v30, %v4625_v53  ;;  %v2264_v4 = vadd.f32 %v2263_v15, %v2019_v26  ;;  %v1857_v1 = vpop.f32.mrb[70].mxu0  ;;  %v3478_v63 = vpop.f32.mrb[102].mxu1  ;;  %2469 = vst [vmem:[%s5115_s5] sm:$0x1] %v3911_v8 }
 0x1df   :  { %v4823_v36 = vadd.f32 %v1857_v1, %v4611_v44  ;;  %v2035_v6 = vadd.f32 %v3478_v63, %v4657_v13  ;;  %v2026_v51 = vpop.f32.mrb[103].mxu1  ;;  %v1859_v59 = vpop.f32.mrb[71].mxu0  ;;  %v2489_v54 = vadd.f32 %v4793_v55, %v2032_v20  ;;  %v2337_v13 = vmul.f32 %v2032_v20, %v2032_v20 }
 0x1e0   :  { %v2265_v53 = vadd.f32 %v2264_v4, %v2024_v48  ;;  %v2335_v30 = vmul.f32 %v2024_v48, %v2024_v48  ;;  %v2397_v26 = vadd.f32 %v2396_v37, %v2334_v39  ;;  %v2027_v0 = vadd.f32 %v2026_v51, %v4635_v61 }
 0x1e1   :  { %v2490_v21 = vadd.f32 %v4793_v55, %v2035_v6  ;;  %v2487_v15 = vadd.f32 %v4793_v55, %v2024_v48  ;;  %v2338_v8 = vmul.f32 %v2035_v6, %v2035_v6 }
 0x1e2   :  { %v2398_v28 = vadd.f32 %v2397_v26, %v2335_v30  ;;  %v2266_v25 = vadd.f32 %v2265_v53, %v2027_v0  ;;  %v2336_v44 = vmul.f32 %v2027_v0, %v2027_v0  ;;  %v2488_v46 = vadd.f32 %v4793_v55, %v2027_v0 }
 0x1e3   :  { %v3254_v45 = vpack.c.bf16 %v2490_v21, %v2489_v54 }
 0x1e4   :  { %v1862_v9 = vpop.f32.mrb[72].mxu0  ;;  %v3481_v1 = vpop.f32.mrb[104].mxu1  ;;  %v2267_v39 = vadd.f32 %v2266_v25, %v2032_v20  ;;  %v2399_v37 = vadd.f32 %v2398_v28, %v2336_v44  ;;  %v3249_v4 = vpack.c.bf16 %v2488_v46, %v2487_v15 }
 0x1e5   :  { %3398 = vst [vmem:[%s5113_s3 + $0x18] sm:$0xff] %v3254_v45   ;;  %v4835_v61 = vadd.f32 %v1862_v9, %v4623_v52  ;;  %v1864_v63 = vpop.f32.mrb[73].mxu0  ;;  %v2039_v48 = vpop.f32.mrb[105].mxu1  ;;  %v2048_v51 = vadd.f32 %v3481_v1, %v4684_v42 }
 0x1e6   :  { %v2040_v59 = vadd.f32 %v2039_v48, %v4669_v24  ;;  %v1865_v53 = vpop.f32.mrb[74].mxu0  ;;  %v3482_v30 = vpop.f32.mrb[106].mxu1  ;;  %v2400_v26 = vadd.f32 %v2399_v37, %v2337_v13  ;;  %3397 = vst [vmem:[%s5113_s3 + $0x10] sm:$0xff] %v3249_v4   ;;  %v2268_v20 = vadd.f32 %v2267_v39, %v2035_v6 }
 0x1e7   :  { %v4843_v54 = vadd.f32 %v1865_v53, %v4633_v60  ;;  %v2051_v52 = vadd.f32 %v3482_v30, %v4688_v50  ;;  %v2042_v21 = vpop.f32.mrb[107].mxu1  ;;  %v1867_v0 = vpop.f32.mrb[75].mxu0  ;;  %v2493_v42 = vadd.f32 %v4793_v55, %v2048_v51  ;;  %v2341_v39 = vmul.f32 %v2048_v51, %v2048_v51 }
 0x1e8   :  { %v2339_v28 = vmul.f32 %v2040_v59, %v2040_v59  ;;  %v2269_v15 = vadd.f32 %v2268_v20, %v2040_v59  ;;  %v2401_v24 = vadd.f32 %v2400_v26, %v2338_v8  ;;  %v2043_v25 = vadd.f32 %v2042_v21, %v4679_v34 }
 0x1e9   :  { %v2494_v45 = vadd.f32 %v4793_v55, %v2051_v52  ;;  %v2491_v6 = vadd.f32 %v4793_v55, %v2040_v59 }
 0x1ea   :  { %v2402_v44 = vadd.f32 %v2401_v24, %v2339_v28  ;;  %v2270_v13 = vadd.f32 %v2269_v15, %v2043_v25  ;;  %v2340_v60 = vmul.f32 %v2043_v25, %v2043_v25  ;;  %v2492_v9 = vadd.f32 %v4793_v55, %v2043_v25 }
 0x1eb   :  { %v3264_v46 = vpack.c.bf16 %v2494_v45, %v2493_v42 }
 0x1ec   :  { %v1870_v50 = vpop.f32.mrb[76].mxu0  ;;  %v3485_v1 = vpop.f32.mrb[108].mxu1  ;;  %v2271_v48 = vadd.f32 %v2270_v13, %v2048_v51  ;;  %v2403_v8 = vadd.f32 %v2402_v44, %v2340_v60  ;;  %v3259_v59 = vpack.c.bf16 %v2492_v9, %v2491_v6 }
 0x1ed   :  { %3400 = vst [vmem:[%s5113_s3 + $0x28] sm:$0xff] %v3264_v46   ;;  %v4855_v37 = vadd.f32 %v1870_v50, %v4645_v5  ;;  %v2064_v34 = vadd.f32 %v3485_v1, %v4700_v11  ;;  %v1872_v4 = vpop.f32.mrb[77].mxu0  ;;  %v2055_v63 = vpop.f32.mrb[109].mxu1  ;;  %v2342_v5 = vmul.f32 %v2051_v52, %v2051_v52 }
 0x1ee   :  { %v2056_v53 = vadd.f32 %v2055_v63, %v4692_v58  ;;  %v1873_v30 = vpop.f32.mrb[78].mxu0  ;;  %v3486_v26 = vpop.f32.mrb[110].mxu1  ;;  %v2404_v42 = vadd.f32 %v2403_v8, %v2341_v39  ;;  %3399 = vst [vmem:[%s5113_s3 + $0x20] sm:$0xff] %v3259_v59   ;;  %v2272_v11 = vadd.f32 %v2271_v48, %v2051_v52 }
 0x1ef   :  { %v4860_v20 = vadd.f32 %v1873_v30, %v4655_v12  ;;  %v2067_v21 = vadd.f32 %v3486_v26, %v4704_v18  ;;  %v2058_v0 = vpop.f32.mrb[111].mxu1  ;;  %v1875_v28 = vpop.f32.mrb[79].mxu0  ;;  %v2497_v15 = vadd.f32 %v4793_v55, %v2064_v34  ;;  %v2345_v4 = vmul.f32 %v2064_v34, %v2064_v34 }
 0x1f0   :  { %v2343_v51 = vmul.f32 %v2056_v53, %v2056_v53  ;;  %v2059_v24 = vadd.f32 %v2058_v0, %v4696_v3  ;;  %v2273_v12 = vadd.f32 %v2272_v11, %v2056_v53  ;;  %v2405_v45 = vadd.f32 %v2404_v42, %v2342_v5 }
 0x1f1   :  { %v2498_v58 = vadd.f32 %v4793_v55, %v2067_v21  ;;  %v2495_v18 = vadd.f32 %v4793_v55, %v2056_v53  ;;  %v2346_v0 = vmul.f32 %v2067_v21, %v2067_v21 }
 0x1f2   :  { %v2344_v44 = vmul.f32 %v2059_v24, %v2059_v24  ;;  %v2496_v46 = vadd.f32 %v4793_v55, %v2059_v24  ;;  %v2406_v6 = vadd.f32 %v2405_v45, %v2343_v51  ;;  %v2274_v13 = vadd.f32 %v2273_v12, %v2059_v24 }
 0x1f3   :  { %v3274_v25 = vpack.c.bf16 %v2498_v58, %v2497_v15 }
 0x1f4   :  { %v1878_v60 = vpop.f32.mrb[80].mxu0  ;;  %v3489_v9 = vpop.f32.mrb[112].mxu1  ;;  %v3269_v52 = vpack.c.bf16 %v2496_v46, %v2495_v18  ;;  %v2275_v63 = vadd.f32 %v2274_v13, %v2064_v34  ;;  %v2407_v48 = vadd.f32 %v2406_v6, %v2344_v44 }
 0x1f5   :  { %3402 = vst [vmem:[%s5113_s3 + $0x38] sm:$0xff] %v3274_v25   ;;  %v4875_v50 = vadd.f32 %v1878_v60, %v4667_v22  ;;  %v2080_v3 = vadd.f32 %v3489_v9, %v4719_v14  ;;  %v1880_v1 = vpop.f32.mrb[81].mxu0  ;;  %v2071_v39 = vpop.f32.mrb[113].mxu1 }
 0x1f6   :  { %v2072_v8 = vadd.f32 %v2071_v39, %v4709_v38  ;;  %v1881_v59 = vpop.f32.mrb[82].mxu0  ;;  %v3490_v53 = vpop.f32.mrb[114].mxu1  ;;  %3401 = vst [vmem:[%s5113_s3 + $0x30] sm:$0xff] %v3269_v52   ;;  %v2408_v28 = vadd.f32 %v2407_v48, %v2345_v4  ;;  %v2276_v5 = vadd.f32 %v2275_v63, %v2067_v21 }
 0x1f7   :  { %v4883_v30 = vadd.f32 %v1881_v59, %v4677_v33  ;;  %v2083_v22 = vadd.f32 %v3490_v53, %v4724_v32  ;;  %v2074_v26 = vpop.f32.mrb[115].mxu1  ;;  %v1883_v14 = vpop.f32.mrb[83].mxu0  ;;  %v2501_v42 = vadd.f32 %v4793_v55, %v2080_v3  ;;  %v2349_v13 = vmul.f32 %v2080_v3, %v2080_v3 }
 0x1f8   :  { %v2347_v34 = vmul.f32 %v2072_v8, %v2072_v8  ;;  %v2075_v11 = vadd.f32 %v2074_v26, %v4714_v56  ;;  %v2277_v51 = vadd.f32 %v2276_v5, %v2072_v8  ;;  %v2409_v15 = vadd.f32 %v2408_v28, %v2346_v0 }
 0x1f9   :  { %v2502_v38 = vadd.f32 %v4793_v55, %v2083_v22  ;;  %v2499_v58 = vadd.f32 %v4793_v55, %v2072_v8  ;;  %v2350_v48 = vmul.f32 %v2083_v22, %v2083_v22 }
 0x1fa   :  { %v2348_v24 = vmul.f32 %v2075_v11, %v2075_v11  ;;  %v2500_v32 = vadd.f32 %v4793_v55, %v2075_v11  ;;  %v2410_v12 = vadd.f32 %v2409_v15, %v2347_v34  ;;  %v2278_v45 = vadd.f32 %v2277_v51, %v2075_v11 }
 0x1fb   :  { %v3284_v33 = vpack.c.bf16 %v2502_v38, %v2501_v42 }
 0x1fc   :  { %v1886_v18 = vpop.f32.mrb[84].mxu0  ;;  %v3493_v25 = vpop.f32.mrb[116].mxu1  ;;  %v3279_v21 = vpack.c.bf16 %v2500_v32, %v2499_v58  ;;  %v2279_v60 = vadd.f32 %v2278_v45, %v2080_v3  ;;  %v2411_v9 = vadd.f32 %v2410_v12, %v2348_v24 }
 0x1fd   :  { %3404 = vst [vmem:[%s5113_s3 + $0x48] sm:$0xff] %v3284_v33   ;;  %v4895_v44 = vadd.f32 %v1886_v18, %v4682_v41  ;;  %v2096_v56 = vadd.f32 %v3493_v25, %v4739_v40  ;;  %v1888_v46 = vpop.f32.mrb[85].mxu0  ;;  %v2087_v6 = vpop.f32.mrb[117].mxu1 }
 0x1fe   :  { %v2088_v52 = vadd.f32 %v2087_v6, %v4729_v62  ;;  %v1889_v1 = vpop.f32.mrb[86].mxu0  ;;  %v3494_v39 = vpop.f32.mrb[118].mxu1  ;;  %3403 = vst [vmem:[%s5113_s3 + $0x40] sm:$0xff] %v3279_v21   ;;  %v2412_v8 = vadd.f32 %v2411_v9, %v2349_v13  ;;  %v2280_v59 = vadd.f32 %v2279_v60, %v2083_v22 }
 0x1ff   :  { %v4903_v4 = vadd.f32 %v1889_v1, %v4686_v49  ;;  %v2099_v41 = vadd.f32 %v3494_v39, %v4744_v7  ;;  %v2090_v63 = vpop.f32.mrb[119].mxu1  ;;  %v1891_v40 = vpop.f32.mrb[87].mxu0  ;;  %v2505_v53 = vadd.f32 %v4793_v55, %v2096_v56  ;;  %v2353_v33 = vmul.f32 %v2096_v56, %v2096_v56 }
 0x200   :  { %v2351_v3 = vmul.f32 %v2088_v52, %v2088_v52  ;;  %v2091_v26 = vadd.f32 %v2090_v63, %v4734_v16  ;;  %v2281_v14 = vadd.f32 %v2280_v59, %v2088_v52  ;;  %v2413_v0 = vadd.f32 %v2412_v8, %v2350_v48 }
 0x201   :  { %v2506_v62 = vadd.f32 %v4793_v55, %v2099_v41  ;;  %v2503_v28 = vadd.f32 %v4793_v55, %v2088_v52  ;;  %v2354_v46 = vmul.f32 %v2099_v41, %v2099_v41 }
 0x202   :  { %v2352_v5 = vmul.f32 %v2091_v26, %v2091_v26  ;;  %v2504_v7 = vadd.f32 %v4793_v55, %v2091_v26  ;;  %v2414_v34 = vadd.f32 %v2413_v0, %v2351_v3  ;;  %v2282_v42 = vadd.f32 %v2281_v14, %v2091_v26 }
 0x203   :  { %v3294_v49 = vpack.c.bf16 %v2506_v62, %v2505_v53 }
 0x204   :  { %v1894_v38 = vpop.f32.mrb[88].mxu0  ;;  %v3497_v11 = vpop.f32.mrb[120].mxu1  ;;  %v3289_v22 = vpack.c.bf16 %v2504_v7, %v2503_v28  ;;  %v2283_v24 = vadd.f32 %v2282_v42, %v2096_v56  ;;  %v2415_v32 = vadd.f32 %v2414_v34, %v2352_v5 }
 0x205   :  { %3406 = vst [vmem:[%s5113_s3 + $0x58] sm:$0xff] %v3294_v49   ;;  %v4915_v51 = vadd.f32 %v1894_v38, %v4690_v57  ;;  %v2112_v16 = vadd.f32 %v3497_v11, %v4759_v27  ;;  %v1896_v15 = vpop.f32.mrb[89].mxu0  ;;  %v2103_v58 = vpop.f32.mrb[121].mxu1 }
 0x206   :  { %v2104_v12 = vadd.f32 %v2103_v58, %v4749_v19  ;;  %v1897_v45 = vpop.f32.mrb[90].mxu0  ;;  %v3498_v18 = vpop.f32.mrb[122].mxu1  ;;  %3405 = vst [vmem:[%s5113_s3 + $0x50] sm:$0xff] %v3289_v22   ;;  %v2416_v6 = vadd.f32 %v2415_v32, %v2353_v33  ;;  %v2284_v13 = vadd.f32 %v2283_v24, %v2099_v41  ;;  %v5135_v15 = vld [vmem:[#allocation16_spill] sm:$0xff] }
 0x207   :  { %v4923_v25 = vadd.f32 %v1897_v45, %v4694_v2  ;;  %v2115_v57 = vadd.f32 %v3498_v18, %v4764_v31  ;;  %v2106_v21 = vpop.f32.mrb[123].mxu1  ;;  %v1899_v27 = vpop.f32.mrb[91].mxu0  ;;  %v2509_v60 = vadd.f32 %v4793_v55, %v2112_v16  ;;  %v2357_v26 = vmul.f32 %v2112_v16, %v2112_v16 }
 0x208   :  { %v2355_v56 = vmul.f32 %v2104_v12, %v2104_v12  ;;  %v2107_v9 = vadd.f32 %v2106_v21, %v4754_v23  ;;  %v2285_v52 = vadd.f32 %v2284_v13, %v2104_v12  ;;  %v2417_v1 = vadd.f32 %v2416_v6, %v2354_v46  ;;  %v5136_v46 = vld [vmem:[#allocation2_spill] sm:$0xff] }
 0x209   :  { %v2510_v19 = vadd.f32 %v4793_v55, %v2115_v57  ;;  %v2507_v39 = vadd.f32 %v4793_v55, %v2104_v12  ;;  %v2358_v42 = vmul.f32 %v2115_v57, %v2115_v57 }
 0x20a   :  { %v2356_v63 = vmul.f32 %v2107_v9, %v2107_v9  ;;  %v2508_v31 = vadd.f32 %v4793_v55, %v2107_v9  ;;  %v2418_v40 = vadd.f32 %v2417_v1, %v2355_v56  ;;  %v2286_v48 = vadd.f32 %v2285_v52, %v2107_v9  ;;  %v5137_v1 = vld [vmem:[#allocation19_spill] sm:$0xff] }
 0x20b   :  { %v3304_v2 = vpack.c.bf16 %v2510_v19, %v2509_v60 }
 0x20c   :  { %v1902_v8 = vpop.f32.mrb[92].mxu0  ;;  %v3501_v59 = vpop.f32.mrb[124].mxu1  ;;  %v3299_v41 = vpack.c.bf16 %v2508_v31, %v2507_v39  ;;  %v2287_v14 = vadd.f32 %v2286_v48, %v2112_v16  ;;  %v2419_v0 = vadd.f32 %v2418_v40, %v2356_v63  ;;  %v5138_v31 = vld [vmem:[#allocation3_spill] sm:$0xff] }
 0x20d   :  { %3408 = vst [vmem:[%s5113_s3 + $0x68] sm:$0xff] %v3304_v2   ;;  %v4935_v3 = vadd.f32 %v1902_v8, %v4698_v10  ;;  %v2128_v23 = vadd.f32 %v3501_v59, %v4779_v43  ;;  %v1904_v53 = vpop.f32.mrb[93].mxu0  ;;  %v2119_v62 = vpop.f32.mrb[125].mxu1 }
 0x20e   :  { %v2120_v28 = vadd.f32 %v2119_v62, %v4769_v35  ;;  %v1905_v49 = vpop.f32.mrb[94].mxu0  ;;  %v3502_v5 = vpop.f32.mrb[126].mxu1  ;;  %3407 = vst [vmem:[%s5113_s3 + $0x60] sm:$0xff] %v3299_v41   ;;  %v2420_v38 = vadd.f32 %v2419_v0, %v2357_v26  ;;  %v2288_v11 = vadd.f32 %v2287_v14, %v2115_v57  ;;  %v5139_v14 = vld [vmem:[#allocation20_spill] sm:$0xff] }
 0x20f   :  { %v4943_v7 = vadd.f32 %v1905_v49, %v4702_v17  ;;  %v2131_v10 = vadd.f32 %v3502_v5, %v4784_v47  ;;  %v2122_v34 = vpop.f32.mrb[127].mxu1  ;;  %v1907_v43 = vpop.f32.mrb[95].mxu0  ;;  %v2513_v16 = vadd.f32 %v4793_v55, %v2128_v23  ;;  %v2361_v19 = vmul.f32 %v2128_v23, %v2128_v23 }
 0x210   :  { %v2359_v22 = vmul.f32 %v2120_v28, %v2120_v28  ;;  %v2123_v58 = vadd.f32 %v2122_v34, %v5135_v15  ;;  %v2289_v33 = vadd.f32 %v2288_v11, %v2120_v28  ;;  %v2421_v24 = vadd.f32 %v2420_v38, %v2358_v42 }
 0x211   :  { %v2514_v35 = vadd.f32 %v4793_v55, %v2131_v10  ;;  %v2511_v32 = vadd.f32 %v4793_v55, %v2120_v28  ;;  %v2362_v59 = vmul.f32 %v2131_v10, %v2131_v10 }
 0x212   :  { %v2360_v12 = vmul.f32 %v2123_v58, %v2123_v58  ;;  %v2512_v47 = vadd.f32 %v4793_v55, %v2123_v58  ;;  %v2422_v45 = vadd.f32 %v2421_v24, %v2359_v22  ;;  %v2290_v18 = vadd.f32 %v2289_v33, %v2123_v58 }
 0x213   :  { %v3314_v17 = vpack.c.bf16 %v2514_v35, %v2513_v16  ;;  %v5140_v16 = vld [vmem:[#allocation4_spill] sm:$0xff] }
 0x214   :  { %v1910_v21 = vpop.f32.mrb[96].mxu0  ;;  %v3505_v27 = vpop.f32.mrb[128].mxu1  ;;  %v3309_v57 = vpack.c.bf16 %v2512_v47, %v2511_v32  ;;  %v2291_v9 = vadd.f32 %v2290_v18, %v2128_v23  ;;  %v2423_v52 = vadd.f32 %v2422_v45, %v2360_v12  ;;  %v5141_v18 = vld [vmem:[#allocation5_spill] sm:$0xff] }
 0x215   :  { %3410 = vst [vmem:[%s5113_s3 + $0x78] sm:$0xff] %v3314_v17   ;;  %v4955_v6 = vadd.f32 %v1910_v21, %v5136_v46  ;;  %v2144_v13 = vadd.f32 %v3505_v27, %v4809_v29  ;;  %v1912_v56 = vpop.f32.mrb[97].mxu0  ;;  %v2135_v60 = vpop.f32.mrb[129].mxu1 }
 0x216   :  { %v2136_v39 = vadd.f32 %v2135_v60, %v5137_v1  ;;  %v1913_v2 = vpop.f32.mrb[98].mxu0  ;;  %v3506_v63 = vpop.f32.mrb[130].mxu1  ;;  %3409 = vst [vmem:[%s5113_s3 + $0x70] sm:$0xff] %v3309_v57   ;;  %v2424_v41 = vadd.f32 %v2423_v52, %v2361_v19  ;;  %v2292_v53 = vadd.f32 %v2291_v9, %v2131_v10 }
 0x217   :  { %v4963_v40 = vadd.f32 %v1913_v2, %v5138_v31  ;;  %v2147_v48 = vadd.f32 %v3506_v63, %v4823_v36  ;;  %v2138_v8 = vpop.f32.mrb[131].mxu1  ;;  %v1915_v29 = vpop.f32.mrb[99].mxu0  ;;  %v2517_v62 = vadd.f32 %v4793_v55, %v2144_v13  ;;  %v2365_v24 = vmul.f32 %v2144_v13, %v2144_v13 }
 0x218   :  { %v2363_v23 = vmul.f32 %v2136_v39, %v2136_v39  ;;  %v2139_v0 = vadd.f32 %v2138_v8, %v5139_v14  ;;  %v2293_v28 = vadd.f32 %v2292_v53, %v2136_v39  ;;  %v2425_v49 = vadd.f32 %v2424_v41, %v2362_v59  ;;  %v5142_v41 = vld [vmem:[#allocation6_spill] sm:$0xff] }
 0x219   :  { %v2518_v26 = vadd.f32 %v4793_v55, %v2147_v48  ;;  %v2515_v5 = vadd.f32 %v4793_v55, %v2136_v39  ;;  %v2366_v46 = vmul.f32 %v2147_v48, %v2147_v48 }
 0x21a   :  { %v2364_v43 = vmul.f32 %v2139_v0, %v2139_v0  ;;  %v2516_v36 = vadd.f32 %v4793_v55, %v2139_v0  ;;  %v2426_v42 = vadd.f32 %v2425_v49, %v2363_v23  ;;  %v2294_v38 = vadd.f32 %v2293_v28, %v2139_v0 }
 0x21b   :  { %v3324_v34 = vpack.c.bf16 %v2518_v26, %v2517_v62 }
 0x21c   :  { %v1918_v11 = vpop.f32.mrb[100].mxu0  ;;  %v3509_v22 = vpop.f32.mrb[132].mxu1  ;;  %v3319_v10 = vpack.c.bf16 %v2516_v36, %v2515_v5  ;;  %v2295_v32 = vadd.f32 %v2294_v38, %v2144_v13  ;;  %v2427_v17 = vadd.f32 %v2426_v42, %v2364_v43 }
 0x21d   :  { %3412 = vst [vmem:[%s5113_s3 + $0x88] sm:$0xff] %v3324_v34   ;;  %v4975_v35 = vadd.f32 %v1918_v11, %v5140_v16  ;;  %v2160_v15 = vadd.f32 %v3509_v22, %v4855_v37  ;;  %v1920_v58 = vpop.f32.mrb[101].mxu0  ;;  %v2151_v33 = vpop.f32.mrb[133].mxu1  ;;  %v5143_v34 = vld [vmem:[#allocation7_spill] sm:$0xff] }
 0x21e   :  { %v2152_v12 = vadd.f32 %v2151_v33, %v4835_v61  ;;  %v1921_v47 = vpop.f32.mrb[102].mxu0  ;;  %v3510_v45 = vpop.f32.mrb[134].mxu1  ;;  %3411 = vst [vmem:[%s5113_s3 + $0x80] sm:$0xff] %v3319_v10   ;;  %v2428_v56 = vadd.f32 %v2427_v17, %v2365_v24  ;;  %v2296_v60 = vadd.f32 %v2295_v32, %v2147_v48 }
 0x21f   :  { %v4983_v21 = vadd.f32 %v1921_v47, %v5141_v18  ;;  %v2163_v27 = vadd.f32 %v3510_v45, %v4860_v20  ;;  %v2154_v57 = vpop.f32.mrb[135].mxu1  ;;  %v1923_v37 = vpop.f32.mrb[103].mxu0  ;;  %v2521_v19 = vadd.f32 %v4793_v55, %v2160_v15  ;;  %v2369_v26 = vmul.f32 %v2160_v15, %v2160_v15 }
 0x220   :  { %v2367_v13 = vmul.f32 %v2152_v12, %v2152_v12  ;;  %v2155_v9 = vadd.f32 %v2154_v57, %v4843_v54  ;;  %v2297_v52 = vadd.f32 %v2296_v60, %v2152_v12  ;;  %v2429_v1 = vadd.f32 %v2428_v56, %v2366_v46  ;;  %v5144_v57 = vld [vmem:[#allocation8_spill] sm:$0xff] }
 0x221   :  { %v2522_v61 = vadd.f32 %v4793_v55, %v2163_v27  ;;  %v2519_v39 = vadd.f32 %v4793_v55, %v2152_v12  ;;  %v2370_v38 = vmul.f32 %v2163_v27, %v2163_v27 }
 0x222   :  { %v2368_v63 = vmul.f32 %v2155_v9, %v2155_v9  ;;  %v2520_v20 = vadd.f32 %v4793_v55, %v2155_v9  ;;  %v2430_v31 = vadd.f32 %v2429_v1, %v2367_v13  ;;  %v2298_v8 = vadd.f32 %v2297_v52, %v2155_v9  ;;  %v5145_v1 = vld [vmem:[#allocation9_spill] sm:$0xff] }
 0x223   :  { %v3334_v2 = vpack.c.bf16 %v2522_v61, %v2521_v19 }
 0x224   :  { %v1926_v29 = vpop.f32.mrb[104].mxu0  ;;  %v3513_v59 = vpop.f32.mrb[136].mxu1  ;;  %v3329_v48 = vpack.c.bf16 %v2520_v20, %v2519_v39  ;;  %v2299_v14 = vadd.f32 %v2298_v8, %v2160_v15  ;;  %v2431_v0 = vadd.f32 %v2430_v31, %v2368_v63 }
 0x225   :  { %3414 = vst [vmem:[%s5113_s3 + $0x98] sm:$0xff] %v3334_v2   ;;  %v4995_v53 = vadd.f32 %v1926_v29, %v5142_v41  ;;  %v2176_v54 = vadd.f32 %v3513_v59, %v4895_v44  ;;  %v1928_v23 = vpop.f32.mrb[105].mxu0  ;;  %v2167_v62 = vpop.f32.mrb[137].mxu1 }
 0x226   :  { %v2168_v28 = vadd.f32 %v2167_v62, %v4875_v50  ;;  %v1929_v49 = vpop.f32.mrb[106].mxu0  ;;  %v3514_v5 = vpop.f32.mrb[138].mxu1  ;;  %3413 = vst [vmem:[%s5113_s3 + $0x90] sm:$0xff] %v3329_v48   ;;  %v2432_v11 = vadd.f32 %v2431_v0, %v2369_v26  ;;  %v2300_v22 = vadd.f32 %v2299_v14, %v2163_v27 }
 0x227   :  { %v5003_v43 = vadd.f32 %v1929_v49, %v5143_v34  ;;  %v2179_v36 = vadd.f32 %v3514_v5, %v4903_v4  ;;  %v2170_v42 = vpop.f32.mrb[139].mxu1  ;;  %v1931_v44 = vpop.f32.mrb[107].mxu0  ;;  %v2525_v16 = vadd.f32 %v4793_v55, %v2176_v54  ;;  %v2373_v60 = vmul.f32 %v2176_v54, %v2176_v54  ;;  %v5146_v34 = vld [vmem:[#allocation10_spill] sm:$0xff] }
 0x228   :  { %v2371_v10 = vmul.f32 %v2168_v28, %v2168_v28  ;;  %v2171_v15 = vadd.f32 %v2170_v42, %v4883_v30  ;;  %v2301_v58 = vadd.f32 %v2300_v22, %v2168_v28  ;;  %v2433_v33 = vadd.f32 %v2432_v11, %v2370_v38 }
 0x229   :  { %v2526_v50 = vadd.f32 %v4793_v55, %v2179_v36  ;;  %v2523_v24 = vadd.f32 %v4793_v55, %v2168_v28  ;;  %v2374_v20 = vmul.f32 %v2179_v36, %v2179_v36 }
 0x22a   :  { %v2372_v17 = vmul.f32 %v2171_v15, %v2171_v15  ;;  %v2524_v4 = vadd.f32 %v4793_v55, %v2171_v15  ;;  %v2434_v12 = vadd.f32 %v2433_v33, %v2371_v10  ;;  %v2302_v47 = vadd.f32 %v2301_v58, %v2171_v15  ;;  %v5147_v15 = vld [vmem:[#allocation11_spill] sm:$0xff] }
 0x22b   :  { %v3344_v32 = vpack.c.bf16 %v2526_v50, %v2525_v16 }
 0x22c   :  { %v1934_v45 = vpop.f32.mrb[108].mxu0  ;;  %v3517_v18 = vpop.f32.mrb[140].mxu1  ;;  %v3339_v27 = vpack.c.bf16 %v2524_v4, %v2523_v24  ;;  %v2303_v13 = vadd.f32 %v2302_v47, %v2176_v54  ;;  %v2435_v19 = vadd.f32 %v2434_v12, %v2372_v17 }
 0x22d   :  { %3416 = vst [vmem:[%s5113_s3 + $0xa8] sm:$0xff] %v3344_v32   ;;  %v5015_v37 = vadd.f32 %v1934_v45, %v5144_v57  ;;  %v2192_v30 = vadd.f32 %v3517_v18, %v4935_v3  ;;  %v1936_v46 = vpop.f32.mrb[109].mxu0  ;;  %v2183_v56 = vpop.f32.mrb[141].mxu1 }
 0x22e   :  { %v2184_v61 = vadd.f32 %v2183_v56, %v4915_v51  ;;  %v1937_v9 = vpop.f32.mrb[110].mxu0  ;;  %v3518_v52 = vpop.f32.mrb[142].mxu1  ;;  %3415 = vst [vmem:[%s5113_s3 + $0xa0] sm:$0xff] %v3339_v27   ;;  %v2436_v31 = vadd.f32 %v2435_v19, %v2373_v60  ;;  %v2304_v8 = vadd.f32 %v2303_v13, %v2179_v36 }
 0x22f   :  { %v5023_v39 = vadd.f32 %v1937_v9, %v5145_v1  ;;  %v2195_v2 = vadd.f32 %v3518_v52, %v4943_v7  ;;  %v2186_v63 = vpop.f32.mrb[143].mxu1  ;;  %v1939_v3 = vpop.f32.mrb[111].mxu0  ;;  %v2529_v59 = vadd.f32 %v4793_v55, %v2192_v30  ;;  %v2377_v38 = vmul.f32 %v2192_v30, %v2192_v30  ;;  %v5148_v9 = vld [vmem:[#allocation12_spill] sm:$0xff] }
 0x230   :  { %v2375_v29 = vmul.f32 %v2184_v61, %v2184_v61  ;;  %v2187_v48 = vadd.f32 %v2186_v63, %v4923_v25  ;;  %v2305_v41 = vadd.f32 %v2304_v8, %v2184_v61  ;;  %v2437_v54 = vadd.f32 %v2436_v31, %v2374_v20 }
 0x231   :  { %v2530_v51 = vadd.f32 %v4793_v55, %v2195_v2  ;;  %v2527_v23 = vadd.f32 %v4793_v55, %v2184_v61  ;;  %v2378_v32 = vmul.f32 %v2195_v2, %v2195_v2 }
 0x232   :  { %v2376_v26 = vmul.f32 %v2187_v48, %v2187_v48  ;;  %v2528_v7 = vadd.f32 %v4793_v55, %v2187_v48  ;;  %v2438_v14 = vadd.f32 %v2437_v54, %v2375_v29  ;;  %v2306_v0 = vadd.f32 %v2305_v41, %v2187_v48 }
 0x233   :  { %v3354_v62 = vpack.c.bf16 %v2530_v51, %v2529_v59  ;;  %v5149_v59 = vld [vmem:[#allocation13_spill] sm:$0xff] }
 0x234   :  { %v1942_v28 = vpop.f32.mrb[112].mxu0  ;;  %v3521_v49 = vpop.f32.mrb[144].mxu1  ;;  %v3349_v5 = vpack.c.bf16 %v2528_v7, %v2527_v23  ;;  %v2307_v11 = vadd.f32 %v2306_v0, %v2192_v30  ;;  %v2439_v22 = vadd.f32 %v2438_v14, %v2376_v26 }
 0x235   :  { %3418 = vst [vmem:[%s5113_s3 + $0xb8] sm:$0xff] %v3354_v62   ;;  %v5035_v36 = vadd.f32 %v1942_v28, %v5146_v34  ;;  %v2208_v25 = vadd.f32 %v3521_v49, %v4975_v35  ;;  %v1944_v42 = vpop.f32.mrb[113].mxu0  ;;  %v2199_v44 = vpop.f32.mrb[145].mxu1 }
 0x236   :  { %v2200_v10 = vadd.f32 %v2199_v44, %v4955_v6  ;;  %v1945_v16 = vpop.f32.mrb[114].mxu0  ;;  %v3522_v50 = vpop.f32.mrb[146].mxu1  ;;  %3417 = vst [vmem:[%s5113_s3 + $0xb0] sm:$0xff] %v3349_v5   ;;  %v2440_v17 = vadd.f32 %v2439_v22, %v2377_v38  ;;  %v2308_v4 = vadd.f32 %v2307_v11, %v2195_v2  ;;  %v5150_v22 = vld [vmem:[#allocation14_spill] sm:$0xff] }
 0x237   :  { %v5043_v58 = vadd.f32 %v1945_v16, %v5147_v15  ;;  %v2211_v33 = vadd.f32 %v3522_v50, %v4983_v21  ;;  %v2202_v24 = vpop.f32.mrb[147].mxu1  ;;  %v1947_v35 = vpop.f32.mrb[115].mxu0  ;;  %v2533_v47 = vadd.f32 %v4793_v55, %v2208_v25  ;;  %v2381_v63 = vmul.f32 %v2208_v25, %v2208_v25 }
 0x238   :  { %v2379_v12 = vmul.f32 %v2200_v10, %v2200_v10  ;;  %v2203_v45 = vadd.f32 %v2202_v24, %v4963_v40  ;;  %v2309_v18 = vadd.f32 %v2308_v4, %v2200_v10  ;;  %v2441_v27 = vadd.f32 %v2440_v17, %v2378_v32  ;;  %v5151_v4 = vld [vmem:[#allocation15_spill] sm:$0xff] }
 0x239   :  { %v2534_v6 = vadd.f32 %v4793_v55, %v2211_v33  ;;  %v2531_v57 = vadd.f32 %v4793_v55, %v2200_v10 }
 0x23a   :  { %v2380_v46 = vmul.f32 %v2203_v45, %v2203_v45  ;;  %v2532_v21 = vadd.f32 %v4793_v55, %v2203_v45  ;;  %v2442_v56 = vadd.f32 %v2441_v27, %v2379_v12  ;;  %v2310_v60 = vadd.f32 %v2309_v18, %v2203_v45 }
 0x23b   :  { %v3364_v30 = vpack.c.bf16 %v2534_v6, %v2533_v47 }
 0x23c   :  { %v1950_v13 = vpop.f32.mrb[116].mxu0  ;;  %v3525_v19 = vpop.f32.mrb[148].mxu1  ;;  %v3359_v61 = vpack.c.bf16 %v2532_v21, %v2531_v57  ;;  %v2311_v3 = vadd.f32 %v2310_v60, %v2208_v25  ;;  %v2443_v20 = vadd.f32 %v2442_v56, %v2380_v46 }
 0x23d   :  { %3420 = vst [vmem:[%s5113_s3 + $0xc8] sm:$0xff] %v3364_v30   ;;  %v1951_v52 = vadd.f32 %v1950_v13, %v5148_v9  ;;  %v2224_v40 = vadd.f32 %v3525_v19, %v5015_v37  ;;  %v1952_v1 = vpop.f32.mrb[117].mxu0  ;;  %v2215_v2 = vpop.f32.mrb[149].mxu1  ;;  %v2382_v37 = vmul.f32 %v2211_v33, %v2211_v33 }
 0x23e   :  { %v2216_v31 = vadd.f32 %v2215_v2, %v4995_v53  ;;  %v1953_v8 = vpop.f32.mrb[118].mxu0  ;;  %v3526_v29 = vpop.f32.mrb[150].mxu1  ;;  %3419 = vst [vmem:[%s5113_s3 + $0xc0] sm:$0xff] %v3359_v61   ;;  %v2444_v23 = vadd.f32 %v2443_v20, %v2381_v63  ;;  %v2312_v62 = vadd.f32 %v2311_v3, %v2211_v33  ;;  %v5152_v3 = vld [vmem:[#allocation17_spill] sm:$0xff] }
 0x23f   :  { %v1954_v51 = vadd.f32 %v1953_v8, %v5149_v59  ;;  %v2227_v48 = vadd.f32 %v3526_v29, %v5023_v39  ;;  %v2218_v41 = vpop.f32.mrb[151].mxu1  ;;  %v1955_v54 = vpop.f32.mrb[119].mxu0  ;;  %v2537_v7 = vadd.f32 %v4793_v55, %v2224_v40  ;;  %v2385_v15 = vmul.f32 %v2224_v40, %v2224_v40 }
 0x240   :  { %v2383_v26 = vmul.f32 %v2216_v31, %v2216_v31  ;;  %v2219_v14 = vadd.f32 %v2218_v41, %v5003_v43  ;;  %v2313_v0 = vadd.f32 %v2312_v62, %v2216_v31  ;;  %v2445_v28 = vadd.f32 %v2444_v23, %v2382_v37  ;;  %v5153_v54 = vld [vmem:[#allocation18_spill] sm:$0xff] }
 0x241   :  { %v2538_v53 = vadd.f32 %v4793_v55, %v2227_v48  ;;  %v2535_v49 = vadd.f32 %v4793_v55, %v2216_v31  ;;  %v2386_v18 = vmul.f32 %v2227_v48, %v2227_v48 }
 0x242   :  { %v2384_v34 = vmul.f32 %v2219_v14, %v2219_v14  ;;  %v2536_v39 = vadd.f32 %v4793_v55, %v2219_v14  ;;  %v2446_v25 = vadd.f32 %v2445_v28, %v2383_v26  ;;  %v2314_v42 = vadd.f32 %v2313_v0, %v2219_v14 }
 0x243   :  { %v3374_v5 = vpack.c.bf16 %v2538_v53, %v2537_v7 }
 0x244   :  { %v1958_v44 = vpop.f32.mrb[120].mxu0  ;;  %v3529_v38 = vpop.f32.mrb[152].mxu1  ;;  %v3369_v11 = vpack.c.bf16 %v2536_v39, %v2535_v49  ;;  %v2315_v33 = vadd.f32 %v2314_v42, %v2224_v40  ;;  %v2447_v24 = vadd.f32 %v2446_v25, %v2384_v34  ;;  %v3909_v34 = vld [vmem:[%s5112_s2] ss:$0 sm:$0xff] }
 0x245   :  { %3422 = vst [vmem:[%s5113_s3 + $0xd8] sm:$0xff] %v3374_v5   ;;  %v1959_v10 = vadd.f32 %v1958_v44, %v5150_v22  ;;  %v2240_v43 = vadd.f32 %v3529_v38, %v1951_v52  ;;  %v1960_v16 = vpop.f32.mrb[121].mxu0  ;;  %v2231_v50 = vpop.f32.mrb[153].mxu1 }
 0x246   :  { %v2232_v35 = vadd.f32 %v2231_v50, %v5035_v36  ;;  %v1961_v32 = vpop.f32.mrb[122].mxu0  ;;  %v3530_v17 = vpop.f32.mrb[154].mxu1  ;;  %3421 = vst [vmem:[%s5113_s3 + $0xd0] sm:$0xff] %v3369_v11   ;;  %v2448_v27 = vadd.f32 %v2447_v24, %v2385_v15  ;;  %v2316_v57 = vadd.f32 %v2315_v33, %v2227_v48 }
 0x247   :  { %v1962_v12 = vadd.f32 %v1961_v32, %v5151_v4  ;;  %v2243_v47 = vadd.f32 %v3530_v17, %v1954_v51  ;;  %v2234_v6 = vpop.f32.mrb[155].mxu1  ;;  %v1963_v45 = vpop.f32.mrb[123].mxu0  ;;  %v2541_v46 = vadd.f32 %v4793_v55, %v2240_v43  ;;  %v2389_v8 = vmul.f32 %v2240_v43, %v2240_v43 }
 0x248   :  { %v2387_v30 = vmul.f32 %v2232_v35, %v2232_v35  ;;  %v2235_v36 = vadd.f32 %v2234_v6, %v5043_v58  ;;  %v2317_v56 = vadd.f32 %v2316_v57, %v2232_v35  ;;  %v2449_v60 = vadd.f32 %v2448_v27, %v2386_v18 }
 0x249   :  { %v2542_v21 = vadd.f32 %v4793_v55, %v2243_v47  ;;  %v2539_v13 = vadd.f32 %v4793_v55, %v2232_v35  ;;  %v2390_v26 = vmul.f32 %v2243_v47, %v2243_v47 }
 0x24a   :  { %v2388_v61 = vmul.f32 %v2235_v36, %v2235_v36  ;;  %v2540_v9 = vadd.f32 %v4793_v55, %v2235_v36  ;;  %v2450_v52 = vadd.f32 %v2449_v60, %v2387_v30  ;;  %v2318_v40 = vadd.f32 %v2317_v56, %v2235_v36  ;;  %v2470_v30 = vld [vmem:[%s5114_s4] sm:$0x1] }
 0x24b   :  { %v3384_v19 = vpack.c.bf16 %v2542_v21, %v2541_v46  ;;  %v2473_v36 = vld [vmem:[%s5115_s5] sm:$0x1] }
 0x24c   :  { %v1966_v1 = vpop.f32.mrb[124].mxu0  ;;  %v3533_v2 = vpop.f32.mrb[156].mxu1  ;;  %v3379_v63 = vpack.c.bf16 %v2540_v9, %v2539_v13  ;;  %v2319_v29 = vadd.f32 %v2318_v40, %v2240_v43  ;;  %v2451_v59 = vadd.f32 %v2450_v52, %v2388_v61 }
 0x24d   :  { %3424 = vst [vmem:[%s5113_s3 + $0xe8] sm:$0xff] %v3384_v19   ;;  %v1967_v20 = vadd.f32 %v1966_v1, %v5152_v3  ;;  %v1968_v58 = vpop.f32.mrb[125].mxu0  ;;  %v2247_v31 = vpop.f32.mrb[157].mxu1 }
 0x24e   :  { %v2248_v51 = vadd.f32 %v2247_v31, %v1959_v10  ;;  %v1969_v48 = vpop.f32.mrb[126].mxu0  ;;  %v3534_v41 = vpop.f32.mrb[158].mxu1  ;;  %3423 = vst [vmem:[%s5113_s3 + $0xe0] sm:$0xff] %v3379_v63   ;;  %v2452_v7 = vadd.f32 %v2451_v59, %v2389_v8  ;;  %v2320_v53 = vadd.f32 %v2319_v29, %v2243_v47 }
 0x24f   :  { %v2256_v55 = vadd.f32 %v3533_v2, %v1967_v20  ;;  %v1970_v37 = vadd.f32 %v1969_v48, %v5153_v54  ;;  %v2250_v23 = vpop.f32.mrb[159].mxu1  ;;  %v1971_v62 = vpop.f32.mrb[127].mxu0 }
 0x250   :  { %v2391_v14 = vmul.f32 %v2248_v51, %v2248_v51  ;;  %v2251_v28 = vadd.f32 %v2250_v23, %v1962_v12  ;;  %v2321_v49 = vadd.f32 %v2320_v53, %v2248_v51  ;;  %v2453_v5 = vadd.f32 %v2452_v7, %v2390_v26 }
 0x251   :  { %v2259_v0 = vadd.f32 %v3534_v41, %v1970_v37  ;;  %v2543_v39 = vadd.f32 %v3909_v34, %v2248_v51  ;;  %v2545_v25 = vadd.f32 %v3909_v34, %v2256_v55  ;;  %v2393_v16 = vmul.f32 %v2256_v55, %v2256_v55 }
 0x252   :  { %v2392_v44 = vmul.f32 %v2251_v28, %v2251_v28  ;;  %v2544_v38 = vadd.f32 %v3909_v34, %v2251_v28  ;;  %v2454_v11 = vadd.f32 %v2453_v5, %v2391_v14  ;;  %v2322_v22 = vadd.f32 %v2321_v49, %v2251_v28 }
 0x253   :  { %v2546_v42 = vadd.f32 %v3909_v34, %v2259_v0  ;;  %v2394_v33 = vmul.f32 %v2259_v0, %v2259_v0 }
 0x254   :  { %v3389_v43 = vpack.c.bf16 %v2544_v38, %v2543_v39  ;;  %v2323_v50 = vadd.f32 %v2322_v22, %v2256_v55  ;;  %v2455_v15 = vadd.f32 %v2454_v11, %v2392_v44 }
 0x255   :  { %v3394_v10 = vpack.c.bf16 %v2546_v42, %v2545_v25 }
 0x256   :  { %3425 = vst [vmem:[%s5113_s3 + $0xf0] sm:$0xff] %v3389_v43   ;;  %v2324_v24 = vadd.f32 %v2323_v50, %v2259_v0  ;;  %v2456_v35 = vadd.f32 %v2455_v15, %v2393_v16 }
 0x257   :  { %3426 = vst [vmem:[%s5113_s3 + $0xf8] sm:$0xff] %v3394_v10  }
 0x258   :  { %v2325_v32 = vrot.slane %v2324_v24, 4  ;;  %v2457_v17 = vadd.f32 %v2456_v35, %v2394_v33 }
 0x25a   :  { %v2326_v4 = vadd.f32 %v2325_v32, %v2324_v24  ;;  %v2458_v12 = vrot.slane %v2457_v17, 4 }
 0x25c   :  { %v2327_v47 = vrot.slane %v2326_v4, 2  ;;  %v2459_v6 = vadd.f32 %v2458_v12, %v2457_v17 }
 0x25e   :  { %v2328_v45 = vadd.f32 %v2327_v47, %v2326_v4  ;;  %v2460_v18 = vrot.slane %v2459_v6, 2 }
 0x260   :  { %v2329_v27 = vrot.slane %v2328_v45, 1  ;;  %v2461_v57 = vadd.f32 %v2460_v18, %v2459_v6 }
 0x262   :  { %v2330_v46 = vadd.f32 %v2329_v27, %v2328_v45  ;;  %v2462_v21 = vrot.slane %v2461_v57, 1 }
 0x264   :  { %v2463_v56 = vadd.f32 %v2462_v21, %v2461_v57  ;;  %v2471_v60 = vadd.f32 %v2470_v30, %v2330_v46 }
 0x266   :  { %2472 = vst [vmem:[%s5114_s4] sm:$0x1] %v2471_v60  ;;  %v2474_v13 = vadd.f32 %v2473_v36, %v2463_v56 }
 0x268   :  { %2475 = vst [vmem:[%s5115_s5] sm:$0x1] %v2474_v13 }

// kernel: discriminator_forward.9
= control target key start
LH: loop header
LB: loop body
LE: loop exit
PB: predicated region body
PF: predicated region fallthrough
CT: control target
= control target key end

     0   :  { %s455_s0 = inlined_call_operand.vmem [shape: bf16[128,128], index: 0, kind: input, shape index: {}]   ;;  %s456_s1 = inlined_call_operand.vmem [shape: f32[1,128], index: 1, kind: input, shape index: {}]   ;;  %s457_s2 = inlined_call_operand.vmem [shape: f32[1,128], index: 2, kind: input, shape index: {}]   ;;  %s458_s3 = inlined_call_operand.vmem [shape: bf16[128,128], index: 3, kind: output, shape index: {}]  }
   0x1   :  { %v259_v0 = vld [vmem:[%s455_s0] sm:$0xff]   ;;  %v330_v4 = vld [vmem:[%s455_s0 + $0x8] sm:$0xff]   ;;  %v331_v5 = vld [vmem:[%s455_s0 + $0x10] sm:$0xff]  }
   0x2   :  { %v370_v1 = vld [vmem:[%s456_s1] ss:$0 sm:$0xff]  ;;  %v260_v2 = vunpack.c.l.bf16 %v259_v0  ;;  %v261_v3 = vunpack.c.h.bf16 %v259_v0  ;;  %v332_v6 = vld [vmem:[%s455_s0 + $0x18] sm:$0xff]   ;;  %v264_v8 = vunpack.c.l.bf16 %v330_v4  ;;  %v265_v9 = vunpack.c.h.bf16 %v330_v4  ;;  %v334_v35 = vld [vmem:[%s455_s0 + $0x28] sm:$0xff]  }
   0x3   :  { %v384_v7 = vld [vmem:[%s457_s2] ss:$0 sm:$0xff]  ;;  %v268_v10 = vunpack.c.l.bf16 %v331_v5  ;;  %v269_v11 = vunpack.c.h.bf16 %v331_v5  ;;  %v272_v14 = vunpack.c.l.bf16 %v332_v6  ;;  %v273_v15 = vunpack.c.h.bf16 %v332_v6  ;;  %v335_v48 = vld [vmem:[%s455_s0 + $0x30] sm:$0xff]   ;;  %v336_v4 = vld [vmem:[%s455_s0 + $0x38] sm:$0xff]  }
   0x4   :  { %v53_v12 = vmul.f32 %v260_v2, %v370_v1  ;;  %v54_v13 = vmul.f32 %v261_v3, %v370_v1  ;;  %v55_v16 = vmul.f32 %v264_v8, %v370_v1  ;;  %v56_v17 = vmul.f32 %v265_v9, %v370_v1  ;;  %v333_v34 = vld [vmem:[%s455_s0 + $0x20] sm:$0xff]  }
   0x5   :  { %v57_v18 = vmul.f32 %v268_v10, %v370_v1  ;;  %v58_v19 = vmul.f32 %v269_v11, %v370_v1  ;;  %v59_v22 = vmul.f32 %v272_v14, %v370_v1  ;;  %v60_v23 = vmul.f32 %v273_v15, %v370_v1 }
   0x6   :  { %v76_v20 = vadd.f32 %v384_v7, %v53_v12  ;;  %v77_v21 = vadd.f32 %v384_v7, %v54_v13  ;;  %v78_v24 = vadd.f32 %v384_v7, %v55_v16  ;;  %v79_v25 = vadd.f32 %v384_v7, %v56_v17 }
   0x7   :  { %v80_v26 = vadd.f32 %v384_v7, %v57_v18  ;;  %v81_v27 = vadd.f32 %v384_v7, %v58_v19  ;;  %v82_v42 = vadd.f32 %v384_v7, %v59_v22  ;;  %v83_v43 = vadd.f32 %v384_v7, %v60_v23 }
   0x8   :  { %vm92_vm0 = vcmp.gt.f32.partialorder %v76_v20, 0.0  ;;  %vm93_vm1 = vcmp.gt.f32.partialorder %v77_v21, 0.0  ;;  %v108_v28 = vmul.f32 0.2, %v76_v20  ;;  %v109_v29 = vmul.f32 0.2, %v77_v21 }
   0x9   :  { %vm94_vm2 = vcmp.gt.f32.partialorder %v78_v24, 0.0  ;;  %vm95_vm3 = vcmp.gt.f32.partialorder %v79_v25, 0.0  ;;  %v110_v30 = vmul.f32 0.2, %v78_v24  ;;  %v111_v31 = vmul.f32 0.2, %v79_v25 }
   0xa   :  { %v124_v32 = vsel %vm92_vm0, %v76_v20, %v108_v28  ;;  %v125_v33 = vsel %vm93_vm1, %v77_v21, %v109_v29  ;;  %vm96_vm4 = vcmp.gt.f32.partialorder %v80_v26, 0.0  ;;  %vm97_vm5 = vcmp.gt.f32.partialorder %v81_v27, 0.0 }
   0xb   :  { %v293_v36 = vpack.c.bf16 %v125_v33, %v124_v32  ;;  %v126_v37 = vsel %vm94_vm2, %v78_v24, %v110_v30  ;;  %v127_v38 = vsel %vm95_vm3, %v79_v25, %v111_v31  ;;  %v112_v39 = vmul.f32 0.2, %v80_v26 }
   0xc   :  { %v298_v40 = vpack.c.bf16 %v127_v38, %v126_v37  ;;  %v113_v41 = vmul.f32 0.2, %v81_v27  ;;  %v276_v45 = vunpack.c.l.bf16 %v333_v34  ;;  %v277_v46 = vunpack.c.h.bf16 %v333_v34 }
   0xd   :  { %294 = vst [vmem:[%s458_s3] sm:$0xff] %v293_v36   ;;  %v128_v44 = vsel %vm96_vm4, %v80_v26, %v112_v39  ;;  %v280_v47 = vunpack.c.l.bf16 %v334_v35  ;;  %vm98_vm6 = vcmp.gt.f32.partialorder %v82_v42, 0.0  ;;  %vm99_vm7 = vcmp.gt.f32.partialorder %v83_v43, 0.0 }
   0xe   :  { %337 = vst [vmem:[%s458_s3 + $0x8] sm:$0xff] %v298_v40   ;;  %v129_v49 = vsel %vm97_vm5, %v81_v27, %v113_v41  ;;  %v114_v50 = vmul.f32 0.2, %v82_v42  ;;  %v115_v52 = vmul.f32 0.2, %v83_v43  ;;  %v61_v53 = vmul.f32 %v276_v45, %v370_v1 }
   0xf   :  { %v303_v51 = vpack.c.bf16 %v129_v49, %v128_v44  ;;  %v62_v54 = vmul.f32 %v277_v46, %v370_v1  ;;  %v281_v56 = vunpack.c.h.bf16 %v334_v35  ;;  %v63_v57 = vmul.f32 %v280_v47, %v370_v1 }
  0x10   :  { %v130_v55 = vsel %vm98_vm6, %v82_v42, %v114_v50  ;;  %v284_v58 = vunpack.c.l.bf16 %v335_v48  ;;  %v131_v59 = vsel %vm99_vm7, %v83_v43, %v115_v52  ;;  %v84_v60 = vadd.f32 %v384_v7, %v61_v53 }
  0x11   :  { %338 = vst [vmem:[%s458_s3 + $0x10] sm:$0xff] %v303_v51   ;;  %v85_v61 = vadd.f32 %v384_v7, %v62_v54  ;;  %v285_v62 = vunpack.c.h.bf16 %v335_v48  ;;  %v308_v63 = vpack.c.bf16 %v131_v59, %v130_v55  ;;  %v64_v0 = vmul.f32 %v281_v56, %v370_v1 }
  0x12   :  { %v86_v2 = vadd.f32 %v384_v7, %v63_v57  ;;  %v65_v3 = vmul.f32 %v284_v58, %v370_v1  ;;  %vm100_vm8 = vcmp.gt.f32.partialorder %v84_v60, 0.0  ;;  %v116_v5 = vmul.f32 0.2, %v84_v60 }
  0x13   :  { %vm101_vm9 = vcmp.gt.f32.partialorder %v85_v61, 0.0  ;;  %v117_v6 = vmul.f32 0.2, %v85_v61  ;;  %339 = vst [vmem:[%s458_s3 + $0x18] sm:$0xff] %v308_v63   ;;  %v87_v8 = vadd.f32 %v384_v7, %v64_v0  ;;  %v66_v10 = vmul.f32 %v285_v62, %v370_v1 }
  0x14   :  { %vm102_vm10 = vcmp.gt.f32.partialorder %v86_v2, 0.0  ;;  %v118_v9 = vmul.f32 0.2, %v86_v2  ;;  %v132_v11 = vsel %vm100_vm8, %v84_v60, %v116_v5  ;;  %v88_v13 = vadd.f32 %v384_v7, %v65_v3 }
  0x15   :  { %v133_v12 = vsel %vm101_vm9, %v85_v61, %v117_v6  ;;  %v288_v14 = vunpack.c.l.bf16 %v336_v4  ;;  %vm103_vm11 = vcmp.gt.f32.partialorder %v87_v8, 0.0  ;;  %v119_v16 = vmul.f32 0.2, %v87_v8 }
  0x16   :  { %v313_v15 = vpack.c.bf16 %v133_v12, %v132_v11  ;;  %v134_v17 = vsel %vm102_vm10, %v86_v2, %v118_v9  ;;  %v89_v18 = vadd.f32 %v384_v7, %v66_v10  ;;  %vm104_vm12 = vcmp.gt.f32.partialorder %v88_v13, 0.0 }
  0x17   :  { %v120_v19 = vmul.f32 0.2, %v88_v13  ;;  %v289_v20 = vunpack.c.h.bf16 %v336_v4  ;;  %v135_v21 = vsel %vm103_vm11, %v87_v8, %v119_v16  ;;  %v67_v22 = vmul.f32 %v288_v14, %v370_v1 }
  0x18   :  { %340 = vst [vmem:[%s458_s3 + $0x20] sm:$0xff] %v313_v15   ;;  %v318_v23 = vpack.c.bf16 %v135_v21, %v134_v17  ;;  %vm105_vm13 = vcmp.gt.f32.partialorder %v89_v18, 0.0  ;;  %v121_v24 = vmul.f32 0.2, %v89_v18 }
  0x19   :  { %v136_v25 = vsel %vm104_vm12, %v88_v13, %v120_v19  ;;  %v68_v26 = vmul.f32 %v289_v20, %v370_v1  ;;  %v90_v27 = vadd.f32 %v384_v7, %v67_v22 }
  0x1a   :  { %341 = vst [vmem:[%s458_s3 + $0x28] sm:$0xff] %v318_v23   ;;  %v137_v28 = vsel %vm105_vm13, %v89_v18, %v121_v24 }
  0x1b   :  { %v323_v29 = vpack.c.bf16 %v137_v28, %v136_v25  ;;  %v91_v30 = vadd.f32 %v384_v7, %v68_v26  ;;  %vm106_vm14 = vcmp.gt.f32.partialorder %v90_v27, 0.0  ;;  %v122_v31 = vmul.f32 0.2, %v90_v27 }
  0x1d   :  { %342 = vst [vmem:[%s458_s3 + $0x30] sm:$0xff] %v323_v29   ;;  %vm107_vm15 = vcmp.gt.f32.partialorder %v91_v30, 0.0  ;;  %v123_v32 = vmul.f32 0.2, %v91_v30  ;;  %v138_v33 = vsel %vm106_vm14, %v90_v27, %v122_v31 }
  0x1f   :  { %v139_v1 = vsel %vm107_vm15, %v91_v30, %v123_v32 }
  0x20   :  { %v328_v34 = vpack.c.bf16 %v139_v1, %v138_v33 }
  0x22   :  { %343 = vst [vmem:[%s458_s3 + $0x38] sm:$0xff] %v328_v34  }

// kernel: discriminator_forward.8
= control target key start
LH: loop header
LB: loop body
LE: loop exit
PB: predicated region body
PF: predicated region fallthrough
CT: control target
= control target key end

     0   :  { %vm554_vm0 = vcmask 523264   ;;  %s1877_s1 = inlined_call_operand.vmem [shape: bf16[576,128], index: 1, kind: input, shape index: {}]   ;;  %s1878_s0 = inlined_call_operand.vmem [shape: bf16[128,576], index: 0, kind: input, shape index: {}]   ;;  %s1879_s4 = inlined_call_operand.vmem [shape: f32[1,128], index: 4, kind: output, shape index: {1}]   ;;  %s1880_s5 = inlined_call_operand.vmem [shape: f32[1,128], index: 5, kind: output, shape index: {2}]   ;;  %s1881_s2 = inlined_call_operand.vmem [shape: f32[1,128], index: 2, kind: input, shape index: {}]   ;;  %s1882_s3 = inlined_call_operand.vmem [shape: bf16[128,128], index: 3, kind: output, shape index: {0}]  }
   0x1   :  { %v1392_v0 = vld [vmem:[%s1877_s1 + $0x40] sm:$0xff]   ;;  %v1396_v4 = vld [vmem:[%s1877_s1 + $0x48] sm:$0xff]   ;;  %v1400_v8 = vld [vmem:[%s1877_s1 + $0x50] sm:$0xff]  }
   0x2   :  { %v1393_v1 = vld [vmem:[%s1877_s1 + $0xc0] sm:$0xff]   ;;  %1219 = vmatprep.subr.bf16.mxu0 %v1392_v0  ;;  %v1397_v5 = vld [vmem:[%s1877_s1 + $0xc8] sm:$0xff]   ;;  %v1401_v9 = vld [vmem:[%s1877_s1 + $0xd0] sm:$0xff]  }
   0x3   :  { %v1394_v2 = vld [vmem:[%s1877_s1] sm:$0xff]   ;;  %1283 = vmatprep.subr.bf16.mxu1 %v1393_v1  ;;  %v1398_v6 = vld [vmem:[%s1877_s1 + $0x8] sm:$0xff]   ;;  %v1402_v10 = vld [vmem:[%s1877_s1 + $0x10] sm:$0xff]  }
   0x4   :  { %v1395_v3 = vld [vmem:[%s1877_s1 + $0x80] sm:$0xff]   ;;  %1220 = vmatpush3.bf16.msra.mxu0 %v1394_v2  ;;  %v1399_v7 = vld [vmem:[%s1877_s1 + $0x88] sm:$0xff]   ;;  %v1403_v11 = vld [vmem:[%s1877_s1 + $0x90] sm:$0xff]  }
   0x5   :  { %1284 = vmatpush3.bf16.msra.mxu1 %v1395_v3  ;;  %1221 = vmatprep.subr.bf16.mxu0 %v1396_v4  ;;  %v1404_v12 = vld [vmem:[%s1877_s1 + $0x58] sm:$0xff]   ;;  %v1408_v16 = vld [vmem:[%s1877_s1 + $0x60] sm:$0xff]   ;;  %v1412_v20 = vld [vmem:[%s1877_s1 + $0x68] sm:$0xff]  }
   0x6   :  { %1285 = vmatprep.subr.bf16.mxu1 %v1397_v5  ;;  %v1405_v13 = vld [vmem:[%s1877_s1 + $0xd8] sm:$0xff]   ;;  %v1409_v17 = vld [vmem:[%s1877_s1 + $0xe0] sm:$0xff]   ;;  %v1413_v21 = vld [vmem:[%s1877_s1 + $0xe8] sm:$0xff]  }
   0x7   :  { %v1406_v14 = vld [vmem:[%s1877_s1 + $0x18] sm:$0xff]   ;;  %v1410_v18 = vld [vmem:[%s1877_s1 + $0x20] sm:$0xff]   ;;  %v1414_v22 = vld [vmem:[%s1877_s1 + $0x28] sm:$0xff]  }
   0x8   :  { %1222 = vmatpush3.bf16.msra.mxu0 %v1398_v6  ;;  %v1407_v15 = vld [vmem:[%s1877_s1 + $0x98] sm:$0xff]   ;;  %v1411_v19 = vld [vmem:[%s1877_s1 + $0xa0] sm:$0xff]   ;;  %v1415_v23 = vld [vmem:[%s1877_s1 + $0xa8] sm:$0xff]  }
   0x9   :  { %1286 = vmatpush3.bf16.msra.mxu1 %v1399_v7  ;;  %1223 = vmatprep.subr.bf16.mxu0 %v1400_v8  ;;  %v1416_v24 = vld [vmem:[%s1877_s1 + $0x70] sm:$0xff]   ;;  %v1420_v28 = vld [vmem:[%s1877_s1 + $0x78] sm:$0xff]   ;;  %v1429_v35 = vld [vmem:[%s1878_s0 + $0xc] ss:$20 sps:$4 sm:$0xff]  }
   0xa   :  { %1287 = vmatprep.subr.bf16.mxu1 %v1401_v9  ;;  %v1417_v25 = vld [vmem:[%s1877_s1 + $0xf0] sm:$0xff]   ;;  %v1421_v29 = vld [vmem:[%s1877_s1 + $0xf8] sm:$0xff]   ;;  %v1430_v36 = vld [vmem:[%s1877_s1 + $0x100] sm:$0xff]   ;;  %708 = vmatprep.mubr.bf16.mxu1 %v1429_v35 }
   0xb   :  { %v1418_v26 = vld [vmem:[%s1877_s1 + $0x30] sm:$0xff]   ;;  %v1422_v30 = vld [vmem:[%s1877_s1 + $0x38] sm:$0xff]   ;;  %v1431_v37 = vld [vmem:[%s1878_s0 + $0x2c] ss:$20 sps:$4 sm:$0xff]  }
   0xc   :  { %1224 = vmatpush3.bf16.msra.mxu0 %v1402_v10  ;;  %v1419_v27 = vld [vmem:[%s1877_s1 + $0xb0] sm:$0xff]   ;;  %v1423_v31 = vld [vmem:[%s1877_s1 + $0xb8] sm:$0xff]   ;;  %v1443_v42 = vld [vmem:[%s1877_s1 + $0x108] sm:$0xff]  }
   0xd   :  { %1288 = vmatpush3.bf16.msra.mxu1 %v1403_v11  ;;  %1225 = vmatprep.subr.bf16.mxu0 %v1404_v12  ;;  %v1424_v32 = vld [vmem:[%s1878_s0] ss:$20 sps:$4 sm:$0xff]   ;;  %v1426_v33 = vld [vmem:[%s1878_s0 + $0x4] ss:$20 sps:$4 sm:$0xff]   ;;  %v1427_v34 = vld [vmem:[%s1878_s0 + $0x8] ss:$20 sps:$4 sm:$0xff]  }
   0xe   :  { %1289 = vmatprep.subr.bf16.mxu1 %v1405_v13  ;;  %611 = vmatprep.mubr.bf16.mxu0 %v1426_v33  ;;  %v1433_v38 = vld [vmem:[%s1878_s0 + $0x34] ss:$20 sps:$4 sm:$0xff]   ;;  %v1436_v40 = vld [vmem:[%s1878_s0 + $0x30] ss:$20 sps:$4 sm:$0xff]   ;;  %v1442_v45 = vld [vmem:[%s1878_s0 + $0x58] ss:$20 sps:$4 sm:$0xff]  }
   0xf   :  { %v1435_v39 = vld [vmem:[%s1878_s0 + $0x28] ss:$20 sps:$4 sm:$0xff]   ;;  %v1441_v44 = vld [vmem:[%s1878_s0 + $0x50] ss:$20 sps:$4 sm:$0xff]   ;;  %v1448_v50 = vld [vmem:[%s1878_s0 + $0x78] ss:$20 sps:$4 sm:$0xff]  }
  0x10   :  { %1226 = vmatpush3.bf16.msra.mxu0 %v1406_v14  ;;  %v1437_v41 = vld [vmem:[%s1878_s0 + $0x54] ss:$20 sps:$4 sm:$0xff]   ;;  %v1439_v43 = vld [vmem:[%s1878_s0 + $0x5c] ss:$20 sps:$4 sm:$0xff]   ;;  %v1446_v48 = vld [vmem:[%s1878_s0 + $0x84] ss:$20 sps:$4 sm:$0xff]  }
  0x11   :  { %1290 = vmatpush3.bf16.msra.mxu1 %v1407_v15  ;;  %1227 = vmatprep.subr.bf16.mxu0 %v1408_v16  ;;  %v1456_v46 = vld [vmem:[%s1877_s1 + $0x110] sm:$0xff]   ;;  %v1469_v49 = vld [vmem:[%s1877_s1 + $0x118] sm:$0xff]   ;;  %v1452_v53 = vld [vmem:[%s1878_s0 + $0xac] ss:$20 sps:$4 sm:$0xff]   ;;  %v1484_v12 = vmov 0.0  }
  0x12   :  { %1291 = vmatprep.subr.bf16.mxu1 %v1409_v17  ;;  %v1444_v47 = vld [vmem:[%s1878_s0 + $0x7c] ss:$20 sps:$4 sm:$0xff]   ;;  %v1449_v51 = vld [vmem:[%s1878_s0 + $0x80] ss:$20 sps:$4 sm:$0xff]   ;;  %v1450_v52 = vld [vmem:[%s1878_s0 + $0xa4] ss:$20 sps:$4 sm:$0xff]  }
  0x13   :  { %v1454_v54 = vld [vmem:[%s1878_s0 + $0xa0] ss:$20 sps:$4 sm:$0xff]   ;;  %v1455_v55 = vld [vmem:[%s1878_s0 + $0xa8] ss:$20 sps:$4 sm:$0xff]   ;;  %v1462_v59 = vld [vmem:[%s1878_s0 + $0xd0] ss:$20 sps:$4 sm:$0xff]  }
  0x14   :  { %1228 = vmatpush3.bf16.msra.mxu0 %v1410_v18  ;;  %v1457_v56 = vld [vmem:[%s1878_s0 + $0xcc] ss:$20 sps:$4 sm:$0xff]   ;;  %v1459_v57 = vld [vmem:[%s1878_s0 + $0xd4] ss:$20 sps:$4 sm:$0xff]   ;;  %v1465_v61 = vld [vmem:[%s1878_s0 + $0xfc] ss:$20 sps:$4 sm:$0xff]  }
  0x15   :  { %1292 = vmatpush3.bf16.msra.mxu1 %v1411_v19  ;;  %1229 = vmatprep.subr.bf16.mxu0 %v1412_v20  ;;  %v1461_v58 = vld [vmem:[%s1878_s0 + $0xc8] ss:$20 sps:$4 sm:$0xff]   ;;  %v1467_v62 = vld [vmem:[%s1878_s0 + $0xf0] ss:$20 sps:$4 sm:$0xff]   ;;  %v1468_v63 = vld [vmem:[%s1878_s0 + $0xf8] ss:$20 sps:$4 sm:$0xff]  }
  0x16   :  { %1293 = vmatprep.subr.bf16.mxu1 %v1413_v21  ;;  %v1463_v60 = vld [vmem:[%s1878_s0 + $0xf4] ss:$20 sps:$4 sm:$0xff]   ;;  %v1470_v0 = vld [vmem:[%s1878_s0 + $0x11c] ss:$20 sps:$4 sm:$0xff]   ;;  %v1472_v1 = vld [vmem:[%s1878_s0 + $0x124] ss:$20 sps:$4 sm:$0xff]  }
  0x17   :  { %v1474_v2 = vld [vmem:[%s1878_s0 + $0x118] ss:$20 sps:$4 sm:$0xff]   ;;  %v1475_v3 = vld [vmem:[%s1878_s0 + $0x120] ss:$20 sps:$4 sm:$0xff]   ;;  %v1476_v4 = vld [vmem:[%s1878_s0 + $0x10] ss:$20 sps:$4 sm:$0xff]  }
  0x18   :  { %1230 = vmatpush3.bf16.msra.mxu0 %v1414_v22  ;;  %v1477_v5 = vld [vmem:[%s1878_s0 + $0xb0] ss:$20 sps:$4 sm:$0xff]   ;;  %v1478_v6 = vld [vmem:[%s1878_s0 + $0x38] ss:$20 sps:$4 sm:$0xff]   ;;  %v1480_v8 = vld [vmem:[%s1878_s0 + $0x60] ss:$20 sps:$4 sm:$0xff]  }
  0x19   :  { %1294 = vmatpush3.bf16.msra.mxu1 %v1415_v23  ;;  %1231 = vmatprep.subr.bf16.mxu0 %v1416_v24  ;;  %v1479_v7 = vld [vmem:[%s1878_s0 + $0xd8] ss:$20 sps:$4 sm:$0xff]   ;;  %v1481_v9 = vld [vmem:[%s1878_s0 + $0x100] ss:$20 sps:$4 sm:$0xff]   ;;  %v1482_v10 = vld [vmem:[%s1878_s0 + $0x88] ss:$20 sps:$4 sm:$0xff]  }
  0x1a   :  { %1295 = vmatprep.subr.bf16.mxu1 %v1417_v25  ;;  %v1483_v11 = vld [vmem:[%s1878_s0 + $0x128] ss:$20 sps:$4 sm:$0xff]   ;;  %932 = vst [vmem:[%s1879_s4] sm:$0x1] %v1484_v12  ;;  %933 = vst [vmem:[%s1880_s5] sm:$0x1] %v1484_v12 }
  0x1c   :  { %1232 = vmatpush3.bf16.msra.mxu0 %v1418_v26 }
  0x1d   :  { %1296 = vmatpush3.bf16.msra.mxu1 %v1419_v27  ;;  %1233 = vmatprep.subr.bf16.mxu0 %v1420_v28 }
  0x1e   :  { %1297 = vmatprep.subr.bf16.mxu1 %v1421_v29 }
  0x20   :  { %1234 = vmatpush3.bf16.msra.mxu0 %v1422_v30 }
  0x21   :  { %1298 = vmatpush3.bf16.msra.mxu1 %v1423_v31  ;;  %1359 = vmatprep.subr.bf16.mxu0 %v1430_v36 }
  0x22   :  { %1383 = vmatprep.subr.bf16.mxu1 %v1430_v36 }
  0x23   :  { %612 = vmatmul.mubr.bf16.vlgmr.msra.gmra.mrb[0].mxu0 %v1424_v32 }
  0x24   :  { %709 = vmatmul.mubr.bf16.vlgmr.msra.gmra.mrb[0].mxu1 %v1427_v34  ;;  %1360 = vmatpush3.bf16.msra.mxu0 %v1430_v36 }
  0x25   :  { %619 = vmatprep.mubr.bf16.mxu0 %v1431_v37  ;;  %716 = vmatprep.mubr.bf16.mxu1 %v1433_v38 }
  0x26   :  { %1387 = vmatpush3.bf16.msra.mxu1 %v1430_v36  ;;  %1361 = vmatprep.subr.bf16.mxu0 %v1443_v42 }
  0x27   :  { %1384 = vmatprep.subr.bf16.mxu1 %v1443_v42 }
  0x28   :  { %1362 = vmatpush3.bf16.msra.mxu0 %v1443_v42 }
  0x29   :  { %1363 = vmatprep.subr.bf16.mxu0 %v1456_v46 }
  0x2a   :  { %1388 = vmatpush3.bf16.msra.mxu1 %v1443_v42 }
  0x2b   :  { %620 = vmatmul.mubr.bf16.gmra.mrb[4].mxu0 %v1435_v39  ;;  %1385 = vmatprep.subr.bf16.mxu1 %v1456_v46 }
  0x2c   :  { %717 = vmatmul.mubr.bf16.gmra.mrb[4].mxu1 %v1436_v40  ;;  %627 = vmatprep.mubr.bf16.mxu0 %v1437_v41 }
  0x2d   :  { %724 = vmatprep.mubr.bf16.mxu1 %v1439_v43  ;;  %1364 = vmatpush3.bf16.msra.mxu0 %v1456_v46 }
  0x2e   :  { %1389 = vmatpush3.bf16.msra.mxu1 %v1456_v46  ;;  %1365 = vmatprep.subr.bf16.mxu0 %v1469_v49 }
  0x2f   :  { %1386 = vmatprep.subr.bf16.mxu1 %v1469_v49 }
  0x31   :  { %1366 = vmatpush3.bf16.msra.mxu0 %v1469_v49 }
  0x32   :  { %1390 = vmatpush3.bf16.msra.mxu1 %v1469_v49 }
  0x33   :  { %628 = vmatmul.mubr.bf16.gmra.mrb[8].mxu0 %v1441_v44 }
  0x34   :  { %725 = vmatmul.mubr.bf16.gmra.mrb[8].mxu1 %v1442_v45  ;;  %635 = vmatprep.mubr.bf16.mxu0 %v1444_v47 }
  0x35   :  { %732 = vmatprep.mubr.bf16.mxu1 %v1446_v48 }
  0x3b   :  { %636 = vmatmul.mubr.bf16.gmra.mrb[12].mxu0 %v1448_v50 }
  0x3c   :  { %733 = vmatmul.mubr.bf16.gmra.mrb[12].mxu1 %v1449_v51  ;;  %643 = vmatprep.mubr.bf16.mxu0 %v1450_v52 }
  0x3d   :  { %740 = vmatprep.mubr.bf16.mxu1 %v1452_v53 }
  0x43   :  { %644 = vmatmul.mubr.bf16.gmra.mrb[16].mxu0 %v1454_v54 }
  0x44   :  { %741 = vmatmul.mubr.bf16.gmra.mrb[16].mxu1 %v1455_v55  ;;  %651 = vmatprep.mubr.bf16.mxu0 %v1457_v56 }
  0x45   :  { %748 = vmatprep.mubr.bf16.mxu1 %v1459_v57 }
  0x4b   :  { %652 = vmatmul.mubr.bf16.gmra.mrb[20].mxu0 %v1461_v58 }
  0x4c   :  { %749 = vmatmul.mubr.bf16.gmra.mrb[20].mxu1 %v1462_v59  ;;  %659 = vmatprep.mubr.bf16.mxu0 %v1463_v60 }
  0x4d   :  { %756 = vmatprep.mubr.bf16.mxu1 %v1465_v61 }
  0x53   :  { %660 = vmatmul.mubr.bf16.gmra.mrb[24].mxu0 %v1467_v62 }
  0x54   :  { %757 = vmatmul.mubr.bf16.gmra.mrb[24].mxu1 %v1468_v63  ;;  %667 = vmatprep.mubr.bf16.mxu0 %v1470_v0 }
  0x55   :  { %764 = vmatprep.mubr.bf16.mxu1 %v1472_v1 }
  0x5b   :  { %668 = vmatmul.mubr.bf16.gmra.mrb[28].mxu0 %v1474_v2 }
  0x5c   :  { %765 = vmatmul.mubr.bf16.gmra.mrb[28].mxu1 %v1475_v3  ;;  %1367 = vmatprep.mubr.msk.bf16.mxu0 %vm554_vm0, %v1476_v4 }
  0x5d   :  { %1375 = vmatprep.mubr.msk.bf16.mxu1 %vm554_vm0, %v1477_v5 }
  0x63   :  { %1368 = vmatmul.mubr.msk.bf16.vlgmr.msra.gmra.mrb[32].mxu0 %vm554_vm0, %v1478_v6 }
  0x64   :  { %1376 = vmatmul.mubr.msk.bf16.vlgmr.msra.gmra.mrb[32].mxu1 %vm554_vm0, %v1479_v7  ;;  %1371 = vmatprep.mubr.msk.bf16.mxu0 %vm554_vm0, %v1480_v8 }
  0x65   :  { %1379 = vmatprep.mubr.msk.bf16.mxu1 %vm554_vm0, %v1481_v9 }
  0x6b   :  { %1372 = vmatmul.mubr.msk.bf16.gmra.mrb[36].mxu0 %vm554_vm0, %v1482_v10 }
  0x6c   :  { %1380 = vmatmul.mubr.msk.bf16.gmra.mrb[36].mxu1 %vm554_vm0, %v1483_v11 }
  0xf6   :  { %v1235_v13 = vpop.f32.mrb[0].mxu0 }
  0xf7   :  { %v1299_v14 = vpop.f32.mrb[0].mxu1  ;;  %v1236_v15 = vpop.f32.mrb[1].mxu0 }
  0xf8   :  { %v1237_v16 = vadd.f32 %v1236_v15, %v1235_v13  ;;  %v1300_v17 = vpop.f32.mrb[1].mxu1  ;;  %v1238_v18 = vpop.f32.mrb[2].mxu0 }
  0xf9   :  { %v1301_v19 = vadd.f32 %v1300_v17, %v1299_v14  ;;  %v1302_v20 = vpop.f32.mrb[2].mxu1  ;;  %v1239_v21 = vpop.f32.mrb[3].mxu0 }
  0xfa   :  { %v1240_v22 = vadd.f32 %v1239_v21, %v1238_v18  ;;  %v1303_v23 = vpop.f32.mrb[3].mxu1 }
  0xfb   :  { %v1304_v24 = vadd.f32 %v1303_v23, %v1302_v20  ;;  %v1757_v25 = vadd.f32 %v1301_v19, %v1237_v16 }
  0xfd   :  { %v1759_v26 = vadd.f32 %v1304_v24, %v1240_v22 }
  0xfe   :  { %v1241_v27 = vpop.f32.mrb[4].mxu0 }
  0xff   :  { %v1305_v28 = vpop.f32.mrb[4].mxu1  ;;  %v1242_v29 = vpop.f32.mrb[5].mxu0 }
 0x100   :  { %v1243_v30 = vadd.f32 %v1242_v29, %v1241_v27  ;;  %v1306_v31 = vpop.f32.mrb[5].mxu1  ;;  %v1244_v32 = vpop.f32.mrb[6].mxu0 }
 0x101   :  { %v1307_v33 = vadd.f32 %v1306_v31, %v1305_v28  ;;  %v1308_v34 = vpop.f32.mrb[6].mxu1  ;;  %v1245_v35 = vpop.f32.mrb[7].mxu0 }
 0x102   :  { %v1246_v36 = vadd.f32 %v1245_v35, %v1244_v32  ;;  %v1309_v37 = vpop.f32.mrb[7].mxu1 }
 0x103   :  { %v1310_v38 = vadd.f32 %v1309_v37, %v1308_v34  ;;  %v1761_v39 = vadd.f32 %v1307_v33, %v1243_v30 }
 0x105   :  { %v1763_v40 = vadd.f32 %v1310_v38, %v1246_v36 }
 0x106   :  { %v1247_v41 = vpop.f32.mrb[8].mxu0 }
 0x107   :  { %v1311_v42 = vpop.f32.mrb[8].mxu1  ;;  %v1248_v43 = vpop.f32.mrb[9].mxu0 }
 0x108   :  { %v1249_v44 = vadd.f32 %v1248_v43, %v1247_v41  ;;  %v1312_v45 = vpop.f32.mrb[9].mxu1  ;;  %v1250_v46 = vpop.f32.mrb[10].mxu0 }
 0x109   :  { %v1313_v47 = vadd.f32 %v1312_v45, %v1311_v42  ;;  %v1314_v48 = vpop.f32.mrb[10].mxu1  ;;  %v1251_v49 = vpop.f32.mrb[11].mxu0 }
 0x10a   :  { %v1252_v50 = vadd.f32 %v1251_v49, %v1250_v46  ;;  %v1315_v51 = vpop.f32.mrb[11].mxu1 }
 0x10b   :  { %v1316_v52 = vadd.f32 %v1315_v51, %v1314_v48  ;;  %v1765_v53 = vadd.f32 %v1313_v47, %v1249_v44 }
 0x10d   :  { %v1767_v54 = vadd.f32 %v1316_v52, %v1252_v50 }
 0x10e   :  { %v1253_v55 = vpop.f32.mrb[12].mxu0 }
 0x10f   :  { %v1317_v56 = vpop.f32.mrb[12].mxu1  ;;  %v1254_v57 = vpop.f32.mrb[13].mxu0 }
 0x110   :  { %v1255_v58 = vadd.f32 %v1254_v57, %v1253_v55  ;;  %v1318_v59 = vpop.f32.mrb[13].mxu1  ;;  %v1256_v60 = vpop.f32.mrb[14].mxu0 }
 0x111   :  { %v1319_v61 = vadd.f32 %v1318_v59, %v1317_v56  ;;  %v1320_v62 = vpop.f32.mrb[14].mxu1  ;;  %v1257_v63 = vpop.f32.mrb[15].mxu0 }
 0x112   :  { %v1258_v0 = vadd.f32 %v1257_v63, %v1256_v60  ;;  %v1321_v1 = vpop.f32.mrb[15].mxu1 }
 0x113   :  { %v1322_v2 = vadd.f32 %v1321_v1, %v1320_v62  ;;  %v1769_v3 = vadd.f32 %v1319_v61, %v1255_v58 }
 0x115   :  { %v1771_v4 = vadd.f32 %v1322_v2, %v1258_v0 }
 0x116   :  { %v1259_v5 = vpop.f32.mrb[16].mxu0 }
 0x117   :  { %v1323_v6 = vpop.f32.mrb[16].mxu1  ;;  %v1260_v7 = vpop.f32.mrb[17].mxu0 }
 0x118   :  { %v1261_v8 = vadd.f32 %v1260_v7, %v1259_v5  ;;  %v1324_v9 = vpop.f32.mrb[17].mxu1  ;;  %v1262_v10 = vpop.f32.mrb[18].mxu0 }
 0x119   :  { %v1325_v11 = vadd.f32 %v1324_v9, %v1323_v6  ;;  %v1326_v12 = vpop.f32.mrb[18].mxu1  ;;  %v1263_v13 = vpop.f32.mrb[19].mxu0  ;;  %v1783_v9 = vld [vmem:[%s1881_s2] ss:$0 sm:$0xff] }
 0x11a   :  { %v1264_v14 = vadd.f32 %v1263_v13, %v1262_v10  ;;  %v1327_v15 = vpop.f32.mrb[19].mxu1 }
 0x11b   :  { %v1328_v16 = vadd.f32 %v1327_v15, %v1326_v12  ;;  %v743_v17 = vadd.f32 %v1325_v11, %v1261_v8 }
 0x11d   :  { %v1773_v18 = vadd.f32 %v1328_v16, %v1264_v14 }
 0x11e   :  { %v1265_v19 = vpop.f32.mrb[20].mxu0 }
 0x11f   :  { %v1329_v20 = vpop.f32.mrb[20].mxu1  ;;  %v1266_v21 = vpop.f32.mrb[21].mxu0 }
 0x120   :  { %v1267_v22 = vadd.f32 %v1266_v21, %v1265_v19  ;;  %v1330_v23 = vpop.f32.mrb[21].mxu1  ;;  %v1268_v24 = vpop.f32.mrb[22].mxu0 }
 0x121   :  { %v1331_v27 = vadd.f32 %v1330_v23, %v1329_v20  ;;  %v1332_v28 = vpop.f32.mrb[22].mxu1  ;;  %v1269_v29 = vpop.f32.mrb[23].mxu0 }
 0x122   :  { %v1270_v30 = vadd.f32 %v1269_v29, %v1268_v24  ;;  %v1333_v31 = vpop.f32.mrb[23].mxu1 }
 0x123   :  { %v1334_v32 = vadd.f32 %v1333_v31, %v1332_v28  ;;  %v751_v33 = vadd.f32 %v1331_v27, %v1267_v22 }
 0x125   :  { %v754_v34 = vadd.f32 %v1334_v32, %v1270_v30 }
 0x126   :  { %v1271_v35 = vpop.f32.mrb[24].mxu0 }
 0x127   :  { %v1335_v36 = vpop.f32.mrb[24].mxu1  ;;  %v1272_v37 = vpop.f32.mrb[25].mxu0 }
 0x128   :  { %v1273_v38 = vadd.f32 %v1272_v37, %v1271_v35  ;;  %v1336_v41 = vpop.f32.mrb[25].mxu1  ;;  %v1274_v42 = vpop.f32.mrb[26].mxu0 }
 0x129   :  { %v1337_v43 = vadd.f32 %v1336_v41, %v1335_v36  ;;  %v1338_v44 = vpop.f32.mrb[26].mxu1  ;;  %v1275_v45 = vpop.f32.mrb[27].mxu0 }
 0x12a   :  { %v1276_v46 = vadd.f32 %v1275_v45, %v1274_v42  ;;  %v1339_v47 = vpop.f32.mrb[27].mxu1 }
 0x12b   :  { %v1340_v48 = vadd.f32 %v1339_v47, %v1338_v44  ;;  %v1775_v49 = vadd.f32 %v1337_v43, %v1273_v38 }
 0x12d   :  { %v1777_v50 = vadd.f32 %v1340_v48, %v1276_v46 }
 0x12e   :  { %v1277_v51 = vpop.f32.mrb[28].mxu0 }
 0x12f   :  { %v1341_v52 = vpop.f32.mrb[28].mxu1  ;;  %v1278_v55 = vpop.f32.mrb[29].mxu0 }
 0x130   :  { %v1279_v56 = vadd.f32 %v1278_v55, %v1277_v51  ;;  %v1342_v57 = vpop.f32.mrb[29].mxu1  ;;  %v1280_v58 = vpop.f32.mrb[30].mxu0 }
 0x131   :  { %v1343_v59 = vadd.f32 %v1342_v57, %v1341_v52  ;;  %v1344_v60 = vpop.f32.mrb[30].mxu1  ;;  %v1281_v61 = vpop.f32.mrb[31].mxu0 }
 0x132   :  { %v1282_v62 = vadd.f32 %v1281_v61, %v1280_v58  ;;  %v1345_v63 = vpop.f32.mrb[31].mxu1 }
 0x133   :  { %v1346_v0 = vadd.f32 %v1345_v63, %v1344_v60  ;;  %v767_v1 = vadd.f32 %v1343_v59, %v1279_v56 }
 0x135   :  { %v770_v2 = vadd.f32 %v1346_v0, %v1282_v62 }
 0x136   :  { %v1369_v5 = vpop.f32.mrb[32].mxu0 }
 0x137   :  { %v816_v6 = vadd.f32 %v1369_v5, %v1761_v39  ;;  %v1377_v7 = vpop.f32.mrb[32].mxu1  ;;  %v807_v8 = vpop.f32.mrb[33].mxu0 }
 0x138   :  { %v1785_v10 = vadd.f32 %v1377_v7, %v751_v33  ;;  %v808_v11 = vadd.f32 %v807_v8, %v1757_v25  ;;  %v839_v12 = vpop.f32.mrb[33].mxu1  ;;  %v1370_v13 = vpop.f32.mrb[34].mxu0 }
 0x139   :  { %v1788_v14 = vadd.f32 %v839_v12, %v743_v17  ;;  %v819_v15 = vadd.f32 %v1370_v13, %v1763_v40  ;;  %v1378_v16 = vpop.f32.mrb[34].mxu1  ;;  %v810_v19 = vpop.f32.mrb[35].mxu0  ;;  %v949_v20 = vadd.f32 %v1783_v9, %v816_v6  ;;  %v893_v25 = vmul.f32 %v816_v6, %v816_v6 }
 0x13a   :  { %v842_v39 = vpop.f32.mrb[35].mxu1  ;;  %v1793_v22 = vadd.f32 %v1378_v16, %v754_v34  ;;  %v811_v23 = vadd.f32 %v810_v19, %v1759_v26  ;;  %v957_v17 = vadd.f32 %v1783_v9, %v1785_v10  ;;  %v891_v27 = vmul.f32 %v808_v11, %v808_v11 }
 0x13b   :  { %v950_v21 = vadd.f32 %v1783_v9, %v819_v15  ;;  %v1797_v24 = vadd.f32 %v842_v39, %v1773_v18  ;;  %v947_v28 = vadd.f32 %v1783_v9, %v808_v11  ;;  %v955_v26 = vadd.f32 %v1783_v9, %v1788_v14 }
 0x13c   :  { %v958_v29 = vadd.f32 %v1783_v9, %v1793_v22  ;;  %v870_v30 = vadd.f32 %v811_v23, %v808_v11  ;;  %v892_v31 = vmul.f32 %v811_v23, %v811_v23  ;;  %v948_v18 = vadd.f32 %v1783_v9, %v811_v23 }
 0x13d   :  { %v1180_v40 = vpack.c.bf16 %v950_v21, %v949_v20  ;;  %v956_v33 = vadd.f32 %v1783_v9, %v1797_v24  ;;  %v894_v51 = vmul.f32 %v819_v15, %v819_v15 }
 0x13e   :  { %v1373_v32 = vpop.f32.mrb[36].mxu0  ;;  %v1200_v37 = vpack.c.bf16 %v958_v29, %v957_v17  ;;  %v871_v38 = vadd.f32 %v870_v30, %v816_v6  ;;  %v907_v41 = vadd.f32 %v892_v31, %v891_v27  ;;  %v1175_v45 = vpack.c.bf16 %v948_v18, %v947_v28 }
 0x13f   :  { %1212 = vst [vmem:[%s1882_s3 + $0x8] sm:$0xff] %v1180_v40   ;;  %v832_v34 = vadd.f32 %v1373_v32, %v1769_v3  ;;  %v1381_v35 = vpop.f32.mrb[36].mxu1  ;;  %v823_v36 = vpop.f32.mrb[37].mxu0  ;;  %v1195_v46 = vpack.c.bf16 %v956_v33, %v955_v26  ;;  %v901_v29 = vmul.f32 %v1785_v10, %v1785_v10 }
 0x140   :  { %v1813_v42 = vadd.f32 %v1381_v35, %v767_v1  ;;  %v855_v43 = vpop.f32.mrb[37].mxu1  ;;  %v1374_v44 = vpop.f32.mrb[38].mxu0  ;;  %1216 = vst [vmem:[%s1882_s3 + $0x28] sm:$0xff] %v1200_v37   ;;  %v908_v52 = vadd.f32 %v907_v41, %v893_v25  ;;  %v824_v3 = vadd.f32 %v823_v36, %v1765_v53  ;;  %1176 = vst [vmem:[%s1882_s3] sm:$0xff] %v1175_v45  }
 0x141   :  { %v1382_v47 = vpop.f32.mrb[38].mxu1  ;;  %v826_v48 = vpop.f32.mrb[39].mxu0  ;;  %1215 = vst [vmem:[%s1882_s3 + $0x20] sm:$0xff] %v1195_v46   ;;  %v872_v56 = vadd.f32 %v871_v38, %v819_v15  ;;  %v856_v57 = vadd.f32 %v855_v43, %v1775_v49  ;;  %v835_v58 = vadd.f32 %v1374_v44, %v1771_v4  ;;  %v953_v53 = vadd.f32 %v1783_v9, %v832_v34 }
 0x142   :  { %v858_v55 = vpop.f32.mrb[39].mxu1  ;;  %v867_v59 = vadd.f32 %v1382_v47, %v770_v2  ;;  %v895_v60 = vmul.f32 %v824_v3, %v824_v3  ;;  %v909_v61 = vadd.f32 %v908_v52, %v894_v51  ;;  %v827_v62 = vadd.f32 %v826_v48, %v1767_v54 }
 0x143   :  { %v961_v63 = vadd.f32 %v1783_v9, %v1813_v42  ;;  %v873_v0 = vadd.f32 %v872_v56, %v824_v3  ;;  %v951_v5 = vadd.f32 %v1783_v9, %v824_v3  ;;  %v954_v6 = vadd.f32 %v1783_v9, %v835_v58 }
 0x144   :  { %v910_v1 = vadd.f32 %v909_v61, %v895_v60  ;;  %v962_v49 = vadd.f32 %v1783_v9, %v867_v59  ;;  %v896_v4 = vmul.f32 %v827_v62, %v827_v62  ;;  %v952_v2 = vadd.f32 %v1783_v9, %v827_v62 }
 0x145   :  { %v874_v7 = vadd.f32 %v873_v0, %v827_v62  ;;  %v859_v8 = vadd.f32 %v858_v55, %v1777_v50  ;;  %v1190_v54 = vpack.c.bf16 %v954_v6, %v953_v53  ;;  %v897_v12 = vmul.f32 %v832_v34, %v832_v34 }
 0x146   :  { %v1210_v11 = vpack.c.bf16 %v962_v49, %v961_v63  ;;  %v911_v15 = vadd.f32 %v910_v1, %v896_v4  ;;  %v1185_v16 = vpack.c.bf16 %v952_v2, %v951_v5  ;;  %v959_v19 = vadd.f32 %v1783_v9, %v856_v57 }
 0x147   :  { %v875_v13 = vadd.f32 %v874_v7, %v832_v34  ;;  %1214 = vst [vmem:[%s1882_s3 + $0x18] sm:$0xff] %v1190_v54   ;;  %v960_v39 = vadd.f32 %v1783_v9, %v859_v8  ;;  %v898_v20 = vmul.f32 %v835_v58, %v835_v58  ;;  %v899_v25 = vmul.f32 %v1788_v14, %v1788_v14 }
 0x148   :  { %1218 = vst [vmem:[%s1882_s3 + $0x38] sm:$0xff] %v1210_v11   ;;  %v912_v21 = vadd.f32 %v911_v15, %v897_v12  ;;  %1213 = vst [vmem:[%s1882_s3 + $0x10] sm:$0xff] %v1185_v16   ;;  %v900_v9 = vmul.f32 %v1797_v24, %v1797_v24  ;;  %v903_v18 = vmul.f32 %v856_v57, %v856_v57 }
 0x149   :  { %v876_v50 = vadd.f32 %v875_v13, %v835_v58  ;;  %v1205_v23 = vpack.c.bf16 %v960_v39, %v959_v19  ;;  %v904_v36 = vmul.f32 %v859_v8, %v859_v8 }
 0x14a   :  { %v913_v27 = vadd.f32 %v912_v21, %v898_v20 }
 0x14b   :  { %v877_v17 = vadd.f32 %v876_v50, %v1788_v14  ;;  %1217 = vst [vmem:[%s1882_s3 + $0x30] sm:$0xff] %v1205_v23   ;;  %v902_v14 = vmul.f32 %v1793_v22, %v1793_v22 }
 0x14c   :  { %v914_v40 = vadd.f32 %v913_v27, %v899_v25 }
 0x14d   :  { %v878_v28 = vadd.f32 %v877_v17, %v1797_v24  ;;  %v905_v24 = vmul.f32 %v1813_v42, %v1813_v42 }
 0x14e   :  { %v915_v31 = vadd.f32 %v914_v40, %v900_v9 }
 0x14f   :  { %v879_v30 = vadd.f32 %v878_v28, %v1785_v10  ;;  %v906_v10 = vmul.f32 %v867_v59, %v867_v59 }
 0x150   :  { %v916_v26 = vadd.f32 %v915_v31, %v901_v29 }
 0x151   :  { %v880_v32 = vadd.f32 %v879_v30, %v1793_v22 }
 0x152   :  { %v917_v34 = vadd.f32 %v916_v26, %v902_v14 }
 0x153   :  { %v881_v33 = vadd.f32 %v880_v32, %v856_v57  ;;  %v934_v57 = vld [vmem:[%s1879_s4] sm:$0x1] }
 0x154   :  { %v918_v37 = vadd.f32 %v917_v34, %v903_v18 }
 0x155   :  { %v882_v35 = vadd.f32 %v881_v33, %v859_v8 }
 0x156   :  { %v919_v41 = vadd.f32 %v918_v37, %v904_v36 }
 0x157   :  { %v883_v38 = vadd.f32 %v882_v35, %v1813_v42 }
 0x158   :  { %v920_v44 = vadd.f32 %v919_v41, %v905_v24 }
 0x159   :  { %v884_v43 = vadd.f32 %v883_v38, %v867_v59  ;;  %v937_v59 = vld [vmem:[%s1880_s5] sm:$0x1] }
 0x15a   :  { %v921_v46 = vadd.f32 %v920_v44, %v906_v10 }
 0x15b   :  { %v885_v45 = vrot.slane %v884_v43, 4 }
 0x15c   :  { %v922_v22 = vrot.slane %v921_v46, 4 }
 0x15d   :  { %v886_v47 = vadd.f32 %v885_v45, %v884_v43 }
 0x15e   :  { %v923_v51 = vadd.f32 %v922_v22, %v921_v46 }
 0x15f   :  { %v887_v48 = vrot.slane %v886_v47, 2 }
 0x160   :  { %v924_v3 = vrot.slane %v923_v51, 2 }
 0x161   :  { %v888_v52 = vadd.f32 %v887_v48, %v886_v47 }
 0x162   :  { %v925_v56 = vadd.f32 %v924_v3, %v923_v51 }
 0x163   :  { %v889_v55 = vrot.slane %v888_v52, 1 }
 0x164   :  { %v926_v42 = vrot.slane %v925_v56, 1 }
 0x165   :  { %v890_v58 = vadd.f32 %v889_v55, %v888_v52 }
 0x166   :  { %v927_v60 = vadd.f32 %v926_v42, %v925_v56 }
 0x167   :  { %v935_v61 = vadd.f32 %v934_v57, %v890_v58 }
 0x168   :  { %v938_v62 = vadd.f32 %v937_v59, %v927_v60 }
 0x169   :  { %936 = vst [vmem:[%s1879_s4] sm:$0x1] %v935_v61 }
 0x16a   :  { %939 = vst [vmem:[%s1880_s5] sm:$0x1] %v938_v62 }

</bundles_post_ra>
